<compile_context>
chip_gen: v7x
topology: tpu7x:2x2x1
jax: 0.10.0
libtpu: 0.0.40
codegen_flags: <defaults>
</compile_context>

<pallas_src>
import functools

import jax
import jax.numpy as jnp
from jax.experimental import pallas as pl
from jax.experimental.pallas import tpu as pltpu

# ------------------------- model hyperparameters (small) -------------------------
IN_CHANNELS = 8
OUT_CHANNELS = 1
KERNEL_SIZE = 7
CHANNELS = 16
UPSAMPLE_SCALES = [2, 2]
STACK_KERNEL_SIZE = 3
STACKS = 3
LRELU_SLOPE = 0.2


# --------------------- in-kernel tap-gather matrix builders -----------------------


def _reflect_gather_mats(t_in, k_size, dilation):
    """K one-hot (T, T) matrices; tap k of a reflection-padded dilated conv.

    x @ G_k  ==  x_reflect_pad[:, m + k*dilation]  for every output column m
    (pad = (k_size - 1) // 2 * dilation, so T_out == T).
    """
    pad = (k_size - 1) // 2 * dilation
    rows = jax.lax.broadcasted_iota(jnp.int32, (t_in, t_in), 0)   # source index t
    cols = jax.lax.broadcasted_iota(jnp.int32, (t_in, t_in), 1)   # output index m
    mats = []
    for k in range(k_size):
        i = cols + k * dilation - pad
        i = jnp.where(i < 0, -i, i)                       # left reflection
        i = jnp.where(i >= t_in, 2 * (t_in - 1) - i, i)   # right reflection
        mats.append((rows == i).astype(jnp.float32))
    return mats


def _upsample_gather_mats(t_in, scale):
    """K one-hot (T, T*scale) matrices; tap k of PyTorch ConvTranspose1d with
    kernel=2*scale, stride=scale, padding=scale//2+scale%2, output_padding=scale%2.

    y[:, m] = sum_k W_k^T @ x[:, t]  over  t*scale + k - padding == m,
    so G_k[t, m] = (t*scale + k - padding == m); invalid taps give zero columns
    (no zero-stuffed array is ever materialized).
    """
    k_size = 2 * scale
    pad = scale // 2 + scale % 2
    t_out = t_in * scale
    rows = jax.lax.broadcasted_iota(jnp.int32, (t_in, t_out), 0)
    cols = jax.lax.broadcasted_iota(jnp.int32, (t_in, t_out), 1)
    return [(rows * scale + k - pad == cols).astype(jnp.float32)
            for k in range(k_size)]


# ------------------------------- fused Pallas kernel ------------------------------


def _melgan_kernel(x_ref, *refs):
    """Whole MelGAN generator for one batch element.

    x_ref : (IN_CHANNELS, T)  channels-first mel slice.
    refs  : 44 weight refs (consumed in order) followed by the output ref
            (OUT_CHANNELS, T * prod(upsample_scales)).
    """
    o_ref = refs[-1]
    it = iter(refs[:-1])

    def nxt():
        return next(it)[...].astype(jnp.float32)

    def lrelu(v):
        return jnp.where(v >= 0, v, v * LRELU_SLOPE)

    def gathered_conv(v, gmats, w_cat, b):
        # v: (C_in, T); gmats: K x (T, T_out); w_cat: (C_out, K*C_in); b: (C_out, 1)
        taps = [jnp.dot(v, g, preferred_element_type=jnp.float32) for g in gmats]
        cols = jnp.concatenate(taps, axis=0) if len(taps) > 1 else taps[0]
        return jnp.dot(w_cat, cols, preferred_element_type=jnp.float32) + b

    def conv1x1(v, w, b):
        return jnp.dot(w, v, preferred_element_type=jnp.float32) + b

    x = x_ref[...].astype(jnp.float32)                       # (C_in, T)

    # ReflectionPad1d((K-1)//2) + Conv1d(in_channels -> channels, K)
    w, b = nxt(), nxt()
    x = gathered_conv(x, _reflect_gather_mats(x.shape[1], KERNEL_SIZE, 1), w, b)

    for _, s in enumerate(UPSAMPLE_SCALES):
        # LeakyReLU + ConvTranspose1d (stride-scatter folded into gather mats)
        w, b = nxt(), nxt()
        x = gathered_conv(lrelu(x), _upsample_gather_mats(x.shape[1], s), w, b)

        # residual stacks
        for j in range(STACKS):
            d = STACK_KERNEL_SIZE ** j
            w1 = nxt(); b1 = nxt()
            w2 = nxt(); b2 = nxt()
            w3 = nxt(); b3 = nxt()
            h = gathered_conv(
                lrelu(x), _reflect_gather_mats(x.shape[1], STACK_KERNEL_SIZE, d),
                w1, b1)
            h = conv1x1(lrelu(h), w2, b2)
            x = h + conv1x1(x, w3, b3)

    # LeakyReLU + ReflectionPad + Conv1d(-> out_channels) + Tanh
    w, b = nxt(), nxt()
    x = gathered_conv(lrelu(x), _reflect_gather_mats(x.shape[1], KERNEL_SIZE, 1),
                      w, b)
    o_ref[...] = jnp.tanh(x).astype(o_ref.dtype)


# ------------------------------ parameters ----------------------------------------


def make_params(key):
    """PyTorch-layout parameters (Conv1d: (C_out, C_in, K); ConvT: (C_in, C_out, K))."""
    params = {}
    keys = jax.random.split(key, 64)
    ki = iter(range(64))

    def nk():
        return keys[next(ki)]

    def conv_init(k, c_out, c_in, ks):
        kw, kb = jax.random.split(k)
        return dict(w=0.02 * jax.random.normal(kw, (c_out, c_in, ks), jnp.float32),
                    b=0.02 * jax.random.normal(kb, (c_out,), jnp.float32))

    def convt_init(k, c_in, c_out, ks):
        kw, kb = jax.random.split(k)
        return dict(w=0.02 * jax.random.normal(kw, (c_in, c_out, ks), jnp.float32),
                    b=0.02 * jax.random.normal(kb, (c_out,), jnp.float32))

    params["first"] = conv_init(nk(), CHANNELS, IN_CHANNELS, KERNEL_SIZE)
    for i, s in enumerate(UPSAMPLE_SCALES):
        c_in = CHANNELS // (2 ** i)
        c_out = CHANNELS // (2 ** (i + 1))
        params[f"up{i}"] = convt_init(nk(), c_in, c_out, 2 * s)
        for j in range(STACKS):
            params[f"rs{i}_{j}"] = dict(
                conv1=conv_init(nk(), c_out, c_out, STACK_KERNEL_SIZE),
                conv2=conv_init(nk(), c_out, c_out, 1),
                skip=conv_init(nk(), c_out, c_out, 1))
    c_last = CHANNELS // (2 ** len(UPSAMPLE_SCALES))
    params["final"] = conv_init(nk(), OUT_CHANNELS, c_last, KERNEL_SIZE)
    return params


def _flatten_params_for_kernel(params):
    """Kernel-layout weights: (C_out, K*C_in) concatenated-tap mats + (C_out, 1) bias."""
    flat = []

    def add_conv(p):
        w, b = p["w"], p["b"]
        c_out, c_in, ks = w.shape
        flat.append(jnp.transpose(w, (0, 2, 1)).reshape(c_out, ks * c_in))
        flat.append(b.reshape(c_out, 1))

    def add_convt(p):
        w, b = p["w"], p["b"]
        c_in, c_out, ks = w.shape
        flat.append(jnp.transpose(w, (1, 2, 0)).reshape(c_out, ks * c_in))
        flat.append(b.reshape(c_out, 1))

    add_conv(params["first"])
    for i, _ in enumerate(UPSAMPLE_SCALES):
        add_convt(params[f"up{i}"])
        for j in range(STACKS):
            rs = params[f"rs{i}_{j}"]
            add_conv(rs["conv1"])
            add_conv(rs["conv2"])
            add_conv(rs["skip"])
    add_conv(params["final"])

    assert len(flat) == 4 + (2 + 6 * STACKS) * len(UPSAMPLE_SCALES)
    return flat


# ------------------------------- forward (Pallas) ---------------------------------


def melgan_forward(params, c):
    """c: (B, in_channels, T) -> (B, out_channels, T * prod(upsample_scales))."""
    b_sz, c_in, t_in = c.shape
    t_out = t_in
    for s in UPSAMPLE_SCALES:
        t_out *= s

    flat = _flatten_params_for_kernel(params)

    in_specs = [pl.BlockSpec((None, c_in, t_in), lambda b: (b, 0, 0))]
    in_specs += [pl.BlockSpec(p.shape, lambda b: (0, 0)) for p in flat]

    return pl.pallas_call(
        _melgan_kernel,
        out_shape=jax.ShapeDtypeStruct((b_sz, OUT_CHANNELS, t_out), c.dtype),
        grid=(b_sz,),
        in_specs=in_specs,
        out_specs=pl.BlockSpec((None, OUT_CHANNELS, t_out), lambda b: (b, 0, 0)),
        compiler_params=pltpu.CompilerParams(
            dimension_semantics=("parallel",)),
    )(c, *flat)


# ----------------------- pure-JAX reference (correctness check) -------------------


def melgan_reference(params, c):
    """Plain-XLA reference with PyTorch Conv1d / ConvTranspose1d semantics."""
    dn = ("NCH", "OIH", "NCH")
    hi = jax.lax.Precision.HIGHEST

    def lrelu(v):
        return jnp.where(v >= 0, v, LRELU_SLOPE * v)

    def conv(v, p, dilation=1, reflect=0):
        if reflect:
            v = jnp.pad(v, ((0, 0), (0, 0), (reflect, reflect)), mode="reflect")
        y = jax.lax.conv_general_dilated(
            v, p["w"], window_strides=(1,), padding="VALID",
            rhs_dilation=(dilation,), dimension_numbers=dn, precision=hi)
        return y + p["b"][None, :, None]

    def conv_transpose(v, p, scale):
        ks = 2 * scale
        pad = scale // 2 + scale % 2
        opad = scale % 2
        w = jnp.flip(jnp.transpose(p["w"], (1, 0, 2)), axis=2)
        y = jax.lax.conv_general_dilated(
            v, w, window_strides=(1,),
            padding=[(ks - 1 - pad, ks - 1 - pad + opad)],
            lhs_dilation=(scale,), dimension_numbers=dn, precision=hi)
        return y + p["b"][None, :, None]

    x = conv(c, params["first"], reflect=(KERNEL_SIZE - 1) // 2)
    for i, s in enumerate(UPSAMPLE_SCALES):
        x = conv_transpose(lrelu(x), params[f"up{i}"], s)
        for j in range(STACKS):
            rs = params[f"rs{i}_{j}"]
            d = STACK_KERNEL_SIZE ** j
            h = conv(lrelu(x), rs["conv1"], dilation=d,
                     reflect=(STACK_KERNEL_SIZE - 1) // 2 * d)
            h = conv(lrelu(h), rs["conv2"])
            x = h + conv(x, rs["skip"])
    x = conv(lrelu(x), params["final"], reflect=(KERNEL_SIZE - 1) // 2)
    return jnp.tanh(x)


# --------------------------------- main --------------------------------------------

if __name__ == "__main__":
    key = jax.random.PRNGKey(0)
    k_params, k_input = jax.random.split(key)

    params = make_params(k_params)

    B, T = 2, 8
    c = jax.random.normal(k_input, (B, IN_CHANNELS, T), jnp.float32)

    fwd = jax.jit(functools.partial(melgan_forward, params))
    out = jax.block_until_ready(fwd(c))

    upsample_factor = 1
    for s in UPSAMPLE_SCALES:
        upsample_factor *= s
    assert out.shape == (B, OUT_CHANNELS, T * upsample_factor), out.shape
    assert bool(jnp.all(jnp.isfinite(out)))
    assert bool(jnp.all(jnp.abs(out) <= 1.0))

    ref = jax.block_until_ready(
        jax.jit(functools.partial(melgan_reference, params))(c))
    max_diff = float(jnp.max(jnp.abs(out - ref)))
    assert jnp.allclose(out, ref, rtol=2e-2, atol=2e-4), max_diff

    print("KERNEL_OK")
</pallas_src>

<mosaic_0001>
module attributes {stable_mosaic.version = 11 : i64} {
  func.func @_melgan_kernel(%arg0: i32, %arg1: memref<1x8x8xf32, #tpu.memory_space<vmem>>, %arg2: memref<16x56xf32, #tpu.memory_space<vmem>>, %arg3: memref<16x1xf32, #tpu.memory_space<vmem>>, %arg4: memref<8x64xf32, #tpu.memory_space<vmem>>, %arg5: memref<8x1xf32, #tpu.memory_space<vmem>>, %arg6: memref<8x24xf32, #tpu.memory_space<vmem>>, %arg7: memref<8x1xf32, #tpu.memory_space<vmem>>, %arg8: memref<8x8xf32, #tpu.memory_space<vmem>>, %arg9: memref<8x1xf32, #tpu.memory_space<vmem>>, %arg10: memref<8x8xf32, #tpu.memory_space<vmem>>, %arg11: memref<8x1xf32, #tpu.memory_space<vmem>>, %arg12: memref<8x24xf32, #tpu.memory_space<vmem>>, %arg13: memref<8x1xf32, #tpu.memory_space<vmem>>, %arg14: memref<8x8xf32, #tpu.memory_space<vmem>>, %arg15: memref<8x1xf32, #tpu.memory_space<vmem>>, %arg16: memref<8x8xf32, #tpu.memory_space<vmem>>, %arg17: memref<8x1xf32, #tpu.memory_space<vmem>>, %arg18: memref<8x24xf32, #tpu.memory_space<vmem>>, %arg19: memref<8x1xf32, #tpu.memory_space<vmem>>, %arg20: memref<8x8xf32, #tpu.memory_space<vmem>>, %arg21: memref<8x1xf32, #tpu.memory_space<vmem>>, %arg22: memref<8x8xf32, #tpu.memory_space<vmem>>, %arg23: memref<8x1xf32, #tpu.memory_space<vmem>>, %arg24: memref<4x32xf32, #tpu.memory_space<vmem>>, %arg25: memref<4x1xf32, #tpu.memory_space<vmem>>, %arg26: memref<4x12xf32, #tpu.memory_space<vmem>>, %arg27: memref<4x1xf32, #tpu.memory_space<vmem>>, %arg28: memref<4x4xf32, #tpu.memory_space<vmem>>, %arg29: memref<4x1xf32, #tpu.memory_space<vmem>>, %arg30: memref<4x4xf32, #tpu.memory_space<vmem>>, %arg31: memref<4x1xf32, #tpu.memory_space<vmem>>, %arg32: memref<4x12xf32, #tpu.memory_space<vmem>>, %arg33: memref<4x1xf32, #tpu.memory_space<vmem>>, %arg34: memref<4x4xf32, #tpu.memory_space<vmem>>, %arg35: memref<4x1xf32, #tpu.memory_space<vmem>>, %arg36: memref<4x4xf32, #tpu.memory_space<vmem>>, %arg37: memref<4x1xf32, #tpu.memory_space<vmem>>, %arg38: memref<4x12xf32, #tpu.memory_space<vmem>>, %arg39: memref<4x1xf32, #tpu.memory_space<vmem>>, %arg40: memref<4x4xf32, #tpu.memory_space<vmem>>, %arg41: memref<4x1xf32, #tpu.memory_space<vmem>>, %arg42: memref<4x4xf32, #tpu.memory_space<vmem>>, %arg43: memref<4x1xf32, #tpu.memory_space<vmem>>, %arg44: memref<1x28xf32, #tpu.memory_space<vmem>>, %arg45: memref<1x1xf32, #tpu.memory_space<vmem>>, %arg46: memref<1x1x32xf32, #tpu.memory_space<vmem>>) attributes {dimension_semantics = [#tpu.dimension_semantics<parallel>], iteration_bounds = array<i64: 2>, scalar_prefetch = 0 : i64, scratch_operands = 0 : i64, tpu.core_type = #tpu.core_type<tc>, window_params = [{transform_indices = @transform_0, window_bounds = array<i64: 1, 8, 8>}, {pipeline_mode = #tpu.pipeline_mode<synchronous>, transform_indices = @transform_1, window_bounds = array<i64: 16, 56>}, {pipeline_mode = #tpu.pipeline_mode<synchronous>, transform_indices = @transform_2, window_bounds = array<i64: 16, 1>}, {pipeline_mode = #tpu.pipeline_mode<synchronous>, transform_indices = @transform_3, window_bounds = array<i64: 8, 64>}, {pipeline_mode = #tpu.pipeline_mode<synchronous>, transform_indices = @transform_4, window_bounds = array<i64: 8, 1>}, {pipeline_mode = #tpu.pipeline_mode<synchronous>, transform_indices = @transform_5, window_bounds = array<i64: 8, 24>}, {pipeline_mode = #tpu.pipeline_mode<synchronous>, transform_indices = @transform_6, window_bounds = array<i64: 8, 1>}, {pipeline_mode = #tpu.pipeline_mode<synchronous>, transform_indices = @transform_7, window_bounds = array<i64: 8, 8>}, {pipeline_mode = #tpu.pipeline_mode<synchronous>, transform_indices = @transform_8, window_bounds = array<i64: 8, 1>}, {pipeline_mode = #tpu.pipeline_mode<synchronous>, transform_indices = @transform_9, window_bounds = array<i64: 8, 8>}, {pipeline_mode = #tpu.pipeline_mode<synchronous>, transform_indices = @transform_10, window_bounds = array<i64: 8, 1>}, {pipeline_mode = #tpu.pipeline_mode<synchronous>, transform_indices = @transform_11, window_bounds = array<i64: 8, 24>}, {pipeline_mode = #tpu.pipeline_mode<synchronous>, transform_indices = @transform_12, window_bounds = array<i64: 8, 1>}, {pipeline_mode = #tpu.pipeline_mode<synchronous>, transform_indices = @transform_13, window_bounds = array<i64: 8, 8>}, {pipeline_mode = #tpu.pipeline_mode<synchronous>, transform_indices = @transform_14, window_bounds = array<i64: 8, 1>}, {pipeline_mode = #tpu.pipeline_mode<synchronous>, transform_indices = @transform_15, window_bounds = array<i64: 8, 8>}, {pipeline_mode = #tpu.pipeline_mode<synchronous>, transform_indices = @transform_16, window_bounds = array<i64: 8, 1>}, {pipeline_mode = #tpu.pipeline_mode<synchronous>, transform_indices = @transform_17, window_bounds = array<i64: 8, 24>}, {pipeline_mode = #tpu.pipeline_mode<synchronous>, transform_indices = @transform_18, window_bounds = array<i64: 8, 1>}, {pipeline_mode = #tpu.pipeline_mode<synchronous>, transform_indices = @transform_19, window_bounds = array<i64: 8, 8>}, {pipeline_mode = #tpu.pipeline_mode<synchronous>, transform_indices = @transform_20, window_bounds = array<i64: 8, 1>}, {pipeline_mode = #tpu.pipeline_mode<synchronous>, transform_indices = @transform_21, window_bounds = array<i64: 8, 8>}, {pipeline_mode = #tpu.pipeline_mode<synchronous>, transform_indices = @transform_22, window_bounds = array<i64: 8, 1>}, {pipeline_mode = #tpu.pipeline_mode<synchronous>, transform_indices = @transform_23, window_bounds = array<i64: 4, 32>}, {pipeline_mode = #tpu.pipeline_mode<synchronous>, transform_indices = @transform_24, window_bounds = array<i64: 4, 1>}, {pipeline_mode = #tpu.pipeline_mode<synchronous>, transform_indices = @transform_25, window_bounds = array<i64: 4, 12>}, {pipeline_mode = #tpu.pipeline_mode<synchronous>, transform_indices = @transform_26, window_bounds = array<i64: 4, 1>}, {pipeline_mode = #tpu.pipeline_mode<synchronous>, transform_indices = @transform_27, window_bounds = array<i64: 4, 4>}, {pipeline_mode = #tpu.pipeline_mode<synchronous>, transform_indices = @transform_28, window_bounds = array<i64: 4, 1>}, {pipeline_mode = #tpu.pipeline_mode<synchronous>, transform_indices = @transform_29, window_bounds = array<i64: 4, 4>}, {pipeline_mode = #tpu.pipeline_mode<synchronous>, transform_indices = @transform_30, window_bounds = array<i64: 4, 1>}, {pipeline_mode = #tpu.pipeline_mode<synchronous>, transform_indices = @transform_31, window_bounds = array<i64: 4, 12>}, {pipeline_mode = #tpu.pipeline_mode<synchronous>, transform_indices = @transform_32, window_bounds = array<i64: 4, 1>}, {pipeline_mode = #tpu.pipeline_mode<synchronous>, transform_indices = @transform_33, window_bounds = array<i64: 4, 4>}, {pipeline_mode = #tpu.pipeline_mode<synchronous>, transform_indices = @transform_34, window_bounds = array<i64: 4, 1>}, {pipeline_mode = #tpu.pipeline_mode<synchronous>, transform_indices = @transform_35, window_bounds = array<i64: 4, 4>}, {pipeline_mode = #tpu.pipeline_mode<synchronous>, transform_indices = @transform_36, window_bounds = array<i64: 4, 1>}, {pipeline_mode = #tpu.pipeline_mode<synchronous>, transform_indices = @transform_37, window_bounds = array<i64: 4, 12>}, {pipeline_mode = #tpu.pipeline_mode<synchronous>, transform_indices = @transform_38, window_bounds = array<i64: 4, 1>}, {pipeline_mode = #tpu.pipeline_mode<synchronous>, transform_indices = @transform_39, window_bounds = array<i64: 4, 4>}, {pipeline_mode = #tpu.pipeline_mode<synchronous>, transform_indices = @transform_40, window_bounds = array<i64: 4, 1>}, {pipeline_mode = #tpu.pipeline_mode<synchronous>, transform_indices = @transform_41, window_bounds = array<i64: 4, 4>}, {pipeline_mode = #tpu.pipeline_mode<synchronous>, transform_indices = @transform_42, window_bounds = array<i64: 4, 1>}, {pipeline_mode = #tpu.pipeline_mode<synchronous>, transform_indices = @transform_43, window_bounds = array<i64: 1, 28>}, {pipeline_mode = #tpu.pipeline_mode<synchronous>, transform_indices = @transform_44, window_bounds = array<i64: 1, 1>}, {transform_indices = @transform_45, window_bounds = array<i64: 1, 1, 32>}]} {
    %c0 = arith.constant 0 : index
    %c0_0 = arith.constant 0 : index
    %c0_1 = arith.constant 0 : index
    %0 = vector.load %arg1[%c0, %c0_0, %c0_1] : memref<1x8x8xf32, #tpu.memory_space<vmem>>, vector<1x8x8xf32>
    %1 = vector.shape_cast %0 : vector<1x8x8xf32> to vector<8x8xf32>
    %c0_2 = arith.constant 0 : index
    %c0_3 = arith.constant 0 : index
    %2 = vector.load %arg2[%c0_2, %c0_3] : memref<16x56xf32, #tpu.memory_space<vmem>>, vector<16x56xf32>
    %c0_4 = arith.constant 0 : index
    %c0_5 = arith.constant 0 : index
    %3 = vector.load %arg3[%c0_4, %c0_5] : memref<16x1xf32, #tpu.memory_space<vmem>>, vector<16x1xf32>
    %4 = tpu.iota {dimensions = array<i32: 0>} : vector<8x8xi32>
    %5 = tpu.iota {dimensions = array<i32: 1>} : vector<8x8xi32>
    %c0_i32 = arith.constant 0 : i32
    %6 = vector.broadcast %c0_i32 : i32 to vector<8x8xi32>
    %7 = arith.addi %5, %6 : vector<8x8xi32>
    %c3_i32 = arith.constant 3 : i32
    %8 = vector.broadcast %c3_i32 : i32 to vector<8x8xi32>
    %9 = arith.subi %7, %8 : vector<8x8xi32>
    %c0_i32_6 = arith.constant 0 : i32
    %10 = vector.broadcast %c0_i32_6 : i32 to vector<8x8xi32>
    %11 = arith.cmpi slt, %9, %10 : vector<8x8xi32>
    %c0_i32_7 = arith.constant 0 : i32
    %12 = vector.broadcast %c0_i32_7 : i32 to vector<8x8xi32>
    %13 = arith.subi %12, %9 : vector<8x8xi32>
    %14 = arith.select %11, %13, %9 : vector<8x8xi1>, vector<8x8xi32>
    %c8_i32 = arith.constant 8 : i32
    %15 = vector.broadcast %c8_i32 : i32 to vector<8x8xi32>
    %16 = arith.cmpi sge, %14, %15 : vector<8x8xi32>
    %c14_i32 = arith.constant 14 : i32
    %17 = vector.broadcast %c14_i32 : i32 to vector<8x8xi32>
    %18 = arith.subi %17, %14 : vector<8x8xi32>
    %19 = arith.select %16, %18, %14 : vector<8x8xi1>, vector<8x8xi32>
    %20 = arith.cmpi eq, %4, %19 : vector<8x8xi32>
    %21 = arith.extui %20 : vector<8x8xi1> to vector<8x8xi32>
    %22 = arith.sitofp %21 : vector<8x8xi32> to vector<8x8xf32>
    %c1_i32 = arith.constant 1 : i32
    %23 = vector.broadcast %c1_i32 : i32 to vector<8x8xi32>
    %24 = arith.addi %5, %23 : vector<8x8xi32>
    %c3_i32_8 = arith.constant 3 : i32
    %25 = vector.broadcast %c3_i32_8 : i32 to vector<8x8xi32>
    %26 = arith.subi %24, %25 : vector<8x8xi32>
    %c0_i32_9 = arith.constant 0 : i32
    %27 = vector.broadcast %c0_i32_9 : i32 to vector<8x8xi32>
    %28 = arith.cmpi slt, %26, %27 : vector<8x8xi32>
    %c0_i32_10 = arith.constant 0 : i32
    %29 = vector.broadcast %c0_i32_10 : i32 to vector<8x8xi32>
    %30 = arith.subi %29, %26 : vector<8x8xi32>
    %31 = arith.select %28, %30, %26 : vector<8x8xi1>, vector<8x8xi32>
    %c8_i32_11 = arith.constant 8 : i32
    %32 = vector.broadcast %c8_i32_11 : i32 to vector<8x8xi32>
    %33 = arith.cmpi sge, %31, %32 : vector<8x8xi32>
    %c14_i32_12 = arith.constant 14 : i32
    %34 = vector.broadcast %c14_i32_12 : i32 to vector<8x8xi32>
    %35 = arith.subi %34, %31 : vector<8x8xi32>
    %36 = arith.select %33, %35, %31 : vector<8x8xi1>, vector<8x8xi32>
    %37 = arith.cmpi eq, %4, %36 : vector<8x8xi32>
    %38 = arith.extui %37 : vector<8x8xi1> to vector<8x8xi32>
    %39 = arith.sitofp %38 : vector<8x8xi32> to vector<8x8xf32>
    %c2_i32 = arith.constant 2 : i32
    %40 = vector.broadcast %c2_i32 : i32 to vector<8x8xi32>
    %41 = arith.addi %5, %40 : vector<8x8xi32>
    %c3_i32_13 = arith.constant 3 : i32
    %42 = vector.broadcast %c3_i32_13 : i32 to vector<8x8xi32>
    %43 = arith.subi %41, %42 : vector<8x8xi32>
    %c0_i32_14 = arith.constant 0 : i32
    %44 = vector.broadcast %c0_i32_14 : i32 to vector<8x8xi32>
    %45 = arith.cmpi slt, %43, %44 : vector<8x8xi32>
    %c0_i32_15 = arith.constant 0 : i32
    %46 = vector.broadcast %c0_i32_15 : i32 to vector<8x8xi32>
    %47 = arith.subi %46, %43 : vector<8x8xi32>
    %48 = arith.select %45, %47, %43 : vector<8x8xi1>, vector<8x8xi32>
    %c8_i32_16 = arith.constant 8 : i32
    %49 = vector.broadcast %c8_i32_16 : i32 to vector<8x8xi32>
    %50 = arith.cmpi sge, %48, %49 : vector<8x8xi32>
    %c14_i32_17 = arith.constant 14 : i32
    %51 = vector.broadcast %c14_i32_17 : i32 to vector<8x8xi32>
    %52 = arith.subi %51, %48 : vector<8x8xi32>
    %53 = arith.select %50, %52, %48 : vector<8x8xi1>, vector<8x8xi32>
    %54 = arith.cmpi eq, %4, %53 : vector<8x8xi32>
    %55 = arith.extui %54 : vector<8x8xi1> to vector<8x8xi32>
    %56 = arith.sitofp %55 : vector<8x8xi32> to vector<8x8xf32>
    %c3_i32_18 = arith.constant 3 : i32
    %57 = vector.broadcast %c3_i32_18 : i32 to vector<8x8xi32>
    %58 = arith.addi %5, %57 : vector<8x8xi32>
    %c3_i32_19 = arith.constant 3 : i32
    %59 = vector.broadcast %c3_i32_19 : i32 to vector<8x8xi32>
    %60 = arith.subi %58, %59 : vector<8x8xi32>
    %c0_i32_20 = arith.constant 0 : i32
    %61 = vector.broadcast %c0_i32_20 : i32 to vector<8x8xi32>
    %62 = arith.cmpi slt, %60, %61 : vector<8x8xi32>
    %c0_i32_21 = arith.constant 0 : i32
    %63 = vector.broadcast %c0_i32_21 : i32 to vector<8x8xi32>
    %64 = arith.subi %63, %60 : vector<8x8xi32>
    %65 = arith.select %62, %64, %60 : vector<8x8xi1>, vector<8x8xi32>
    %c8_i32_22 = arith.constant 8 : i32
    %66 = vector.broadcast %c8_i32_22 : i32 to vector<8x8xi32>
    %67 = arith.cmpi sge, %65, %66 : vector<8x8xi32>
    %c14_i32_23 = arith.constant 14 : i32
    %68 = vector.broadcast %c14_i32_23 : i32 to vector<8x8xi32>
    %69 = arith.subi %68, %65 : vector<8x8xi32>
    %70 = arith.select %67, %69, %65 : vector<8x8xi1>, vector<8x8xi32>
    %71 = arith.cmpi eq, %4, %70 : vector<8x8xi32>
    %72 = arith.extui %71 : vector<8x8xi1> to vector<8x8xi32>
    %73 = arith.sitofp %72 : vector<8x8xi32> to vector<8x8xf32>
    %c4_i32 = arith.constant 4 : i32
    %74 = vector.broadcast %c4_i32 : i32 to vector<8x8xi32>
    %75 = arith.addi %5, %74 : vector<8x8xi32>
    %c3_i32_24 = arith.constant 3 : i32
    %76 = vector.broadcast %c3_i32_24 : i32 to vector<8x8xi32>
    %77 = arith.subi %75, %76 : vector<8x8xi32>
    %c0_i32_25 = arith.constant 0 : i32
    %78 = vector.broadcast %c0_i32_25 : i32 to vector<8x8xi32>
    %79 = arith.cmpi slt, %77, %78 : vector<8x8xi32>
    %c0_i32_26 = arith.constant 0 : i32
    %80 = vector.broadcast %c0_i32_26 : i32 to vector<8x8xi32>
    %81 = arith.subi %80, %77 : vector<8x8xi32>
    %82 = arith.select %79, %81, %77 : vector<8x8xi1>, vector<8x8xi32>
    %c8_i32_27 = arith.constant 8 : i32
    %83 = vector.broadcast %c8_i32_27 : i32 to vector<8x8xi32>
    %84 = arith.cmpi sge, %82, %83 : vector<8x8xi32>
    %c14_i32_28 = arith.constant 14 : i32
    %85 = vector.broadcast %c14_i32_28 : i32 to vector<8x8xi32>
    %86 = arith.subi %85, %82 : vector<8x8xi32>
    %87 = arith.select %84, %86, %82 : vector<8x8xi1>, vector<8x8xi32>
    %88 = arith.cmpi eq, %4, %87 : vector<8x8xi32>
    %89 = arith.extui %88 : vector<8x8xi1> to vector<8x8xi32>
    %90 = arith.sitofp %89 : vector<8x8xi32> to vector<8x8xf32>
    %c5_i32 = arith.constant 5 : i32
    %91 = vector.broadcast %c5_i32 : i32 to vector<8x8xi32>
    %92 = arith.addi %5, %91 : vector<8x8xi32>
    %c3_i32_29 = arith.constant 3 : i32
    %93 = vector.broadcast %c3_i32_29 : i32 to vector<8x8xi32>
    %94 = arith.subi %92, %93 : vector<8x8xi32>
    %c0_i32_30 = arith.constant 0 : i32
    %95 = vector.broadcast %c0_i32_30 : i32 to vector<8x8xi32>
    %96 = arith.cmpi slt, %94, %95 : vector<8x8xi32>
    %c0_i32_31 = arith.constant 0 : i32
    %97 = vector.broadcast %c0_i32_31 : i32 to vector<8x8xi32>
    %98 = arith.subi %97, %94 : vector<8x8xi32>
    %99 = arith.select %96, %98, %94 : vector<8x8xi1>, vector<8x8xi32>
    %c8_i32_32 = arith.constant 8 : i32
    %100 = vector.broadcast %c8_i32_32 : i32 to vector<8x8xi32>
    %101 = arith.cmpi sge, %99, %100 : vector<8x8xi32>
    %c14_i32_33 = arith.constant 14 : i32
    %102 = vector.broadcast %c14_i32_33 : i32 to vector<8x8xi32>
    %103 = arith.subi %102, %99 : vector<8x8xi32>
    %104 = arith.select %101, %103, %99 : vector<8x8xi1>, vector<8x8xi32>
    %105 = arith.cmpi eq, %4, %104 : vector<8x8xi32>
    %106 = arith.extui %105 : vector<8x8xi1> to vector<8x8xi32>
    %107 = arith.sitofp %106 : vector<8x8xi32> to vector<8x8xf32>
    %c6_i32 = arith.constant 6 : i32
    %108 = vector.broadcast %c6_i32 : i32 to vector<8x8xi32>
    %109 = arith.addi %5, %108 : vector<8x8xi32>
    %c3_i32_34 = arith.constant 3 : i32
    %110 = vector.broadcast %c3_i32_34 : i32 to vector<8x8xi32>
    %111 = arith.subi %109, %110 : vector<8x8xi32>
    %c0_i32_35 = arith.constant 0 : i32
    %112 = vector.broadcast %c0_i32_35 : i32 to vector<8x8xi32>
    %113 = arith.cmpi slt, %111, %112 : vector<8x8xi32>
    %c0_i32_36 = arith.constant 0 : i32
    %114 = vector.broadcast %c0_i32_36 : i32 to vector<8x8xi32>
    %115 = arith.subi %114, %111 : vector<8x8xi32>
    %116 = arith.select %113, %115, %111 : vector<8x8xi1>, vector<8x8xi32>
    %c8_i32_37 = arith.constant 8 : i32
    %117 = vector.broadcast %c8_i32_37 : i32 to vector<8x8xi32>
    %118 = arith.cmpi sge, %116, %117 : vector<8x8xi32>
    %c14_i32_38 = arith.constant 14 : i32
    %119 = vector.broadcast %c14_i32_38 : i32 to vector<8x8xi32>
    %120 = arith.subi %119, %116 : vector<8x8xi32>
    %121 = arith.select %118, %120, %116 : vector<8x8xi1>, vector<8x8xi32>
    %122 = arith.cmpi eq, %4, %121 : vector<8x8xi32>
    %123 = arith.extui %122 : vector<8x8xi1> to vector<8x8xi32>
    %124 = arith.sitofp %123 : vector<8x8xi32> to vector<8x8xf32>
    %cst = arith.constant dense<0.000000e+00> : vector<8x8xf32>
    %125 = tpu.matmul %1, %22, %cst {dimension_numbers = #tpu.dot_dimension_numbers<[1], [0], [0], [1], [0, 0, 1, 1], [], []>} : vector<8x8xf32>, vector<8x8xf32>, vector<8x8xf32> -> vector<8x8xf32>
    %cst_39 = arith.constant dense<0.000000e+00> : vector<8x8xf32>
    %126 = tpu.matmul %1, %39, %cst_39 {dimension_numbers = #tpu.dot_dimension_numbers<[1], [0], [0], [1], [0, 0, 1, 1], [], []>} : vector<8x8xf32>, vector<8x8xf32>, vector<8x8xf32> -> vector<8x8xf32>
    %cst_40 = arith.constant dense<0.000000e+00> : vector<8x8xf32>
    %127 = tpu.matmul %1, %56, %cst_40 {dimension_numbers = #tpu.dot_dimension_numbers<[1], [0], [0], [1], [0, 0, 1, 1], [], []>} : vector<8x8xf32>, vector<8x8xf32>, vector<8x8xf32> -> vector<8x8xf32>
    %cst_41 = arith.constant dense<0.000000e+00> : vector<8x8xf32>
    %128 = tpu.matmul %1, %73, %cst_41 {dimension_numbers = #tpu.dot_dimension_numbers<[1], [0], [0], [1], [0, 0, 1, 1], [], []>} : vector<8x8xf32>, vector<8x8xf32>, vector<8x8xf32> -> vector<8x8xf32>
    %cst_42 = arith.constant dense<0.000000e+00> : vector<8x8xf32>
    %129 = tpu.matmul %1, %90, %cst_42 {dimension_numbers = #tpu.dot_dimension_numbers<[1], [0], [0], [1], [0, 0, 1, 1], [], []>} : vector<8x8xf32>, vector<8x8xf32>, vector<8x8xf32> -> vector<8x8xf32>
    %cst_43 = arith.constant dense<0.000000e+00> : vector<8x8xf32>
    %130 = tpu.matmul %1, %107, %cst_43 {dimension_numbers = #tpu.dot_dimension_numbers<[1], [0], [0], [1], [0, 0, 1, 1], [], []>} : vector<8x8xf32>, vector<8x8xf32>, vector<8x8xf32> -> vector<8x8xf32>
    %cst_44 = arith.constant dense<0.000000e+00> : vector<8x8xf32>
    %131 = tpu.matmul %1, %124, %cst_44 {dimension_numbers = #tpu.dot_dimension_numbers<[1], [0], [0], [1], [0, 0, 1, 1], [], []>} : vector<8x8xf32>, vector<8x8xf32>, vector<8x8xf32> -> vector<8x8xf32>
    %132 = tpu.concatenate %125, %126, %127, %128, %129, %130, %131 in 0 : vector<8x8xf32>, vector<8x8xf32>, vector<8x8xf32>, vector<8x8xf32>, vector<8x8xf32>, vector<8x8xf32>, vector<8x8xf32> -> vector<56x8xf32>
    %cst_45 = arith.constant dense<0.000000e+00> : vector<16x8xf32>
    %133 = tpu.matmul %2, %132, %cst_45 {dimension_numbers = #tpu.dot_dimension_numbers<[1], [0], [0], [1], [0, 0, 1, 1], [], []>} : vector<16x56xf32>, vector<56x8xf32>, vector<16x8xf32> -> vector<16x8xf32>
    %134 = vector.broadcast %3 : vector<16x1xf32> to vector<16x8xf32>
    %135 = arith.addf %133, %134 : vector<16x8xf32>
    %c0_46 = arith.constant 0 : index
    %c0_47 = arith.constant 0 : index
    %136 = vector.load %arg4[%c0_46, %c0_47] : memref<8x64xf32, #tpu.memory_space<vmem>>, vector<8x64xf32>
    %c0_48 = arith.constant 0 : index
    %c0_49 = arith.constant 0 : index
    %137 = vector.load %arg5[%c0_48, %c0_49] : memref<8x1xf32, #tpu.memory_space<vmem>>, vector<8x1xf32>
    %cst_50 = arith.constant 0.000000e+00 : f32
    %138 = vector.broadcast %cst_50 : f32 to vector<16x8xf32>
    %139 = arith.cmpf oge, %135, %138 : vector<16x8xf32>
    %cst_51 = arith.constant 2.000000e-01 : f32
    %140 = vector.broadcast %cst_51 : f32 to vector<16x8xf32>
    %141 = arith.mulf %135, %140 : vector<16x8xf32>
    %142 = arith.select %139, %135, %141 : vector<16x8xi1>, vector<16x8xf32>
    %143 = tpu.iota {dimensions = array<i32: 0>} : vector<8x16xi32>
    %144 = tpu.iota {dimensions = array<i32: 1>} : vector<8x16xi32>
    %c2_i32_52 = arith.constant 2 : i32
    %145 = vector.broadcast %c2_i32_52 : i32 to vector<8x16xi32>
    %146 = arith.muli %143, %145 : vector<8x16xi32>
    %c0_i32_53 = arith.constant 0 : i32
    %147 = vector.broadcast %c0_i32_53 : i32 to vector<8x16xi32>
    %148 = arith.addi %146, %147 : vector<8x16xi32>
    %c1_i32_54 = arith.constant 1 : i32
    %149 = vector.broadcast %c1_i32_54 : i32 to vector<8x16xi32>
    %150 = arith.subi %148, %149 : vector<8x16xi32>
    %151 = arith.cmpi eq, %150, %144 : vector<8x16xi32>
    %152 = arith.extui %151 : vector<8x16xi1> to vector<8x16xi32>
    %153 = arith.sitofp %152 : vector<8x16xi32> to vector<8x16xf32>
    %c2_i32_55 = arith.constant 2 : i32
    %154 = vector.broadcast %c2_i32_55 : i32 to vector<8x16xi32>
    %155 = arith.muli %143, %154 : vector<8x16xi32>
    %c1_i32_56 = arith.constant 1 : i32
    %156 = vector.broadcast %c1_i32_56 : i32 to vector<8x16xi32>
    %157 = arith.addi %155, %156 : vector<8x16xi32>
    %c1_i32_57 = arith.constant 1 : i32
    %158 = vector.broadcast %c1_i32_57 : i32 to vector<8x16xi32>
    %159 = arith.subi %157, %158 : vector<8x16xi32>
    %160 = arith.cmpi eq, %159, %144 : vector<8x16xi32>
    %161 = arith.extui %160 : vector<8x16xi1> to vector<8x16xi32>
    %162 = arith.sitofp %161 : vector<8x16xi32> to vector<8x16xf32>
    %c2_i32_58 = arith.constant 2 : i32
    %163 = vector.broadcast %c2_i32_58 : i32 to vector<8x16xi32>
    %164 = arith.muli %143, %163 : vector<8x16xi32>
    %c2_i32_59 = arith.constant 2 : i32
    %165 = vector.broadcast %c2_i32_59 : i32 to vector<8x16xi32>
    %166 = arith.addi %164, %165 : vector<8x16xi32>
    %c1_i32_60 = arith.constant 1 : i32
    %167 = vector.broadcast %c1_i32_60 : i32 to vector<8x16xi32>
    %168 = arith.subi %166, %167 : vector<8x16xi32>
    %169 = arith.cmpi eq, %168, %144 : vector<8x16xi32>
    %170 = arith.extui %169 : vector<8x16xi1> to vector<8x16xi32>
    %171 = arith.sitofp %170 : vector<8x16xi32> to vector<8x16xf32>
    %c2_i32_61 = arith.constant 2 : i32
    %172 = vector.broadcast %c2_i32_61 : i32 to vector<8x16xi32>
    %173 = arith.muli %143, %172 : vector<8x16xi32>
    %c3_i32_62 = arith.constant 3 : i32
    %174 = vector.broadcast %c3_i32_62 : i32 to vector<8x16xi32>
    %175 = arith.addi %173, %174 : vector<8x16xi32>
    %c1_i32_63 = arith.constant 1 : i32
    %176 = vector.broadcast %c1_i32_63 : i32 to vector<8x16xi32>
    %177 = arith.subi %175, %176 : vector<8x16xi32>
    %178 = arith.cmpi eq, %177, %144 : vector<8x16xi32>
    %179 = arith.extui %178 : vector<8x16xi1> to vector<8x16xi32>
    %180 = arith.sitofp %179 : vector<8x16xi32> to vector<8x16xf32>
    %cst_64 = arith.constant dense<0.000000e+00> : vector<16x16xf32>
    %181 = tpu.matmul %142, %153, %cst_64 {dimension_numbers = #tpu.dot_dimension_numbers<[1], [0], [0], [1], [0, 0, 1, 1], [], []>} : vector<16x8xf32>, vector<8x16xf32>, vector<16x16xf32> -> vector<16x16xf32>
    %cst_65 = arith.constant dense<0.000000e+00> : vector<16x16xf32>
    %182 = tpu.matmul %142, %162, %cst_65 {dimension_numbers = #tpu.dot_dimension_numbers<[1], [0], [0], [1], [0, 0, 1, 1], [], []>} : vector<16x8xf32>, vector<8x16xf32>, vector<16x16xf32> -> vector<16x16xf32>
    %cst_66 = arith.constant dense<0.000000e+00> : vector<16x16xf32>
    %183 = tpu.matmul %142, %171, %cst_66 {dimension_numbers = #tpu.dot_dimension_numbers<[1], [0], [0], [1], [0, 0, 1, 1], [], []>} : vector<16x8xf32>, vector<8x16xf32>, vector<16x16xf32> -> vector<16x16xf32>
    %cst_67 = arith.constant dense<0.000000e+00> : vector<16x16xf32>
    %184 = tpu.matmul %142, %180, %cst_67 {dimension_numbers = #tpu.dot_dimension_numbers<[1], [0], [0], [1], [0, 0, 1, 1], [], []>} : vector<16x8xf32>, vector<8x16xf32>, vector<16x16xf32> -> vector<16x16xf32>
    %185 = tpu.concatenate %181, %182, %183, %184 in 0 : vector<16x16xf32>, vector<16x16xf32>, vector<16x16xf32>, vector<16x16xf32> -> vector<64x16xf32>
    %cst_68 = arith.constant dense<0.000000e+00> : vector<8x16xf32>
    %186 = tpu.matmul %136, %185, %cst_68 {dimension_numbers = #tpu.dot_dimension_numbers<[1], [0], [0], [1], [0, 0, 1, 1], [], []>} : vector<8x64xf32>, vector<64x16xf32>, vector<8x16xf32> -> vector<8x16xf32>
    %187 = vector.broadcast %137 : vector<8x1xf32> to vector<8x16xf32>
    %188 = arith.addf %186, %187 : vector<8x16xf32>
    %c0_69 = arith.constant 0 : index
    %c0_70 = arith.constant 0 : index
    %189 = vector.load %arg6[%c0_69, %c0_70] : memref<8x24xf32, #tpu.memory_space<vmem>>, vector<8x24xf32>
    %c0_71 = arith.constant 0 : index
    %c0_72 = arith.constant 0 : index
    %190 = vector.load %arg7[%c0_71, %c0_72] : memref<8x1xf32, #tpu.memory_space<vmem>>, vector<8x1xf32>
    %c0_73 = arith.constant 0 : index
    %c0_74 = arith.constant 0 : index
    %191 = vector.load %arg8[%c0_73, %c0_74] : memref<8x8xf32, #tpu.memory_space<vmem>>, vector<8x8xf32>
    %c0_75 = arith.constant 0 : index
    %c0_76 = arith.constant 0 : index
    %192 = vector.load %arg9[%c0_75, %c0_76] : memref<8x1xf32, #tpu.memory_space<vmem>>, vector<8x1xf32>
    %c0_77 = arith.constant 0 : index
    %c0_78 = arith.constant 0 : index
    %193 = vector.load %arg10[%c0_77, %c0_78] : memref<8x8xf32, #tpu.memory_space<vmem>>, vector<8x8xf32>
    %c0_79 = arith.constant 0 : index
    %c0_80 = arith.constant 0 : index
    %194 = vector.load %arg11[%c0_79, %c0_80] : memref<8x1xf32, #tpu.memory_space<vmem>>, vector<8x1xf32>
    %cst_81 = arith.constant 0.000000e+00 : f32
    %195 = vector.broadcast %cst_81 : f32 to vector<8x16xf32>
    %196 = arith.cmpf oge, %188, %195 : vector<8x16xf32>
    %cst_82 = arith.constant 2.000000e-01 : f32
    %197 = vector.broadcast %cst_82 : f32 to vector<8x16xf32>
    %198 = arith.mulf %188, %197 : vector<8x16xf32>
    %199 = arith.select %196, %188, %198 : vector<8x16xi1>, vector<8x16xf32>
    %200 = tpu.iota {dimensions = array<i32: 0>} : vector<16x16xi32>
    %201 = tpu.iota {dimensions = array<i32: 1>} : vector<16x16xi32>
    %c0_i32_83 = arith.constant 0 : i32
    %202 = vector.broadcast %c0_i32_83 : i32 to vector<16x16xi32>
    %203 = arith.addi %201, %202 : vector<16x16xi32>
    %c1_i32_84 = arith.constant 1 : i32
    %204 = vector.broadcast %c1_i32_84 : i32 to vector<16x16xi32>
    %205 = arith.subi %203, %204 : vector<16x16xi32>
    %c0_i32_85 = arith.constant 0 : i32
    %206 = vector.broadcast %c0_i32_85 : i32 to vector<16x16xi32>
    %207 = arith.cmpi slt, %205, %206 : vector<16x16xi32>
    %c0_i32_86 = arith.constant 0 : i32
    %208 = vector.broadcast %c0_i32_86 : i32 to vector<16x16xi32>
    %209 = arith.subi %208, %205 : vector<16x16xi32>
    %210 = arith.select %207, %209, %205 : vector<16x16xi1>, vector<16x16xi32>
    %c16_i32 = arith.constant 16 : i32
    %211 = vector.broadcast %c16_i32 : i32 to vector<16x16xi32>
    %212 = arith.cmpi sge, %210, %211 : vector<16x16xi32>
    %c30_i32 = arith.constant 30 : i32
    %213 = vector.broadcast %c30_i32 : i32 to vector<16x16xi32>
    %214 = arith.subi %213, %210 : vector<16x16xi32>
    %215 = arith.select %212, %214, %210 : vector<16x16xi1>, vector<16x16xi32>
    %216 = arith.cmpi eq, %200, %215 : vector<16x16xi32>
    %217 = arith.extui %216 : vector<16x16xi1> to vector<16x16xi32>
    %218 = arith.sitofp %217 : vector<16x16xi32> to vector<16x16xf32>
    %c1_i32_87 = arith.constant 1 : i32
    %219 = vector.broadcast %c1_i32_87 : i32 to vector<16x16xi32>
    %220 = arith.addi %201, %219 : vector<16x16xi32>
    %c1_i32_88 = arith.constant 1 : i32
    %221 = vector.broadcast %c1_i32_88 : i32 to vector<16x16xi32>
    %222 = arith.subi %220, %221 : vector<16x16xi32>
    %c0_i32_89 = arith.constant 0 : i32
    %223 = vector.broadcast %c0_i32_89 : i32 to vector<16x16xi32>
    %224 = arith.cmpi slt, %222, %223 : vector<16x16xi32>
    %c0_i32_90 = arith.constant 0 : i32
    %225 = vector.broadcast %c0_i32_90 : i32 to vector<16x16xi32>
    %226 = arith.subi %225, %222 : vector<16x16xi32>
    %227 = arith.select %224, %226, %222 : vector<16x16xi1>, vector<16x16xi32>
    %c16_i32_91 = arith.constant 16 : i32
    %228 = vector.broadcast %c16_i32_91 : i32 to vector<16x16xi32>
    %229 = arith.cmpi sge, %227, %228 : vector<16x16xi32>
    %c30_i32_92 = arith.constant 30 : i32
    %230 = vector.broadcast %c30_i32_92 : i32 to vector<16x16xi32>
    %231 = arith.subi %230, %227 : vector<16x16xi32>
    %232 = arith.select %229, %231, %227 : vector<16x16xi1>, vector<16x16xi32>
    %233 = arith.cmpi eq, %200, %232 : vector<16x16xi32>
    %234 = arith.extui %233 : vector<16x16xi1> to vector<16x16xi32>
    %235 = arith.sitofp %234 : vector<16x16xi32> to vector<16x16xf32>
    %c2_i32_93 = arith.constant 2 : i32
    %236 = vector.broadcast %c2_i32_93 : i32 to vector<16x16xi32>
    %237 = arith.addi %201, %236 : vector<16x16xi32>
    %c1_i32_94 = arith.constant 1 : i32
    %238 = vector.broadcast %c1_i32_94 : i32 to vector<16x16xi32>
    %239 = arith.subi %237, %238 : vector<16x16xi32>
    %c0_i32_95 = arith.constant 0 : i32
    %240 = vector.broadcast %c0_i32_95 : i32 to vector<16x16xi32>
    %241 = arith.cmpi slt, %239, %240 : vector<16x16xi32>
    %c0_i32_96 = arith.constant 0 : i32
    %242 = vector.broadcast %c0_i32_96 : i32 to vector<16x16xi32>
    %243 = arith.subi %242, %239 : vector<16x16xi32>
    %244 = arith.select %241, %243, %239 : vector<16x16xi1>, vector<16x16xi32>
    %c16_i32_97 = arith.constant 16 : i32
    %245 = vector.broadcast %c16_i32_97 : i32 to vector<16x16xi32>
    %246 = arith.cmpi sge, %244, %245 : vector<16x16xi32>
    %c30_i32_98 = arith.constant 30 : i32
    %247 = vector.broadcast %c30_i32_98 : i32 to vector<16x16xi32>
    %248 = arith.subi %247, %244 : vector<16x16xi32>
    %249 = arith.select %246, %248, %244 : vector<16x16xi1>, vector<16x16xi32>
    %250 = arith.cmpi eq, %200, %249 : vector<16x16xi32>
    %251 = arith.extui %250 : vector<16x16xi1> to vector<16x16xi32>
    %252 = arith.sitofp %251 : vector<16x16xi32> to vector<16x16xf32>
    %cst_99 = arith.constant dense<0.000000e+00> : vector<8x16xf32>
    %253 = tpu.matmul %199, %218, %cst_99 {dimension_numbers = #tpu.dot_dimension_numbers<[1], [0], [0], [1], [0, 0, 1, 1], [], []>} : vector<8x16xf32>, vector<16x16xf32>, vector<8x16xf32> -> vector<8x16xf32>
    %cst_100 = arith.constant dense<0.000000e+00> : vector<8x16xf32>
    %254 = tpu.matmul %199, %235, %cst_100 {dimension_numbers = #tpu.dot_dimension_numbers<[1], [0], [0], [1], [0, 0, 1, 1], [], []>} : vector<8x16xf32>, vector<16x16xf32>, vector<8x16xf32> -> vector<8x16xf32>
    %cst_101 = arith.constant dense<0.000000e+00> : vector<8x16xf32>
    %255 = tpu.matmul %199, %252, %cst_101 {dimension_numbers = #tpu.dot_dimension_numbers<[1], [0], [0], [1], [0, 0, 1, 1], [], []>} : vector<8x16xf32>, vector<16x16xf32>, vector<8x16xf32> -> vector<8x16xf32>
    %256 = tpu.concatenate %253, %254, %255 in 0 : vector<8x16xf32>, vector<8x16xf32>, vector<8x16xf32> -> vector<24x16xf32>
    %cst_102 = arith.constant dense<0.000000e+00> : vector<8x16xf32>
    %257 = tpu.matmul %189, %256, %cst_102 {dimension_numbers = #tpu.dot_dimension_numbers<[1], [0], [0], [1], [0, 0, 1, 1], [], []>} : vector<8x24xf32>, vector<24x16xf32>, vector<8x16xf32> -> vector<8x16xf32>
    %258 = vector.broadcast %190 : vector<8x1xf32> to vector<8x16xf32>
    %259 = arith.addf %257, %258 : vector<8x16xf32>
    %cst_103 = arith.constant 0.000000e+00 : f32
    %260 = vector.broadcast %cst_103 : f32 to vector<8x16xf32>
    %261 = arith.cmpf oge, %259, %260 : vector<8x16xf32>
    %cst_104 = arith.constant 2.000000e-01 : f32
    %262 = vector.broadcast %cst_104 : f32 to vector<8x16xf32>
    %263 = arith.mulf %259, %262 : vector<8x16xf32>
    %264 = arith.select %261, %259, %263 : vector<8x16xi1>, vector<8x16xf32>
    %cst_105 = arith.constant dense<0.000000e+00> : vector<8x16xf32>
    %265 = tpu.matmul %191, %264, %cst_105 {dimension_numbers = #tpu.dot_dimension_numbers<[1], [0], [0], [1], [0, 0, 1, 1], [], []>} : vector<8x8xf32>, vector<8x16xf32>, vector<8x16xf32> -> vector<8x16xf32>
    %266 = vector.broadcast %192 : vector<8x1xf32> to vector<8x16xf32>
    %267 = arith.addf %265, %266 : vector<8x16xf32>
    %cst_106 = arith.constant dense<0.000000e+00> : vector<8x16xf32>
    %268 = tpu.matmul %193, %188, %cst_106 {dimension_numbers = #tpu.dot_dimension_numbers<[1], [0], [0], [1], [0, 0, 1, 1], [], []>} : vector<8x8xf32>, vector<8x16xf32>, vector<8x16xf32> -> vector<8x16xf32>
    %269 = vector.broadcast %194 : vector<8x1xf32> to vector<8x16xf32>
    %270 = arith.addf %268, %269 : vector<8x16xf32>
    %271 = arith.addf %267, %270 : vector<8x16xf32>
    %c0_107 = arith.constant 0 : index
    %c0_108 = arith.constant 0 : index
    %272 = vector.load %arg12[%c0_107, %c0_108] : memref<8x24xf32, #tpu.memory_space<vmem>>, vector<8x24xf32>
    %c0_109 = arith.constant 0 : index
    %c0_110 = arith.constant 0 : index
    %273 = vector.load %arg13[%c0_109, %c0_110] : memref<8x1xf32, #tpu.memory_space<vmem>>, vector<8x1xf32>
    %c0_111 = arith.constant 0 : index
    %c0_112 = arith.constant 0 : index
    %274 = vector.load %arg14[%c0_111, %c0_112] : memref<8x8xf32, #tpu.memory_space<vmem>>, vector<8x8xf32>
    %c0_113 = arith.constant 0 : index
    %c0_114 = arith.constant 0 : index
    %275 = vector.load %arg15[%c0_113, %c0_114] : memref<8x1xf32, #tpu.memory_space<vmem>>, vector<8x1xf32>
    %c0_115 = arith.constant 0 : index
    %c0_116 = arith.constant 0 : index
    %276 = vector.load %arg16[%c0_115, %c0_116] : memref<8x8xf32, #tpu.memory_space<vmem>>, vector<8x8xf32>
    %c0_117 = arith.constant 0 : index
    %c0_118 = arith.constant 0 : index
    %277 = vector.load %arg17[%c0_117, %c0_118] : memref<8x1xf32, #tpu.memory_space<vmem>>, vector<8x1xf32>
    %cst_119 = arith.constant 0.000000e+00 : f32
    %278 = vector.broadcast %cst_119 : f32 to vector<8x16xf32>
    %279 = arith.cmpf oge, %271, %278 : vector<8x16xf32>
    %cst_120 = arith.constant 2.000000e-01 : f32
    %280 = vector.broadcast %cst_120 : f32 to vector<8x16xf32>
    %281 = arith.mulf %271, %280 : vector<8x16xf32>
    %282 = arith.select %279, %271, %281 : vector<8x16xi1>, vector<8x16xf32>
    %283 = tpu.iota {dimensions = array<i32: 0>} : vector<16x16xi32>
    %284 = tpu.iota {dimensions = array<i32: 1>} : vector<16x16xi32>
    %c0_i32_121 = arith.constant 0 : i32
    %285 = vector.broadcast %c0_i32_121 : i32 to vector<16x16xi32>
    %286 = arith.addi %284, %285 : vector<16x16xi32>
    %c3_i32_122 = arith.constant 3 : i32
    %287 = vector.broadcast %c3_i32_122 : i32 to vector<16x16xi32>
    %288 = arith.subi %286, %287 : vector<16x16xi32>
    %c0_i32_123 = arith.constant 0 : i32
    %289 = vector.broadcast %c0_i32_123 : i32 to vector<16x16xi32>
    %290 = arith.cmpi slt, %288, %289 : vector<16x16xi32>
    %c0_i32_124 = arith.constant 0 : i32
    %291 = vector.broadcast %c0_i32_124 : i32 to vector<16x16xi32>
    %292 = arith.subi %291, %288 : vector<16x16xi32>
    %293 = arith.select %290, %292, %288 : vector<16x16xi1>, vector<16x16xi32>
    %c16_i32_125 = arith.constant 16 : i32
    %294 = vector.broadcast %c16_i32_125 : i32 to vector<16x16xi32>
    %295 = arith.cmpi sge, %293, %294 : vector<16x16xi32>
    %c30_i32_126 = arith.constant 30 : i32
    %296 = vector.broadcast %c30_i32_126 : i32 to vector<16x16xi32>
    %297 = arith.subi %296, %293 : vector<16x16xi32>
    %298 = arith.select %295, %297, %293 : vector<16x16xi1>, vector<16x16xi32>
    %299 = arith.cmpi eq, %283, %298 : vector<16x16xi32>
    %300 = arith.extui %299 : vector<16x16xi1> to vector<16x16xi32>
    %301 = arith.sitofp %300 : vector<16x16xi32> to vector<16x16xf32>
    %c3_i32_127 = arith.constant 3 : i32
    %302 = vector.broadcast %c3_i32_127 : i32 to vector<16x16xi32>
    %303 = arith.addi %284, %302 : vector<16x16xi32>
    %c3_i32_128 = arith.constant 3 : i32
    %304 = vector.broadcast %c3_i32_128 : i32 to vector<16x16xi32>
    %305 = arith.subi %303, %304 : vector<16x16xi32>
    %c0_i32_129 = arith.constant 0 : i32
    %306 = vector.broadcast %c0_i32_129 : i32 to vector<16x16xi32>
    %307 = arith.cmpi slt, %305, %306 : vector<16x16xi32>
    %c0_i32_130 = arith.constant 0 : i32
    %308 = vector.broadcast %c0_i32_130 : i32 to vector<16x16xi32>
    %309 = arith.subi %308, %305 : vector<16x16xi32>
    %310 = arith.select %307, %309, %305 : vector<16x16xi1>, vector<16x16xi32>
    %c16_i32_131 = arith.constant 16 : i32
    %311 = vector.broadcast %c16_i32_131 : i32 to vector<16x16xi32>
    %312 = arith.cmpi sge, %310, %311 : vector<16x16xi32>
    %c30_i32_132 = arith.constant 30 : i32
    %313 = vector.broadcast %c30_i32_132 : i32 to vector<16x16xi32>
    %314 = arith.subi %313, %310 : vector<16x16xi32>
    %315 = arith.select %312, %314, %310 : vector<16x16xi1>, vector<16x16xi32>
    %316 = arith.cmpi eq, %283, %315 : vector<16x16xi32>
    %317 = arith.extui %316 : vector<16x16xi1> to vector<16x16xi32>
    %318 = arith.sitofp %317 : vector<16x16xi32> to vector<16x16xf32>
    %c6_i32_133 = arith.constant 6 : i32
    %319 = vector.broadcast %c6_i32_133 : i32 to vector<16x16xi32>
    %320 = arith.addi %284, %319 : vector<16x16xi32>
    %c3_i32_134 = arith.constant 3 : i32
    %321 = vector.broadcast %c3_i32_134 : i32 to vector<16x16xi32>
    %322 = arith.subi %320, %321 : vector<16x16xi32>
    %c0_i32_135 = arith.constant 0 : i32
    %323 = vector.broadcast %c0_i32_135 : i32 to vector<16x16xi32>
    %324 = arith.cmpi slt, %322, %323 : vector<16x16xi32>
    %c0_i32_136 = arith.constant 0 : i32
    %325 = vector.broadcast %c0_i32_136 : i32 to vector<16x16xi32>
    %326 = arith.subi %325, %322 : vector<16x16xi32>
    %327 = arith.select %324, %326, %322 : vector<16x16xi1>, vector<16x16xi32>
    %c16_i32_137 = arith.constant 16 : i32
    %328 = vector.broadcast %c16_i32_137 : i32 to vector<16x16xi32>
    %329 = arith.cmpi sge, %327, %328 : vector<16x16xi32>
    %c30_i32_138 = arith.constant 30 : i32
    %330 = vector.broadcast %c30_i32_138 : i32 to vector<16x16xi32>
    %331 = arith.subi %330, %327 : vector<16x16xi32>
    %332 = arith.select %329, %331, %327 : vector<16x16xi1>, vector<16x16xi32>
    %333 = arith.cmpi eq, %283, %332 : vector<16x16xi32>
    %334 = arith.extui %333 : vector<16x16xi1> to vector<16x16xi32>
    %335 = arith.sitofp %334 : vector<16x16xi32> to vector<16x16xf32>
    %cst_139 = arith.constant dense<0.000000e+00> : vector<8x16xf32>
    %336 = tpu.matmul %282, %301, %cst_139 {dimension_numbers = #tpu.dot_dimension_numbers<[1], [0], [0], [1], [0, 0, 1, 1], [], []>} : vector<8x16xf32>, vector<16x16xf32>, vector<8x16xf32> -> vector<8x16xf32>
    %cst_140 = arith.constant dense<0.000000e+00> : vector<8x16xf32>
    %337 = tpu.matmul %282, %318, %cst_140 {dimension_numbers = #tpu.dot_dimension_numbers<[1], [0], [0], [1], [0, 0, 1, 1], [], []>} : vector<8x16xf32>, vector<16x16xf32>, vector<8x16xf32> -> vector<8x16xf32>
    %cst_141 = arith.constant dense<0.000000e+00> : vector<8x16xf32>
    %338 = tpu.matmul %282, %335, %cst_141 {dimension_numbers = #tpu.dot_dimension_numbers<[1], [0], [0], [1], [0, 0, 1, 1], [], []>} : vector<8x16xf32>, vector<16x16xf32>, vector<8x16xf32> -> vector<8x16xf32>
    %339 = tpu.concatenate %336, %337, %338 in 0 : vector<8x16xf32>, vector<8x16xf32>, vector<8x16xf32> -> vector<24x16xf32>
    %cst_142 = arith.constant dense<0.000000e+00> : vector<8x16xf32>
    %340 = tpu.matmul %272, %339, %cst_142 {dimension_numbers = #tpu.dot_dimension_numbers<[1], [0], [0], [1], [0, 0, 1, 1], [], []>} : vector<8x24xf32>, vector<24x16xf32>, vector<8x16xf32> -> vector<8x16xf32>
    %341 = vector.broadcast %273 : vector<8x1xf32> to vector<8x16xf32>
    %342 = arith.addf %340, %341 : vector<8x16xf32>
    %cst_143 = arith.constant 0.000000e+00 : f32
    %343 = vector.broadcast %cst_143 : f32 to vector<8x16xf32>
    %344 = arith.cmpf oge, %342, %343 : vector<8x16xf32>
    %cst_144 = arith.constant 2.000000e-01 : f32
    %345 = vector.broadcast %cst_144 : f32 to vector<8x16xf32>
    %346 = arith.mulf %342, %345 : vector<8x16xf32>
    %347 = arith.select %344, %342, %346 : vector<8x16xi1>, vector<8x16xf32>
    %cst_145 = arith.constant dense<0.000000e+00> : vector<8x16xf32>
    %348 = tpu.matmul %274, %347, %cst_145 {dimension_numbers = #tpu.dot_dimension_numbers<[1], [0], [0], [1], [0, 0, 1, 1], [], []>} : vector<8x8xf32>, vector<8x16xf32>, vector<8x16xf32> -> vector<8x16xf32>
    %349 = vector.broadcast %275 : vector<8x1xf32> to vector<8x16xf32>
    %350 = arith.addf %348, %349 : vector<8x16xf32>
    %cst_146 = arith.constant dense<0.000000e+00> : vector<8x16xf32>
    %351 = tpu.matmul %276, %271, %cst_146 {dimension_numbers = #tpu.dot_dimension_numbers<[1], [0], [0], [1], [0, 0, 1, 1], [], []>} : vector<8x8xf32>, vector<8x16xf32>, vector<8x16xf32> -> vector<8x16xf32>
    %352 = vector.broadcast %277 : vector<8x1xf32> to vector<8x16xf32>
    %353 = arith.addf %351, %352 : vector<8x16xf32>
    %354 = arith.addf %350, %353 : vector<8x16xf32>
    %c0_147 = arith.constant 0 : index
    %c0_148 = arith.constant 0 : index
    %355 = vector.load %arg18[%c0_147, %c0_148] : memref<8x24xf32, #tpu.memory_space<vmem>>, vector<8x24xf32>
    %c0_149 = arith.constant 0 : index
    %c0_150 = arith.constant 0 : index
    %356 = vector.load %arg19[%c0_149, %c0_150] : memref<8x1xf32, #tpu.memory_space<vmem>>, vector<8x1xf32>
    %c0_151 = arith.constant 0 : index
    %c0_152 = arith.constant 0 : index
    %357 = vector.load %arg20[%c0_151, %c0_152] : memref<8x8xf32, #tpu.memory_space<vmem>>, vector<8x8xf32>
    %c0_153 = arith.constant 0 : index
    %c0_154 = arith.constant 0 : index
    %358 = vector.load %arg21[%c0_153, %c0_154] : memref<8x1xf32, #tpu.memory_space<vmem>>, vector<8x1xf32>
    %c0_155 = arith.constant 0 : index
    %c0_156 = arith.constant 0 : index
    %359 = vector.load %arg22[%c0_155, %c0_156] : memref<8x8xf32, #tpu.memory_space<vmem>>, vector<8x8xf32>
    %c0_157 = arith.constant 0 : index
    %c0_158 = arith.constant 0 : index
    %360 = vector.load %arg23[%c0_157, %c0_158] : memref<8x1xf32, #tpu.memory_space<vmem>>, vector<8x1xf32>
    %cst_159 = arith.constant 0.000000e+00 : f32
    %361 = vector.broadcast %cst_159 : f32 to vector<8x16xf32>
    %362 = arith.cmpf oge, %354, %361 : vector<8x16xf32>
    %cst_160 = arith.constant 2.000000e-01 : f32
    %363 = vector.broadcast %cst_160 : f32 to vector<8x16xf32>
    %364 = arith.mulf %354, %363 : vector<8x16xf32>
    %365 = arith.select %362, %354, %364 : vector<8x16xi1>, vector<8x16xf32>
    %366 = tpu.iota {dimensions = array<i32: 0>} : vector<16x16xi32>
    %367 = tpu.iota {dimensions = array<i32: 1>} : vector<16x16xi32>
    %c0_i32_161 = arith.constant 0 : i32
    %368 = vector.broadcast %c0_i32_161 : i32 to vector<16x16xi32>
    %369 = arith.addi %367, %368 : vector<16x16xi32>
    %c9_i32 = arith.constant 9 : i32
    %370 = vector.broadcast %c9_i32 : i32 to vector<16x16xi32>
    %371 = arith.subi %369, %370 : vector<16x16xi32>
    %c0_i32_162 = arith.constant 0 : i32
    %372 = vector.broadcast %c0_i32_162 : i32 to vector<16x16xi32>
    %373 = arith.cmpi slt, %371, %372 : vector<16x16xi32>
    %c0_i32_163 = arith.constant 0 : i32
    %374 = vector.broadcast %c0_i32_163 : i32 to vector<16x16xi32>
    %375 = arith.subi %374, %371 : vector<16x16xi32>
    %376 = arith.select %373, %375, %371 : vector<16x16xi1>, vector<16x16xi32>
    %c16_i32_164 = arith.constant 16 : i32
    %377 = vector.broadcast %c16_i32_164 : i32 to vector<16x16xi32>
    %378 = arith.cmpi sge, %376, %377 : vector<16x16xi32>
    %c30_i32_165 = arith.constant 30 : i32
    %379 = vector.broadcast %c30_i32_165 : i32 to vector<16x16xi32>
    %380 = arith.subi %379, %376 : vector<16x16xi32>
    %381 = arith.select %378, %380, %376 : vector<16x16xi1>, vector<16x16xi32>
    %382 = arith.cmpi eq, %366, %381 : vector<16x16xi32>
    %383 = arith.extui %382 : vector<16x16xi1> to vector<16x16xi32>
    %384 = arith.sitofp %383 : vector<16x16xi32> to vector<16x16xf32>
    %c9_i32_166 = arith.constant 9 : i32
    %385 = vector.broadcast %c9_i32_166 : i32 to vector<16x16xi32>
    %386 = arith.addi %367, %385 : vector<16x16xi32>
    %c9_i32_167 = arith.constant 9 : i32
    %387 = vector.broadcast %c9_i32_167 : i32 to vector<16x16xi32>
    %388 = arith.subi %386, %387 : vector<16x16xi32>
    %c0_i32_168 = arith.constant 0 : i32
    %389 = vector.broadcast %c0_i32_168 : i32 to vector<16x16xi32>
    %390 = arith.cmpi slt, %388, %389 : vector<16x16xi32>
    %c0_i32_169 = arith.constant 0 : i32
    %391 = vector.broadcast %c0_i32_169 : i32 to vector<16x16xi32>
    %392 = arith.subi %391, %388 : vector<16x16xi32>
    %393 = arith.select %390, %392, %388 : vector<16x16xi1>, vector<16x16xi32>
    %c16_i32_170 = arith.constant 16 : i32
    %394 = vector.broadcast %c16_i32_170 : i32 to vector<16x16xi32>
    %395 = arith.cmpi sge, %393, %394 : vector<16x16xi32>
    %c30_i32_171 = arith.constant 30 : i32
    %396 = vector.broadcast %c30_i32_171 : i32 to vector<16x16xi32>
    %397 = arith.subi %396, %393 : vector<16x16xi32>
    %398 = arith.select %395, %397, %393 : vector<16x16xi1>, vector<16x16xi32>
    %399 = arith.cmpi eq, %366, %398 : vector<16x16xi32>
    %400 = arith.extui %399 : vector<16x16xi1> to vector<16x16xi32>
    %401 = arith.sitofp %400 : vector<16x16xi32> to vector<16x16xf32>
    %c18_i32 = arith.constant 18 : i32
    %402 = vector.broadcast %c18_i32 : i32 to vector<16x16xi32>
    %403 = arith.addi %367, %402 : vector<16x16xi32>
    %c9_i32_172 = arith.constant 9 : i32
    %404 = vector.broadcast %c9_i32_172 : i32 to vector<16x16xi32>
    %405 = arith.subi %403, %404 : vector<16x16xi32>
    %c0_i32_173 = arith.constant 0 : i32
    %406 = vector.broadcast %c0_i32_173 : i32 to vector<16x16xi32>
    %407 = arith.cmpi slt, %405, %406 : vector<16x16xi32>
    %c0_i32_174 = arith.constant 0 : i32
    %408 = vector.broadcast %c0_i32_174 : i32 to vector<16x16xi32>
    %409 = arith.subi %408, %405 : vector<16x16xi32>
    %410 = arith.select %407, %409, %405 : vector<16x16xi1>, vector<16x16xi32>
    %c16_i32_175 = arith.constant 16 : i32
    %411 = vector.broadcast %c16_i32_175 : i32 to vector<16x16xi32>
    %412 = arith.cmpi sge, %410, %411 : vector<16x16xi32>
    %c30_i32_176 = arith.constant 30 : i32
    %413 = vector.broadcast %c30_i32_176 : i32 to vector<16x16xi32>
    %414 = arith.subi %413, %410 : vector<16x16xi32>
    %415 = arith.select %412, %414, %410 : vector<16x16xi1>, vector<16x16xi32>
    %416 = arith.cmpi eq, %366, %415 : vector<16x16xi32>
    %417 = arith.extui %416 : vector<16x16xi1> to vector<16x16xi32>
    %418 = arith.sitofp %417 : vector<16x16xi32> to vector<16x16xf32>
    %cst_177 = arith.constant dense<0.000000e+00> : vector<8x16xf32>
    %419 = tpu.matmul %365, %384, %cst_177 {dimension_numbers = #tpu.dot_dimension_numbers<[1], [0], [0], [1], [0, 0, 1, 1], [], []>} : vector<8x16xf32>, vector<16x16xf32>, vector<8x16xf32> -> vector<8x16xf32>
    %cst_178 = arith.constant dense<0.000000e+00> : vector<8x16xf32>
    %420 = tpu.matmul %365, %401, %cst_178 {dimension_numbers = #tpu.dot_dimension_numbers<[1], [0], [0], [1], [0, 0, 1, 1], [], []>} : vector<8x16xf32>, vector<16x16xf32>, vector<8x16xf32> -> vector<8x16xf32>
    %cst_179 = arith.constant dense<0.000000e+00> : vector<8x16xf32>
    %421 = tpu.matmul %365, %418, %cst_179 {dimension_numbers = #tpu.dot_dimension_numbers<[1], [0], [0], [1], [0, 0, 1, 1], [], []>} : vector<8x16xf32>, vector<16x16xf32>, vector<8x16xf32> -> vector<8x16xf32>
    %422 = tpu.concatenate %419, %420, %421 in 0 : vector<8x16xf32>, vector<8x16xf32>, vector<8x16xf32> -> vector<24x16xf32>
    %cst_180 = arith.constant dense<0.000000e+00> : vector<8x16xf32>
    %423 = tpu.matmul %355, %422, %cst_180 {dimension_numbers = #tpu.dot_dimension_numbers<[1], [0], [0], [1], [0, 0, 1, 1], [], []>} : vector<8x24xf32>, vector<24x16xf32>, vector<8x16xf32> -> vector<8x16xf32>
    %424 = vector.broadcast %356 : vector<8x1xf32> to vector<8x16xf32>
    %425 = arith.addf %423, %424 : vector<8x16xf32>
    %cst_181 = arith.constant 0.000000e+00 : f32
    %426 = vector.broadcast %cst_181 : f32 to vector<8x16xf32>
    %427 = arith.cmpf oge, %425, %426 : vector<8x16xf32>
    %cst_182 = arith.constant 2.000000e-01 : f32
    %428 = vector.broadcast %cst_182 : f32 to vector<8x16xf32>
    %429 = arith.mulf %425, %428 : vector<8x16xf32>
    %430 = arith.select %427, %425, %429 : vector<8x16xi1>, vector<8x16xf32>
    %cst_183 = arith.constant dense<0.000000e+00> : vector<8x16xf32>
    %431 = tpu.matmul %357, %430, %cst_183 {dimension_numbers = #tpu.dot_dimension_numbers<[1], [0], [0], [1], [0, 0, 1, 1], [], []>} : vector<8x8xf32>, vector<8x16xf32>, vector<8x16xf32> -> vector<8x16xf32>
    %432 = vector.broadcast %358 : vector<8x1xf32> to vector<8x16xf32>
    %433 = arith.addf %431, %432 : vector<8x16xf32>
    %cst_184 = arith.constant dense<0.000000e+00> : vector<8x16xf32>
    %434 = tpu.matmul %359, %354, %cst_184 {dimension_numbers = #tpu.dot_dimension_numbers<[1], [0], [0], [1], [0, 0, 1, 1], [], []>} : vector<8x8xf32>, vector<8x16xf32>, vector<8x16xf32> -> vector<8x16xf32>
    %435 = vector.broadcast %360 : vector<8x1xf32> to vector<8x16xf32>
    %436 = arith.addf %434, %435 : vector<8x16xf32>
    %437 = arith.addf %433, %436 : vector<8x16xf32>
    %c0_185 = arith.constant 0 : index
    %c0_186 = arith.constant 0 : index
    %438 = vector.load %arg24[%c0_185, %c0_186] : memref<4x32xf32, #tpu.memory_space<vmem>>, vector<4x32xf32>
    %c0_187 = arith.constant 0 : index
    %c0_188 = arith.constant 0 : index
    %439 = vector.load %arg25[%c0_187, %c0_188] : memref<4x1xf32, #tpu.memory_space<vmem>>, vector<4x1xf32>
    %cst_189 = arith.constant 0.000000e+00 : f32
    %440 = vector.broadcast %cst_189 : f32 to vector<8x16xf32>
    %441 = arith.cmpf oge, %437, %440 : vector<8x16xf32>
    %cst_190 = arith.constant 2.000000e-01 : f32
    %442 = vector.broadcast %cst_190 : f32 to vector<8x16xf32>
    %443 = arith.mulf %437, %442 : vector<8x16xf32>
    %444 = arith.select %441, %437, %443 : vector<8x16xi1>, vector<8x16xf32>
    %445 = tpu.iota {dimensions = array<i32: 0>} : vector<16x32xi32>
    %446 = tpu.iota {dimensions = array<i32: 1>} : vector<16x32xi32>
    %c2_i32_191 = arith.constant 2 : i32
    %447 = vector.broadcast %c2_i32_191 : i32 to vector<16x32xi32>
    %448 = arith.muli %445, %447 : vector<16x32xi32>
    %c0_i32_192 = arith.constant 0 : i32
    %449 = vector.broadcast %c0_i32_192 : i32 to vector<16x32xi32>
    %450 = arith.addi %448, %449 : vector<16x32xi32>
    %c1_i32_193 = arith.constant 1 : i32
    %451 = vector.broadcast %c1_i32_193 : i32 to vector<16x32xi32>
    %452 = arith.subi %450, %451 : vector<16x32xi32>
    %453 = arith.cmpi eq, %452, %446 : vector<16x32xi32>
    %454 = arith.extui %453 : vector<16x32xi1> to vector<16x32xi32>
    %455 = arith.sitofp %454 : vector<16x32xi32> to vector<16x32xf32>
    %c2_i32_194 = arith.constant 2 : i32
    %456 = vector.broadcast %c2_i32_194 : i32 to vector<16x32xi32>
    %457 = arith.muli %445, %456 : vector<16x32xi32>
    %c1_i32_195 = arith.constant 1 : i32
    %458 = vector.broadcast %c1_i32_195 : i32 to vector<16x32xi32>
    %459 = arith.addi %457, %458 : vector<16x32xi32>
    %c1_i32_196 = arith.constant 1 : i32
    %460 = vector.broadcast %c1_i32_196 : i32 to vector<16x32xi32>
    %461 = arith.subi %459, %460 : vector<16x32xi32>
    %462 = arith.cmpi eq, %461, %446 : vector<16x32xi32>
    %463 = arith.extui %462 : vector<16x32xi1> to vector<16x32xi32>
    %464 = arith.sitofp %463 : vector<16x32xi32> to vector<16x32xf32>
    %c2_i32_197 = arith.constant 2 : i32
    %465 = vector.broadcast %c2_i32_197 : i32 to vector<16x32xi32>
    %466 = arith.muli %445, %465 : vector<16x32xi32>
    %c2_i32_198 = arith.constant 2 : i32
    %467 = vector.broadcast %c2_i32_198 : i32 to vector<16x32xi32>
    %468 = arith.addi %466, %467 : vector<16x32xi32>
    %c1_i32_199 = arith.constant 1 : i32
    %469 = vector.broadcast %c1_i32_199 : i32 to vector<16x32xi32>
    %470 = arith.subi %468, %469 : vector<16x32xi32>
    %471 = arith.cmpi eq, %470, %446 : vector<16x32xi32>
    %472 = arith.extui %471 : vector<16x32xi1> to vector<16x32xi32>
    %473 = arith.sitofp %472 : vector<16x32xi32> to vector<16x32xf32>
    %c2_i32_200 = arith.constant 2 : i32
    %474 = vector.broadcast %c2_i32_200 : i32 to vector<16x32xi32>
    %475 = arith.muli %445, %474 : vector<16x32xi32>
    %c3_i32_201 = arith.constant 3 : i32
    %476 = vector.broadcast %c3_i32_201 : i32 to vector<16x32xi32>
    %477 = arith.addi %475, %476 : vector<16x32xi32>
    %c1_i32_202 = arith.constant 1 : i32
    %478 = vector.broadcast %c1_i32_202 : i32 to vector<16x32xi32>
    %479 = arith.subi %477, %478 : vector<16x32xi32>
    %480 = arith.cmpi eq, %479, %446 : vector<16x32xi32>
    %481 = arith.extui %480 : vector<16x32xi1> to vector<16x32xi32>
    %482 = arith.sitofp %481 : vector<16x32xi32> to vector<16x32xf32>
    %cst_203 = arith.constant dense<0.000000e+00> : vector<8x32xf32>
    %483 = tpu.matmul %444, %455, %cst_203 {dimension_numbers = #tpu.dot_dimension_numbers<[1], [0], [0], [1], [0, 0, 1, 1], [], []>} : vector<8x16xf32>, vector<16x32xf32>, vector<8x32xf32> -> vector<8x32xf32>
    %cst_204 = arith.constant dense<0.000000e+00> : vector<8x32xf32>
    %484 = tpu.matmul %444, %464, %cst_204 {dimension_numbers = #tpu.dot_dimension_numbers<[1], [0], [0], [1], [0, 0, 1, 1], [], []>} : vector<8x16xf32>, vector<16x32xf32>, vector<8x32xf32> -> vector<8x32xf32>
    %cst_205 = arith.constant dense<0.000000e+00> : vector<8x32xf32>
    %485 = tpu.matmul %444, %473, %cst_205 {dimension_numbers = #tpu.dot_dimension_numbers<[1], [0], [0], [1], [0, 0, 1, 1], [], []>} : vector<8x16xf32>, vector<16x32xf32>, vector<8x32xf32> -> vector<8x32xf32>
    %cst_206 = arith.constant dense<0.000000e+00> : vector<8x32xf32>
    %486 = tpu.matmul %444, %482, %cst_206 {dimension_numbers = #tpu.dot_dimension_numbers<[1], [0], [0], [1], [0, 0, 1, 1], [], []>} : vector<8x16xf32>, vector<16x32xf32>, vector<8x32xf32> -> vector<8x32xf32>
    %487 = tpu.concatenate %483, %484, %485, %486 in 0 : vector<8x32xf32>, vector<8x32xf32>, vector<8x32xf32>, vector<8x32xf32> -> vector<32x32xf32>
    %cst_207 = arith.constant dense<0.000000e+00> : vector<4x32xf32>
    %488 = tpu.matmul %438, %487, %cst_207 {dimension_numbers = #tpu.dot_dimension_numbers<[1], [0], [0], [1], [0, 0, 1, 1], [], []>} : vector<4x32xf32>, vector<32x32xf32>, vector<4x32xf32> -> vector<4x32xf32>
    %489 = vector.broadcast %439 : vector<4x1xf32> to vector<4x32xf32>
    %490 = arith.addf %488, %489 : vector<4x32xf32>
    %c0_208 = arith.constant 0 : index
    %c0_209 = arith.constant 0 : index
    %491 = vector.load %arg26[%c0_208, %c0_209] : memref<4x12xf32, #tpu.memory_space<vmem>>, vector<4x12xf32>
    %c0_210 = arith.constant 0 : index
    %c0_211 = arith.constant 0 : index
    %492 = vector.load %arg27[%c0_210, %c0_211] : memref<4x1xf32, #tpu.memory_space<vmem>>, vector<4x1xf32>
    %c0_212 = arith.constant 0 : index
    %c0_213 = arith.constant 0 : index
    %493 = vector.load %arg28[%c0_212, %c0_213] : memref<4x4xf32, #tpu.memory_space<vmem>>, vector<4x4xf32>
    %c0_214 = arith.constant 0 : index
    %c0_215 = arith.constant 0 : index
    %494 = vector.load %arg29[%c0_214, %c0_215] : memref<4x1xf32, #tpu.memory_space<vmem>>, vector<4x1xf32>
    %c0_216 = arith.constant 0 : index
    %c0_217 = arith.constant 0 : index
    %495 = vector.load %arg30[%c0_216, %c0_217] : memref<4x4xf32, #tpu.memory_space<vmem>>, vector<4x4xf32>
    %c0_218 = arith.constant 0 : index
    %c0_219 = arith.constant 0 : index
    %496 = vector.load %arg31[%c0_218, %c0_219] : memref<4x1xf32, #tpu.memory_space<vmem>>, vector<4x1xf32>
    %cst_220 = arith.constant 0.000000e+00 : f32
    %497 = vector.broadcast %cst_220 : f32 to vector<4x32xf32>
    %498 = arith.cmpf oge, %490, %497 : vector<4x32xf32>
    %cst_221 = arith.constant 2.000000e-01 : f32
    %499 = vector.broadcast %cst_221 : f32 to vector<4x32xf32>
    %500 = arith.mulf %490, %499 : vector<4x32xf32>
    %501 = arith.select %498, %490, %500 : vector<4x32xi1>, vector<4x32xf32>
    %502 = tpu.iota {dimensions = array<i32: 0>} : vector<32x32xi32>
    %503 = tpu.iota {dimensions = array<i32: 1>} : vector<32x32xi32>
    %c0_i32_222 = arith.constant 0 : i32
    %504 = vector.broadcast %c0_i32_222 : i32 to vector<32x32xi32>
    %505 = arith.addi %503, %504 : vector<32x32xi32>
    %c1_i32_223 = arith.constant 1 : i32
    %506 = vector.broadcast %c1_i32_223 : i32 to vector<32x32xi32>
    %507 = arith.subi %505, %506 : vector<32x32xi32>
    %c0_i32_224 = arith.constant 0 : i32
    %508 = vector.broadcast %c0_i32_224 : i32 to vector<32x32xi32>
    %509 = arith.cmpi slt, %507, %508 : vector<32x32xi32>
    %c0_i32_225 = arith.constant 0 : i32
    %510 = vector.broadcast %c0_i32_225 : i32 to vector<32x32xi32>
    %511 = arith.subi %510, %507 : vector<32x32xi32>
    %512 = arith.select %509, %511, %507 : vector<32x32xi1>, vector<32x32xi32>
    %c32_i32 = arith.constant 32 : i32
    %513 = vector.broadcast %c32_i32 : i32 to vector<32x32xi32>
    %514 = arith.cmpi sge, %512, %513 : vector<32x32xi32>
    %c62_i32 = arith.constant 62 : i32
    %515 = vector.broadcast %c62_i32 : i32 to vector<32x32xi32>
    %516 = arith.subi %515, %512 : vector<32x32xi32>
    %517 = arith.select %514, %516, %512 : vector<32x32xi1>, vector<32x32xi32>
    %518 = arith.cmpi eq, %502, %517 : vector<32x32xi32>
    %519 = arith.extui %518 : vector<32x32xi1> to vector<32x32xi32>
    %520 = arith.sitofp %519 : vector<32x32xi32> to vector<32x32xf32>
    %c1_i32_226 = arith.constant 1 : i32
    %521 = vector.broadcast %c1_i32_226 : i32 to vector<32x32xi32>
    %522 = arith.addi %503, %521 : vector<32x32xi32>
    %c1_i32_227 = arith.constant 1 : i32
    %523 = vector.broadcast %c1_i32_227 : i32 to vector<32x32xi32>
    %524 = arith.subi %522, %523 : vector<32x32xi32>
    %c0_i32_228 = arith.constant 0 : i32
    %525 = vector.broadcast %c0_i32_228 : i32 to vector<32x32xi32>
    %526 = arith.cmpi slt, %524, %525 : vector<32x32xi32>
    %c0_i32_229 = arith.constant 0 : i32
    %527 = vector.broadcast %c0_i32_229 : i32 to vector<32x32xi32>
    %528 = arith.subi %527, %524 : vector<32x32xi32>
    %529 = arith.select %526, %528, %524 : vector<32x32xi1>, vector<32x32xi32>
    %c32_i32_230 = arith.constant 32 : i32
    %530 = vector.broadcast %c32_i32_230 : i32 to vector<32x32xi32>
    %531 = arith.cmpi sge, %529, %530 : vector<32x32xi32>
    %c62_i32_231 = arith.constant 62 : i32
    %532 = vector.broadcast %c62_i32_231 : i32 to vector<32x32xi32>
    %533 = arith.subi %532, %529 : vector<32x32xi32>
    %534 = arith.select %531, %533, %529 : vector<32x32xi1>, vector<32x32xi32>
    %535 = arith.cmpi eq, %502, %534 : vector<32x32xi32>
    %536 = arith.extui %535 : vector<32x32xi1> to vector<32x32xi32>
    %537 = arith.sitofp %536 : vector<32x32xi32> to vector<32x32xf32>
    %c2_i32_232 = arith.constant 2 : i32
    %538 = vector.broadcast %c2_i32_232 : i32 to vector<32x32xi32>
    %539 = arith.addi %503, %538 : vector<32x32xi32>
    %c1_i32_233 = arith.constant 1 : i32
    %540 = vector.broadcast %c1_i32_233 : i32 to vector<32x32xi32>
    %541 = arith.subi %539, %540 : vector<32x32xi32>
    %c0_i32_234 = arith.constant 0 : i32
    %542 = vector.broadcast %c0_i32_234 : i32 to vector<32x32xi32>
    %543 = arith.cmpi slt, %541, %542 : vector<32x32xi32>
    %c0_i32_235 = arith.constant 0 : i32
    %544 = vector.broadcast %c0_i32_235 : i32 to vector<32x32xi32>
    %545 = arith.subi %544, %541 : vector<32x32xi32>
    %546 = arith.select %543, %545, %541 : vector<32x32xi1>, vector<32x32xi32>
    %c32_i32_236 = arith.constant 32 : i32
    %547 = vector.broadcast %c32_i32_236 : i32 to vector<32x32xi32>
    %548 = arith.cmpi sge, %546, %547 : vector<32x32xi32>
    %c62_i32_237 = arith.constant 62 : i32
    %549 = vector.broadcast %c62_i32_237 : i32 to vector<32x32xi32>
    %550 = arith.subi %549, %546 : vector<32x32xi32>
    %551 = arith.select %548, %550, %546 : vector<32x32xi1>, vector<32x32xi32>
    %552 = arith.cmpi eq, %502, %551 : vector<32x32xi32>
    %553 = arith.extui %552 : vector<32x32xi1> to vector<32x32xi32>
    %554 = arith.sitofp %553 : vector<32x32xi32> to vector<32x32xf32>
    %cst_238 = arith.constant dense<0.000000e+00> : vector<4x32xf32>
    %555 = tpu.matmul %501, %520, %cst_238 {dimension_numbers = #tpu.dot_dimension_numbers<[1], [0], [0], [1], [0, 0, 1, 1], [], []>} : vector<4x32xf32>, vector<32x32xf32>, vector<4x32xf32> -> vector<4x32xf32>
    %cst_239 = arith.constant dense<0.000000e+00> : vector<4x32xf32>
    %556 = tpu.matmul %501, %537, %cst_239 {dimension_numbers = #tpu.dot_dimension_numbers<[1], [0], [0], [1], [0, 0, 1, 1], [], []>} : vector<4x32xf32>, vector<32x32xf32>, vector<4x32xf32> -> vector<4x32xf32>
    %cst_240 = arith.constant dense<0.000000e+00> : vector<4x32xf32>
    %557 = tpu.matmul %501, %554, %cst_240 {dimension_numbers = #tpu.dot_dimension_numbers<[1], [0], [0], [1], [0, 0, 1, 1], [], []>} : vector<4x32xf32>, vector<32x32xf32>, vector<4x32xf32> -> vector<4x32xf32>
    %558 = tpu.concatenate %555, %556, %557 in 0 : vector<4x32xf32>, vector<4x32xf32>, vector<4x32xf32> -> vector<12x32xf32>
    %cst_241 = arith.constant dense<0.000000e+00> : vector<4x32xf32>
    %559 = tpu.matmul %491, %558, %cst_241 {dimension_numbers = #tpu.dot_dimension_numbers<[1], [0], [0], [1], [0, 0, 1, 1], [], []>} : vector<4x12xf32>, vector<12x32xf32>, vector<4x32xf32> -> vector<4x32xf32>
    %560 = vector.broadcast %492 : vector<4x1xf32> to vector<4x32xf32>
    %561 = arith.addf %559, %560 : vector<4x32xf32>
    %cst_242 = arith.constant 0.000000e+00 : f32
    %562 = vector.broadcast %cst_242 : f32 to vector<4x32xf32>
    %563 = arith.cmpf oge, %561, %562 : vector<4x32xf32>
    %cst_243 = arith.constant 2.000000e-01 : f32
    %564 = vector.broadcast %cst_243 : f32 to vector<4x32xf32>
    %565 = arith.mulf %561, %564 : vector<4x32xf32>
    %566 = arith.select %563, %561, %565 : vector<4x32xi1>, vector<4x32xf32>
    %cst_244 = arith.constant dense<0.000000e+00> : vector<4x32xf32>
    %567 = tpu.matmul %493, %566, %cst_244 {dimension_numbers = #tpu.dot_dimension_numbers<[1], [0], [0], [1], [0, 0, 1, 1], [], []>} : vector<4x4xf32>, vector<4x32xf32>, vector<4x32xf32> -> vector<4x32xf32>
    %568 = vector.broadcast %494 : vector<4x1xf32> to vector<4x32xf32>
    %569 = arith.addf %567, %568 : vector<4x32xf32>
    %cst_245 = arith.constant dense<0.000000e+00> : vector<4x32xf32>
    %570 = tpu.matmul %495, %490, %cst_245 {dimension_numbers = #tpu.dot_dimension_numbers<[1], [0], [0], [1], [0, 0, 1, 1], [], []>} : vector<4x4xf32>, vector<4x32xf32>, vector<4x32xf32> -> vector<4x32xf32>
    %571 = vector.broadcast %496 : vector<4x1xf32> to vector<4x32xf32>
    %572 = arith.addf %570, %571 : vector<4x32xf32>
    %573 = arith.addf %569, %572 : vector<4x32xf32>
    %c0_246 = arith.constant 0 : index
    %c0_247 = arith.constant 0 : index
    %574 = vector.load %arg32[%c0_246, %c0_247] : memref<4x12xf32, #tpu.memory_space<vmem>>, vector<4x12xf32>
    %c0_248 = arith.constant 0 : index
    %c0_249 = arith.constant 0 : index
    %575 = vector.load %arg33[%c0_248, %c0_249] : memref<4x1xf32, #tpu.memory_space<vmem>>, vector<4x1xf32>
    %c0_250 = arith.constant 0 : index
    %c0_251 = arith.constant 0 : index
    %576 = vector.load %arg34[%c0_250, %c0_251] : memref<4x4xf32, #tpu.memory_space<vmem>>, vector<4x4xf32>
    %c0_252 = arith.constant 0 : index
    %c0_253 = arith.constant 0 : index
    %577 = vector.load %arg35[%c0_252, %c0_253] : memref<4x1xf32, #tpu.memory_space<vmem>>, vector<4x1xf32>
    %c0_254 = arith.constant 0 : index
    %c0_255 = arith.constant 0 : index
    %578 = vector.load %arg36[%c0_254, %c0_255] : memref<4x4xf32, #tpu.memory_space<vmem>>, vector<4x4xf32>
    %c0_256 = arith.constant 0 : index
    %c0_257 = arith.constant 0 : index
    %579 = vector.load %arg37[%c0_256, %c0_257] : memref<4x1xf32, #tpu.memory_space<vmem>>, vector<4x1xf32>
    %cst_258 = arith.constant 0.000000e+00 : f32
    %580 = vector.broadcast %cst_258 : f32 to vector<4x32xf32>
    %581 = arith.cmpf oge, %573, %580 : vector<4x32xf32>
    %cst_259 = arith.constant 2.000000e-01 : f32
    %582 = vector.broadcast %cst_259 : f32 to vector<4x32xf32>
    %583 = arith.mulf %573, %582 : vector<4x32xf32>
    %584 = arith.select %581, %573, %583 : vector<4x32xi1>, vector<4x32xf32>
    %585 = tpu.iota {dimensions = array<i32: 0>} : vector<32x32xi32>
    %586 = tpu.iota {dimensions = array<i32: 1>} : vector<32x32xi32>
    %c0_i32_260 = arith.constant 0 : i32
    %587 = vector.broadcast %c0_i32_260 : i32 to vector<32x32xi32>
    %588 = arith.addi %586, %587 : vector<32x32xi32>
    %c3_i32_261 = arith.constant 3 : i32
    %589 = vector.broadcast %c3_i32_261 : i32 to vector<32x32xi32>
    %590 = arith.subi %588, %589 : vector<32x32xi32>
    %c0_i32_262 = arith.constant 0 : i32
    %591 = vector.broadcast %c0_i32_262 : i32 to vector<32x32xi32>
    %592 = arith.cmpi slt, %590, %591 : vector<32x32xi32>
    %c0_i32_263 = arith.constant 0 : i32
    %593 = vector.broadcast %c0_i32_263 : i32 to vector<32x32xi32>
    %594 = arith.subi %593, %590 : vector<32x32xi32>
    %595 = arith.select %592, %594, %590 : vector<32x32xi1>, vector<32x32xi32>
    %c32_i32_264 = arith.constant 32 : i32
    %596 = vector.broadcast %c32_i32_264 : i32 to vector<32x32xi32>
    %597 = arith.cmpi sge, %595, %596 : vector<32x32xi32>
    %c62_i32_265 = arith.constant 62 : i32
    %598 = vector.broadcast %c62_i32_265 : i32 to vector<32x32xi32>
    %599 = arith.subi %598, %595 : vector<32x32xi32>
    %600 = arith.select %597, %599, %595 : vector<32x32xi1>, vector<32x32xi32>
    %601 = arith.cmpi eq, %585, %600 : vector<32x32xi32>
    %602 = arith.extui %601 : vector<32x32xi1> to vector<32x32xi32>
    %603 = arith.sitofp %602 : vector<32x32xi32> to vector<32x32xf32>
    %c3_i32_266 = arith.constant 3 : i32
    %604 = vector.broadcast %c3_i32_266 : i32 to vector<32x32xi32>
    %605 = arith.addi %586, %604 : vector<32x32xi32>
    %c3_i32_267 = arith.constant 3 : i32
    %606 = vector.broadcast %c3_i32_267 : i32 to vector<32x32xi32>
    %607 = arith.subi %605, %606 : vector<32x32xi32>
    %c0_i32_268 = arith.constant 0 : i32
    %608 = vector.broadcast %c0_i32_268 : i32 to vector<32x32xi32>
    %609 = arith.cmpi slt, %607, %608 : vector<32x32xi32>
    %c0_i32_269 = arith.constant 0 : i32
    %610 = vector.broadcast %c0_i32_269 : i32 to vector<32x32xi32>
    %611 = arith.subi %610, %607 : vector<32x32xi32>
    %612 = arith.select %609, %611, %607 : vector<32x32xi1>, vector<32x32xi32>
    %c32_i32_270 = arith.constant 32 : i32
    %613 = vector.broadcast %c32_i32_270 : i32 to vector<32x32xi32>
    %614 = arith.cmpi sge, %612, %613 : vector<32x32xi32>
    %c62_i32_271 = arith.constant 62 : i32
    %615 = vector.broadcast %c62_i32_271 : i32 to vector<32x32xi32>
    %616 = arith.subi %615, %612 : vector<32x32xi32>
    %617 = arith.select %614, %616, %612 : vector<32x32xi1>, vector<32x32xi32>
    %618 = arith.cmpi eq, %585, %617 : vector<32x32xi32>
    %619 = arith.extui %618 : vector<32x32xi1> to vector<32x32xi32>
    %620 = arith.sitofp %619 : vector<32x32xi32> to vector<32x32xf32>
    %c6_i32_272 = arith.constant 6 : i32
    %621 = vector.broadcast %c6_i32_272 : i32 to vector<32x32xi32>
    %622 = arith.addi %586, %621 : vector<32x32xi32>
    %c3_i32_273 = arith.constant 3 : i32
    %623 = vector.broadcast %c3_i32_273 : i32 to vector<32x32xi32>
    %624 = arith.subi %622, %623 : vector<32x32xi32>
    %c0_i32_274 = arith.constant 0 : i32
    %625 = vector.broadcast %c0_i32_274 : i32 to vector<32x32xi32>
    %626 = arith.cmpi slt, %624, %625 : vector<32x32xi32>
    %c0_i32_275 = arith.constant 0 : i32
    %627 = vector.broadcast %c0_i32_275 : i32 to vector<32x32xi32>
    %628 = arith.subi %627, %624 : vector<32x32xi32>
    %629 = arith.select %626, %628, %624 : vector<32x32xi1>, vector<32x32xi32>
    %c32_i32_276 = arith.constant 32 : i32
    %630 = vector.broadcast %c32_i32_276 : i32 to vector<32x32xi32>
    %631 = arith.cmpi sge, %629, %630 : vector<32x32xi32>
    %c62_i32_277 = arith.constant 62 : i32
    %632 = vector.broadcast %c62_i32_277 : i32 to vector<32x32xi32>
    %633 = arith.subi %632, %629 : vector<32x32xi32>
    %634 = arith.select %631, %633, %629 : vector<32x32xi1>, vector<32x32xi32>
    %635 = arith.cmpi eq, %585, %634 : vector<32x32xi32>
    %636 = arith.extui %635 : vector<32x32xi1> to vector<32x32xi32>
    %637 = arith.sitofp %636 : vector<32x32xi32> to vector<32x32xf32>
    %cst_278 = arith.constant dense<0.000000e+00> : vector<4x32xf32>
    %638 = tpu.matmul %584, %603, %cst_278 {dimension_numbers = #tpu.dot_dimension_numbers<[1], [0], [0], [1], [0, 0, 1, 1], [], []>} : vector<4x32xf32>, vector<32x32xf32>, vector<4x32xf32> -> vector<4x32xf32>
    %cst_279 = arith.constant dense<0.000000e+00> : vector<4x32xf32>
    %639 = tpu.matmul %584, %620, %cst_279 {dimension_numbers = #tpu.dot_dimension_numbers<[1], [0], [0], [1], [0, 0, 1, 1], [], []>} : vector<4x32xf32>, vector<32x32xf32>, vector<4x32xf32> -> vector<4x32xf32>
    %cst_280 = arith.constant dense<0.000000e+00> : vector<4x32xf32>
    %640 = tpu.matmul %584, %637, %cst_280 {dimension_numbers = #tpu.dot_dimension_numbers<[1], [0], [0], [1], [0, 0, 1, 1], [], []>} : vector<4x32xf32>, vector<32x32xf32>, vector<4x32xf32> -> vector<4x32xf32>
    %641 = tpu.concatenate %638, %639, %640 in 0 : vector<4x32xf32>, vector<4x32xf32>, vector<4x32xf32> -> vector<12x32xf32>
    %cst_281 = arith.constant dense<0.000000e+00> : vector<4x32xf32>
    %642 = tpu.matmul %574, %641, %cst_281 {dimension_numbers = #tpu.dot_dimension_numbers<[1], [0], [0], [1], [0, 0, 1, 1], [], []>} : vector<4x12xf32>, vector<12x32xf32>, vector<4x32xf32> -> vector<4x32xf32>
    %643 = vector.broadcast %575 : vector<4x1xf32> to vector<4x32xf32>
    %644 = arith.addf %642, %643 : vector<4x32xf32>
    %cst_282 = arith.constant 0.000000e+00 : f32
    %645 = vector.broadcast %cst_282 : f32 to vector<4x32xf32>
    %646 = arith.cmpf oge, %644, %645 : vector<4x32xf32>
    %cst_283 = arith.constant 2.000000e-01 : f32
    %647 = vector.broadcast %cst_283 : f32 to vector<4x32xf32>
    %648 = arith.mulf %644, %647 : vector<4x32xf32>
    %649 = arith.select %646, %644, %648 : vector<4x32xi1>, vector<4x32xf32>
    %cst_284 = arith.constant dense<0.000000e+00> : vector<4x32xf32>
    %650 = tpu.matmul %576, %649, %cst_284 {dimension_numbers = #tpu.dot_dimension_numbers<[1], [0], [0], [1], [0, 0, 1, 1], [], []>} : vector<4x4xf32>, vector<4x32xf32>, vector<4x32xf32> -> vector<4x32xf32>
    %651 = vector.broadcast %577 : vector<4x1xf32> to vector<4x32xf32>
    %652 = arith.addf %650, %651 : vector<4x32xf32>
    %cst_285 = arith.constant dense<0.000000e+00> : vector<4x32xf32>
    %653 = tpu.matmul %578, %573, %cst_285 {dimension_numbers = #tpu.dot_dimension_numbers<[1], [0], [0], [1], [0, 0, 1, 1], [], []>} : vector<4x4xf32>, vector<4x32xf32>, vector<4x32xf32> -> vector<4x32xf32>
    %654 = vector.broadcast %579 : vector<4x1xf32> to vector<4x32xf32>
    %655 = arith.addf %653, %654 : vector<4x32xf32>
    %656 = arith.addf %652, %655 : vector<4x32xf32>
    %c0_286 = arith.constant 0 : index
    %c0_287 = arith.constant 0 : index
    %657 = vector.load %arg38[%c0_286, %c0_287] : memref<4x12xf32, #tpu.memory_space<vmem>>, vector<4x12xf32>
    %c0_288 = arith.constant 0 : index
    %c0_289 = arith.constant 0 : index
    %658 = vector.load %arg39[%c0_288, %c0_289] : memref<4x1xf32, #tpu.memory_space<vmem>>, vector<4x1xf32>
    %c0_290 = arith.constant 0 : index
    %c0_291 = arith.constant 0 : index
    %659 = vector.load %arg40[%c0_290, %c0_291] : memref<4x4xf32, #tpu.memory_space<vmem>>, vector<4x4xf32>
    %c0_292 = arith.constant 0 : index
    %c0_293 = arith.constant 0 : index
    %660 = vector.load %arg41[%c0_292, %c0_293] : memref<4x1xf32, #tpu.memory_space<vmem>>, vector<4x1xf32>
    %c0_294 = arith.constant 0 : index
    %c0_295 = arith.constant 0 : index
    %661 = vector.load %arg42[%c0_294, %c0_295] : memref<4x4xf32, #tpu.memory_space<vmem>>, vector<4x4xf32>
    %c0_296 = arith.constant 0 : index
    %c0_297 = arith.constant 0 : index
    %662 = vector.load %arg43[%c0_296, %c0_297] : memref<4x1xf32, #tpu.memory_space<vmem>>, vector<4x1xf32>
    %cst_298 = arith.constant 0.000000e+00 : f32
    %663 = vector.broadcast %cst_298 : f32 to vector<4x32xf32>
    %664 = arith.cmpf oge, %656, %663 : vector<4x32xf32>
    %cst_299 = arith.constant 2.000000e-01 : f32
    %665 = vector.broadcast %cst_299 : f32 to vector<4x32xf32>
    %666 = arith.mulf %656, %665 : vector<4x32xf32>
    %667 = arith.select %664, %656, %666 : vector<4x32xi1>, vector<4x32xf32>
    %668 = tpu.iota {dimensions = array<i32: 0>} : vector<32x32xi32>
    %669 = tpu.iota {dimensions = array<i32: 1>} : vector<32x32xi32>
    %c0_i32_300 = arith.constant 0 : i32
    %670 = vector.broadcast %c0_i32_300 : i32 to vector<32x32xi32>
    %671 = arith.addi %669, %670 : vector<32x32xi32>
    %c9_i32_301 = arith.constant 9 : i32
    %672 = vector.broadcast %c9_i32_301 : i32 to vector<32x32xi32>
    %673 = arith.subi %671, %672 : vector<32x32xi32>
    %c0_i32_302 = arith.constant 0 : i32
    %674 = vector.broadcast %c0_i32_302 : i32 to vector<32x32xi32>
    %675 = arith.cmpi slt, %673, %674 : vector<32x32xi32>
    %c0_i32_303 = arith.constant 0 : i32
    %676 = vector.broadcast %c0_i32_303 : i32 to vector<32x32xi32>
    %677 = arith.subi %676, %673 : vector<32x32xi32>
    %678 = arith.select %675, %677, %673 : vector<32x32xi1>, vector<32x32xi32>
    %c32_i32_304 = arith.constant 32 : i32
    %679 = vector.broadcast %c32_i32_304 : i32 to vector<32x32xi32>
    %680 = arith.cmpi sge, %678, %679 : vector<32x32xi32>
    %c62_i32_305 = arith.constant 62 : i32
    %681 = vector.broadcast %c62_i32_305 : i32 to vector<32x32xi32>
    %682 = arith.subi %681, %678 : vector<32x32xi32>
    %683 = arith.select %680, %682, %678 : vector<32x32xi1>, vector<32x32xi32>
    %684 = arith.cmpi eq, %668, %683 : vector<32x32xi32>
    %685 = arith.extui %684 : vector<32x32xi1> to vector<32x32xi32>
    %686 = arith.sitofp %685 : vector<32x32xi32> to vector<32x32xf32>
    %c9_i32_306 = arith.constant 9 : i32
    %687 = vector.broadcast %c9_i32_306 : i32 to vector<32x32xi32>
    %688 = arith.addi %669, %687 : vector<32x32xi32>
    %c9_i32_307 = arith.constant 9 : i32
    %689 = vector.broadcast %c9_i32_307 : i32 to vector<32x32xi32>
    %690 = arith.subi %688, %689 : vector<32x32xi32>
    %c0_i32_308 = arith.constant 0 : i32
    %691 = vector.broadcast %c0_i32_308 : i32 to vector<32x32xi32>
    %692 = arith.cmpi slt, %690, %691 : vector<32x32xi32>
    %c0_i32_309 = arith.constant 0 : i32
    %693 = vector.broadcast %c0_i32_309 : i32 to vector<32x32xi32>
    %694 = arith.subi %693, %690 : vector<32x32xi32>
    %695 = arith.select %692, %694, %690 : vector<32x32xi1>, vector<32x32xi32>
    %c32_i32_310 = arith.constant 32 : i32
    %696 = vector.broadcast %c32_i32_310 : i32 to vector<32x32xi32>
    %697 = arith.cmpi sge, %695, %696 : vector<32x32xi32>
    %c62_i32_311 = arith.constant 62 : i32
    %698 = vector.broadcast %c62_i32_311 : i32 to vector<32x32xi32>
    %699 = arith.subi %698, %695 : vector<32x32xi32>
    %700 = arith.select %697, %699, %695 : vector<32x32xi1>, vector<32x32xi32>
    %701 = arith.cmpi eq, %668, %700 : vector<32x32xi32>
    %702 = arith.extui %701 : vector<32x32xi1> to vector<32x32xi32>
    %703 = arith.sitofp %702 : vector<32x32xi32> to vector<32x32xf32>
    %c18_i32_312 = arith.constant 18 : i32
    %704 = vector.broadcast %c18_i32_312 : i32 to vector<32x32xi32>
    %705 = arith.addi %669, %704 : vector<32x32xi32>
    %c9_i32_313 = arith.constant 9 : i32
    %706 = vector.broadcast %c9_i32_313 : i32 to vector<32x32xi32>
    %707 = arith.subi %705, %706 : vector<32x32xi32>
    %c0_i32_314 = arith.constant 0 : i32
    %708 = vector.broadcast %c0_i32_314 : i32 to vector<32x32xi32>
    %709 = arith.cmpi slt, %707, %708 : vector<32x32xi32>
    %c0_i32_315 = arith.constant 0 : i32
    %710 = vector.broadcast %c0_i32_315 : i32 to vector<32x32xi32>
    %711 = arith.subi %710, %707 : vector<32x32xi32>
    %712 = arith.select %709, %711, %707 : vector<32x32xi1>, vector<32x32xi32>
    %c32_i32_316 = arith.constant 32 : i32
    %713 = vector.broadcast %c32_i32_316 : i32 to vector<32x32xi32>
    %714 = arith.cmpi sge, %712, %713 : vector<32x32xi32>
    %c62_i32_317 = arith.constant 62 : i32
    %715 = vector.broadcast %c62_i32_317 : i32 to vector<32x32xi32>
    %716 = arith.subi %715, %712 : vector<32x32xi32>
    %717 = arith.select %714, %716, %712 : vector<32x32xi1>, vector<32x32xi32>
    %718 = arith.cmpi eq, %668, %717 : vector<32x32xi32>
    %719 = arith.extui %718 : vector<32x32xi1> to vector<32x32xi32>
    %720 = arith.sitofp %719 : vector<32x32xi32> to vector<32x32xf32>
    %cst_318 = arith.constant dense<0.000000e+00> : vector<4x32xf32>
    %721 = tpu.matmul %667, %686, %cst_318 {dimension_numbers = #tpu.dot_dimension_numbers<[1], [0], [0], [1], [0, 0, 1, 1], [], []>} : vector<4x32xf32>, vector<32x32xf32>, vector<4x32xf32> -> vector<4x32xf32>
    %cst_319 = arith.constant dense<0.000000e+00> : vector<4x32xf32>
    %722 = tpu.matmul %667, %703, %cst_319 {dimension_numbers = #tpu.dot_dimension_numbers<[1], [0], [0], [1], [0, 0, 1, 1], [], []>} : vector<4x32xf32>, vector<32x32xf32>, vector<4x32xf32> -> vector<4x32xf32>
    %cst_320 = arith.constant dense<0.000000e+00> : vector<4x32xf32>
    %723 = tpu.matmul %667, %720, %cst_320 {dimension_numbers = #tpu.dot_dimension_numbers<[1], [0], [0], [1], [0, 0, 1, 1], [], []>} : vector<4x32xf32>, vector<32x32xf32>, vector<4x32xf32> -> vector<4x32xf32>
    %724 = tpu.concatenate %721, %722, %723 in 0 : vector<4x32xf32>, vector<4x32xf32>, vector<4x32xf32> -> vector<12x32xf32>
    %cst_321 = arith.constant dense<0.000000e+00> : vector<4x32xf32>
    %725 = tpu.matmul %657, %724, %cst_321 {dimension_numbers = #tpu.dot_dimension_numbers<[1], [0], [0], [1], [0, 0, 1, 1], [], []>} : vector<4x12xf32>, vector<12x32xf32>, vector<4x32xf32> -> vector<4x32xf32>
    %726 = vector.broadcast %658 : vector<4x1xf32> to vector<4x32xf32>
    %727 = arith.addf %725, %726 : vector<4x32xf32>
    %cst_322 = arith.constant 0.000000e+00 : f32
    %728 = vector.broadcast %cst_322 : f32 to vector<4x32xf32>
    %729 = arith.cmpf oge, %727, %728 : vector<4x32xf32>
    %cst_323 = arith.constant 2.000000e-01 : f32
    %730 = vector.broadcast %cst_323 : f32 to vector<4x32xf32>
    %731 = arith.mulf %727, %730 : vector<4x32xf32>
    %732 = arith.select %729, %727, %731 : vector<4x32xi1>, vector<4x32xf32>
    %cst_324 = arith.constant dense<0.000000e+00> : vector<4x32xf32>
    %733 = tpu.matmul %659, %732, %cst_324 {dimension_numbers = #tpu.dot_dimension_numbers<[1], [0], [0], [1], [0, 0, 1, 1], [], []>} : vector<4x4xf32>, vector<4x32xf32>, vector<4x32xf32> -> vector<4x32xf32>
    %734 = vector.broadcast %660 : vector<4x1xf32> to vector<4x32xf32>
    %735 = arith.addf %733, %734 : vector<4x32xf32>
    %cst_325 = arith.constant dense<0.000000e+00> : vector<4x32xf32>
    %736 = tpu.matmul %661, %656, %cst_325 {dimension_numbers = #tpu.dot_dimension_numbers<[1], [0], [0], [1], [0, 0, 1, 1], [], []>} : vector<4x4xf32>, vector<4x32xf32>, vector<4x32xf32> -> vector<4x32xf32>
    %737 = vector.broadcast %662 : vector<4x1xf32> to vector<4x32xf32>
    %738 = arith.addf %736, %737 : vector<4x32xf32>
    %739 = arith.addf %735, %738 : vector<4x32xf32>
    %c0_326 = arith.constant 0 : index
    %c0_327 = arith.constant 0 : index
    %740 = vector.load %arg44[%c0_326, %c0_327] : memref<1x28xf32, #tpu.memory_space<vmem>>, vector<1x28xf32>
    %c0_328 = arith.constant 0 : index
    %c0_329 = arith.constant 0 : index
    %741 = vector.load %arg45[%c0_328, %c0_329] : memref<1x1xf32, #tpu.memory_space<vmem>>, vector<1x1xf32>
    %cst_330 = arith.constant 0.000000e+00 : f32
    %742 = vector.broadcast %cst_330 : f32 to vector<4x32xf32>
    %743 = arith.cmpf oge, %739, %742 : vector<4x32xf32>
    %cst_331 = arith.constant 2.000000e-01 : f32
    %744 = vector.broadcast %cst_331 : f32 to vector<4x32xf32>
    %745 = arith.mulf %739, %744 : vector<4x32xf32>
    %746 = arith.select %743, %739, %745 : vector<4x32xi1>, vector<4x32xf32>
    %747 = tpu.iota {dimensions = array<i32: 0>} : vector<32x32xi32>
    %748 = tpu.iota {dimensions = array<i32: 1>} : vector<32x32xi32>
    %c0_i32_332 = arith.constant 0 : i32
    %749 = vector.broadcast %c0_i32_332 : i32 to vector<32x32xi32>
    %750 = arith.addi %748, %749 : vector<32x32xi32>
    %c3_i32_333 = arith.constant 3 : i32
    %751 = vector.broadcast %c3_i32_333 : i32 to vector<32x32xi32>
    %752 = arith.subi %750, %751 : vector<32x32xi32>
    %c0_i32_334 = arith.constant 0 : i32
    %753 = vector.broadcast %c0_i32_334 : i32 to vector<32x32xi32>
    %754 = arith.cmpi slt, %752, %753 : vector<32x32xi32>
    %c0_i32_335 = arith.constant 0 : i32
    %755 = vector.broadcast %c0_i32_335 : i32 to vector<32x32xi32>
    %756 = arith.subi %755, %752 : vector<32x32xi32>
    %757 = arith.select %754, %756, %752 : vector<32x32xi1>, vector<32x32xi32>
    %c32_i32_336 = arith.constant 32 : i32
    %758 = vector.broadcast %c32_i32_336 : i32 to vector<32x32xi32>
    %759 = arith.cmpi sge, %757, %758 : vector<32x32xi32>
    %c62_i32_337 = arith.constant 62 : i32
    %760 = vector.broadcast %c62_i32_337 : i32 to vector<32x32xi32>
    %761 = arith.subi %760, %757 : vector<32x32xi32>
    %762 = arith.select %759, %761, %757 : vector<32x32xi1>, vector<32x32xi32>
    %763 = arith.cmpi eq, %747, %762 : vector<32x32xi32>
    %764 = arith.extui %763 : vector<32x32xi1> to vector<32x32xi32>
    %765 = arith.sitofp %764 : vector<32x32xi32> to vector<32x32xf32>
    %c1_i32_338 = arith.constant 1 : i32
    %766 = vector.broadcast %c1_i32_338 : i32 to vector<32x32xi32>
    %767 = arith.addi %748, %766 : vector<32x32xi32>
    %c3_i32_339 = arith.constant 3 : i32
    %768 = vector.broadcast %c3_i32_339 : i32 to vector<32x32xi32>
    %769 = arith.subi %767, %768 : vector<32x32xi32>
    %c0_i32_340 = arith.constant 0 : i32
    %770 = vector.broadcast %c0_i32_340 : i32 to vector<32x32xi32>
    %771 = arith.cmpi slt, %769, %770 : vector<32x32xi32>
    %c0_i32_341 = arith.constant 0 : i32
    %772 = vector.broadcast %c0_i32_341 : i32 to vector<32x32xi32>
    %773 = arith.subi %772, %769 : vector<32x32xi32>
    %774 = arith.select %771, %773, %769 : vector<32x32xi1>, vector<32x32xi32>
    %c32_i32_342 = arith.constant 32 : i32
    %775 = vector.broadcast %c32_i32_342 : i32 to vector<32x32xi32>
    %776 = arith.cmpi sge, %774, %775 : vector<32x32xi32>
    %c62_i32_343 = arith.constant 62 : i32
    %777 = vector.broadcast %c62_i32_343 : i32 to vector<32x32xi32>
    %778 = arith.subi %777, %774 : vector<32x32xi32>
    %779 = arith.select %776, %778, %774 : vector<32x32xi1>, vector<32x32xi32>
    %780 = arith.cmpi eq, %747, %779 : vector<32x32xi32>
    %781 = arith.extui %780 : vector<32x32xi1> to vector<32x32xi32>
    %782 = arith.sitofp %781 : vector<32x32xi32> to vector<32x32xf32>
    %c2_i32_344 = arith.constant 2 : i32
    %783 = vector.broadcast %c2_i32_344 : i32 to vector<32x32xi32>
    %784 = arith.addi %748, %783 : vector<32x32xi32>
    %c3_i32_345 = arith.constant 3 : i32
    %785 = vector.broadcast %c3_i32_345 : i32 to vector<32x32xi32>
    %786 = arith.subi %784, %785 : vector<32x32xi32>
    %c0_i32_346 = arith.constant 0 : i32
    %787 = vector.broadcast %c0_i32_346 : i32 to vector<32x32xi32>
    %788 = arith.cmpi slt, %786, %787 : vector<32x32xi32>
    %c0_i32_347 = arith.constant 0 : i32
    %789 = vector.broadcast %c0_i32_347 : i32 to vector<32x32xi32>
    %790 = arith.subi %789, %786 : vector<32x32xi32>
    %791 = arith.select %788, %790, %786 : vector<32x32xi1>, vector<32x32xi32>
    %c32_i32_348 = arith.constant 32 : i32
    %792 = vector.broadcast %c32_i32_348 : i32 to vector<32x32xi32>
    %793 = arith.cmpi sge, %791, %792 : vector<32x32xi32>
    %c62_i32_349 = arith.constant 62 : i32
    %794 = vector.broadcast %c62_i32_349 : i32 to vector<32x32xi32>
    %795 = arith.subi %794, %791 : vector<32x32xi32>
    %796 = arith.select %793, %795, %791 : vector<32x32xi1>, vector<32x32xi32>
    %797 = arith.cmpi eq, %747, %796 : vector<32x32xi32>
    %798 = arith.extui %797 : vector<32x32xi1> to vector<32x32xi32>
    %799 = arith.sitofp %798 : vector<32x32xi32> to vector<32x32xf32>
    %c3_i32_350 = arith.constant 3 : i32
    %800 = vector.broadcast %c3_i32_350 : i32 to vector<32x32xi32>
    %801 = arith.addi %748, %800 : vector<32x32xi32>
    %c3_i32_351 = arith.constant 3 : i32
    %802 = vector.broadcast %c3_i32_351 : i32 to vector<32x32xi32>
    %803 = arith.subi %801, %802 : vector<32x32xi32>
    %c0_i32_352 = arith.constant 0 : i32
    %804 = vector.broadcast %c0_i32_352 : i32 to vector<32x32xi32>
    %805 = arith.cmpi slt, %803, %804 : vector<32x32xi32>
    %c0_i32_353 = arith.constant 0 : i32
    %806 = vector.broadcast %c0_i32_353 : i32 to vector<32x32xi32>
    %807 = arith.subi %806, %803 : vector<32x32xi32>
    %808 = arith.select %805, %807, %803 : vector<32x32xi1>, vector<32x32xi32>
    %c32_i32_354 = arith.constant 32 : i32
    %809 = vector.broadcast %c32_i32_354 : i32 to vector<32x32xi32>
    %810 = arith.cmpi sge, %808, %809 : vector<32x32xi32>
    %c62_i32_355 = arith.constant 62 : i32
    %811 = vector.broadcast %c62_i32_355 : i32 to vector<32x32xi32>
    %812 = arith.subi %811, %808 : vector<32x32xi32>
    %813 = arith.select %810, %812, %808 : vector<32x32xi1>, vector<32x32xi32>
    %814 = arith.cmpi eq, %747, %813 : vector<32x32xi32>
    %815 = arith.extui %814 : vector<32x32xi1> to vector<32x32xi32>
    %816 = arith.sitofp %815 : vector<32x32xi32> to vector<32x32xf32>
    %c4_i32_356 = arith.constant 4 : i32
    %817 = vector.broadcast %c4_i32_356 : i32 to vector<32x32xi32>
    %818 = arith.addi %748, %817 : vector<32x32xi32>
    %c3_i32_357 = arith.constant 3 : i32
    %819 = vector.broadcast %c3_i32_357 : i32 to vector<32x32xi32>
    %820 = arith.subi %818, %819 : vector<32x32xi32>
    %c0_i32_358 = arith.constant 0 : i32
    %821 = vector.broadcast %c0_i32_358 : i32 to vector<32x32xi32>
    %822 = arith.cmpi slt, %820, %821 : vector<32x32xi32>
    %c0_i32_359 = arith.constant 0 : i32
    %823 = vector.broadcast %c0_i32_359 : i32 to vector<32x32xi32>
    %824 = arith.subi %823, %820 : vector<32x32xi32>
    %825 = arith.select %822, %824, %820 : vector<32x32xi1>, vector<32x32xi32>
    %c32_i32_360 = arith.constant 32 : i32
    %826 = vector.broadcast %c32_i32_360 : i32 to vector<32x32xi32>
    %827 = arith.cmpi sge, %825, %826 : vector<32x32xi32>
    %c62_i32_361 = arith.constant 62 : i32
    %828 = vector.broadcast %c62_i32_361 : i32 to vector<32x32xi32>
    %829 = arith.subi %828, %825 : vector<32x32xi32>
    %830 = arith.select %827, %829, %825 : vector<32x32xi1>, vector<32x32xi32>
    %831 = arith.cmpi eq, %747, %830 : vector<32x32xi32>
    %832 = arith.extui %831 : vector<32x32xi1> to vector<32x32xi32>
    %833 = arith.sitofp %832 : vector<32x32xi32> to vector<32x32xf32>
    %c5_i32_362 = arith.constant 5 : i32
    %834 = vector.broadcast %c5_i32_362 : i32 to vector<32x32xi32>
    %835 = arith.addi %748, %834 : vector<32x32xi32>
    %c3_i32_363 = arith.constant 3 : i32
    %836 = vector.broadcast %c3_i32_363 : i32 to vector<32x32xi32>
    %837 = arith.subi %835, %836 : vector<32x32xi32>
    %c0_i32_364 = arith.constant 0 : i32
    %838 = vector.broadcast %c0_i32_364 : i32 to vector<32x32xi32>
    %839 = arith.cmpi slt, %837, %838 : vector<32x32xi32>
    %c0_i32_365 = arith.constant 0 : i32
    %840 = vector.broadcast %c0_i32_365 : i32 to vector<32x32xi32>
    %841 = arith.subi %840, %837 : vector<32x32xi32>
    %842 = arith.select %839, %841, %837 : vector<32x32xi1>, vector<32x32xi32>
    %c32_i32_366 = arith.constant 32 : i32
    %843 = vector.broadcast %c32_i32_366 : i32 to vector<32x32xi32>
    %844 = arith.cmpi sge, %842, %843 : vector<32x32xi32>
    %c62_i32_367 = arith.constant 62 : i32
    %845 = vector.broadcast %c62_i32_367 : i32 to vector<32x32xi32>
    %846 = arith.subi %845, %842 : vector<32x32xi32>
    %847 = arith.select %844, %846, %842 : vector<32x32xi1>, vector<32x32xi32>
    %848 = arith.cmpi eq, %747, %847 : vector<32x32xi32>
    %849 = arith.extui %848 : vector<32x32xi1> to vector<32x32xi32>
    %850 = arith.sitofp %849 : vector<32x32xi32> to vector<32x32xf32>
    %c6_i32_368 = arith.constant 6 : i32
    %851 = vector.broadcast %c6_i32_368 : i32 to vector<32x32xi32>
    %852 = arith.addi %748, %851 : vector<32x32xi32>
    %c3_i32_369 = arith.constant 3 : i32
    %853 = vector.broadcast %c3_i32_369 : i32 to vector<32x32xi32>
    %854 = arith.subi %852, %853 : vector<32x32xi32>
    %c0_i32_370 = arith.constant 0 : i32
    %855 = vector.broadcast %c0_i32_370 : i32 to vector<32x32xi32>
    %856 = arith.cmpi slt, %854, %855 : vector<32x32xi32>
    %c0_i32_371 = arith.constant 0 : i32
    %857 = vector.broadcast %c0_i32_371 : i32 to vector<32x32xi32>
    %858 = arith.subi %857, %854 : vector<32x32xi32>
    %859 = arith.select %856, %858, %854 : vector<32x32xi1>, vector<32x32xi32>
    %c32_i32_372 = arith.constant 32 : i32
    %860 = vector.broadcast %c32_i32_372 : i32 to vector<32x32xi32>
    %861 = arith.cmpi sge, %859, %860 : vector<32x32xi32>
    %c62_i32_373 = arith.constant 62 : i32
    %862 = vector.broadcast %c62_i32_373 : i32 to vector<32x32xi32>
    %863 = arith.subi %862, %859 : vector<32x32xi32>
    %864 = arith.select %861, %863, %859 : vector<32x32xi1>, vector<32x32xi32>
    %865 = arith.cmpi eq, %747, %864 : vector<32x32xi32>
    %866 = arith.extui %865 : vector<32x32xi1> to vector<32x32xi32>
    %867 = arith.sitofp %866 : vector<32x32xi32> to vector<32x32xf32>
    %cst_374 = arith.constant dense<0.000000e+00> : vector<4x32xf32>
    %868 = tpu.matmul %746, %765, %cst_374 {dimension_numbers = #tpu.dot_dimension_numbers<[1], [0], [0], [1], [0, 0, 1, 1], [], []>} : vector<4x32xf32>, vector<32x32xf32>, vector<4x32xf32> -> vector<4x32xf32>
    %cst_375 = arith.constant dense<0.000000e+00> : vector<4x32xf32>
    %869 = tpu.matmul %746, %782, %cst_375 {dimension_numbers = #tpu.dot_dimension_numbers<[1], [0], [0], [1], [0, 0, 1, 1], [], []>} : vector<4x32xf32>, vector<32x32xf32>, vector<4x32xf32> -> vector<4x32xf32>
    %cst_376 = arith.constant dense<0.000000e+00> : vector<4x32xf32>
    %870 = tpu.matmul %746, %799, %cst_376 {dimension_numbers = #tpu.dot_dimension_numbers<[1], [0], [0], [1], [0, 0, 1, 1], [], []>} : vector<4x32xf32>, vector<32x32xf32>, vector<4x32xf32> -> vector<4x32xf32>
    %cst_377 = arith.constant dense<0.000000e+00> : vector<4x32xf32>
    %871 = tpu.matmul %746, %816, %cst_377 {dimension_numbers = #tpu.dot_dimension_numbers<[1], [0], [0], [1], [0, 0, 1, 1], [], []>} : vector<4x32xf32>, vector<32x32xf32>, vector<4x32xf32> -> vector<4x32xf32>
    %cst_378 = arith.constant dense<0.000000e+00> : vector<4x32xf32>
    %872 = tpu.matmul %746, %833, %cst_378 {dimension_numbers = #tpu.dot_dimension_numbers<[1], [0], [0], [1], [0, 0, 1, 1], [], []>} : vector<4x32xf32>, vector<32x32xf32>, vector<4x32xf32> -> vector<4x32xf32>
    %cst_379 = arith.constant dense<0.000000e+00> : vector<4x32xf32>
    %873 = tpu.matmul %746, %850, %cst_379 {dimension_numbers = #tpu.dot_dimension_numbers<[1], [0], [0], [1], [0, 0, 1, 1], [], []>} : vector<4x32xf32>, vector<32x32xf32>, vector<4x32xf32> -> vector<4x32xf32>
    %cst_380 = arith.constant dense<0.000000e+00> : vector<4x32xf32>
    %874 = tpu.matmul %746, %867, %cst_380 {dimension_numbers = #tpu.dot_dimension_numbers<[1], [0], [0], [1], [0, 0, 1, 1], [], []>} : vector<4x32xf32>, vector<32x32xf32>, vector<4x32xf32> -> vector<4x32xf32>
    %875 = tpu.concatenate %868, %869, %870, %871, %872, %873, %874 in 0 : vector<4x32xf32>, vector<4x32xf32>, vector<4x32xf32>, vector<4x32xf32>, vector<4x32xf32>, vector<4x32xf32>, vector<4x32xf32> -> vector<28x32xf32>
    %cst_381 = arith.constant dense<0.000000e+00> : vector<1x32xf32>
    %876 = tpu.matmul %740, %875, %cst_381 {dimension_numbers = #tpu.dot_dimension_numbers<[1], [0], [0], [1], [0, 0, 1, 1], [], []>} : vector<1x28xf32>, vector<28x32xf32>, vector<1x32xf32> -> vector<1x32xf32>
    %877 = vector.broadcast %741 : vector<1x1xf32> to vector<1x32xf32>
    %878 = arith.addf %876, %877 : vector<1x32xf32>
    %879 = math.tanh %878 : vector<1x32xf32>
    %c0_382 = arith.constant 0 : index
    %c0_383 = arith.constant 0 : index
    %c0_384 = arith.constant 0 : index
    %880 = vector.load %arg46[%c0_382, %c0_383, %c0_384] : memref<1x1x32xf32, #tpu.memory_space<vmem>>, vector<1x1x32xf32>
    %881 = vector.shape_cast %880 : vector<1x1x32xf32> to vector<1x32xf32>
    %882 = vector.shape_cast %879 : vector<1x32xf32> to vector<1x1x32xf32>
    tpu.vector_store %arg46[%c0_382, %c0_383, %c0_384], %882 {strides = array<i32>} : memref<1x1x32xf32, #tpu.memory_space<vmem>>, vector<1x1x32xf32>,
    return
  }
  func.func @transform_0(%arg0: i32) -> (i32, i32, i32) {
    %c0_i32 = arith.constant 0 : i32
    %c0_i32_0 = arith.constant 0 : i32
    %c0_i32_1 = arith.constant 0 : i32
    return %arg0, %c0_i32, %c0_i32_0 : i32, i32, i32
  }
  func.func @transform_1(%arg0: i32) -> (i32, i32) {
    %c0_i32 = arith.constant 0 : i32
    %c0_i32_0 = arith.constant 0 : i32
    %c0_i32_1 = arith.constant 0 : i32
    return %c0_i32, %c0_i32_0 : i32, i32
  }
  func.func @transform_2(%arg0: i32) -> (i32, i32) {
    %c0_i32 = arith.constant 0 : i32
    %c0_i32_0 = arith.constant 0 : i32
    %c0_i32_1 = arith.constant 0 : i32
    return %c0_i32, %c0_i32_0 : i32, i32
  }
  func.func @transform_3(%arg0: i32) -> (i32, i32) {
    %c0_i32 = arith.constant 0 : i32
    %c0_i32_0 = arith.constant 0 : i32
    %c0_i32_1 = arith.constant 0 : i32
    return %c0_i32, %c0_i32_0 : i32, i32
  }
  func.func @transform_4(%arg0: i32) -> (i32, i32) {
    %c0_i32 = arith.constant 0 : i32
    %c0_i32_0 = arith.constant 0 : i32
    %c0_i32_1 = arith.constant 0 : i32
    return %c0_i32, %c0_i32_0 : i32, i32
  }
  func.func @transform_5(%arg0: i32) -> (i32, i32) {
    %c0_i32 = arith.constant 0 : i32
    %c0_i32_0 = arith.constant 0 : i32
    %c0_i32_1 = arith.constant 0 : i32
    return %c0_i32, %c0_i32_0 : i32, i32
  }
  func.func @transform_6(%arg0: i32) -> (i32, i32) {
    %c0_i32 = arith.constant 0 : i32
    %c0_i32_0 = arith.constant 0 : i32
    %c0_i32_1 = arith.constant 0 : i32
    return %c0_i32, %c0_i32_0 : i32, i32
  }
  func.func @transform_7(%arg0: i32) -> (i32, i32) {
    %c0_i32 = arith.constant 0 : i32
    %c0_i32_0 = arith.constant 0 : i32
    %c0_i32_1 = arith.constant 0 : i32
    return %c0_i32, %c0_i32_0 : i32, i32
  }
  func.func @transform_8(%arg0: i32) -> (i32, i32) {
    %c0_i32 = arith.constant 0 : i32
    %c0_i32_0 = arith.constant 0 : i32
    %c0_i32_1 = arith.constant 0 : i32
    return %c0_i32, %c0_i32_0 : i32, i32
  }
  func.func @transform_9(%arg0: i32) -> (i32, i32) {
    %c0_i32 = arith.constant 0 : i32
    %c0_i32_0 = arith.constant 0 : i32
    %c0_i32_1 = arith.constant 0 : i32
    return %c0_i32, %c0_i32_0 : i32, i32
  }
  func.func @transform_10(%arg0: i32) -> (i32, i32) {
    %c0_i32 = arith.constant 0 : i32
    %c0_i32_0 = arith.constant 0 : i32
    %c0_i32_1 = arith.constant 0 : i32
    return %c0_i32, %c0_i32_0 : i32, i32
  }
  func.func @transform_11(%arg0: i32) -> (i32, i32) {
    %c0_i32 = arith.constant 0 : i32
    %c0_i32_0 = arith.constant 0 : i32
    %c0_i32_1 = arith.constant 0 : i32
    return %c0_i32, %c0_i32_0 : i32, i32
  }
  func.func @transform_12(%arg0: i32) -> (i32, i32) {
    %c0_i32 = arith.constant 0 : i32
    %c0_i32_0 = arith.constant 0 : i32
    %c0_i32_1 = arith.constant 0 : i32
    return %c0_i32, %c0_i32_0 : i32, i32
  }
  func.func @transform_13(%arg0: i32) -> (i32, i32) {
    %c0_i32 = arith.constant 0 : i32
    %c0_i32_0 = arith.constant 0 : i32
    %c0_i32_1 = arith.constant 0 : i32
    return %c0_i32, %c0_i32_0 : i32, i32
  }
  func.func @transform_14(%arg0: i32) -> (i32, i32) {
    %c0_i32 = arith.constant 0 : i32
    %c0_i32_0 = arith.constant 0 : i32
    %c0_i32_1 = arith.constant 0 : i32
    return %c0_i32, %c0_i32_0 : i32, i32
  }
  func.func @transform_15(%arg0: i32) -> (i32, i32) {
    %c0_i32 = arith.constant 0 : i32
    %c0_i32_0 = arith.constant 0 : i32
    %c0_i32_1 = arith.constant 0 : i32
    return %c0_i32, %c0_i32_0 : i32, i32
  }
  func.func @transform_16(%arg0: i32) -> (i32, i32) {
    %c0_i32 = arith.constant 0 : i32
    %c0_i32_0 = arith.constant 0 : i32
    %c0_i32_1 = arith.constant 0 : i32
    return %c0_i32, %c0_i32_0 : i32, i32
  }
  func.func @transform_17(%arg0: i32) -> (i32, i32) {
    %c0_i32 = arith.constant 0 : i32
    %c0_i32_0 = arith.constant 0 : i32
    %c0_i32_1 = arith.constant 0 : i32
    return %c0_i32, %c0_i32_0 : i32, i32
  }
  func.func @transform_18(%arg0: i32) -> (i32, i32) {
    %c0_i32 = arith.constant 0 : i32
    %c0_i32_0 = arith.constant 0 : i32
    %c0_i32_1 = arith.constant 0 : i32
    return %c0_i32, %c0_i32_0 : i32, i32
  }
  func.func @transform_19(%arg0: i32) -> (i32, i32) {
    %c0_i32 = arith.constant 0 : i32
    %c0_i32_0 = arith.constant 0 : i32
    %c0_i32_1 = arith.constant 0 : i32
    return %c0_i32, %c0_i32_0 : i32, i32
  }
  func.func @transform_20(%arg0: i32) -> (i32, i32) {
    %c0_i32 = arith.constant 0 : i32
    %c0_i32_0 = arith.constant 0 : i32
    %c0_i32_1 = arith.constant 0 : i32
    return %c0_i32, %c0_i32_0 : i32, i32
  }
  func.func @transform_21(%arg0: i32) -> (i32, i32) {
    %c0_i32 = arith.constant 0 : i32
    %c0_i32_0 = arith.constant 0 : i32
    %c0_i32_1 = arith.constant 0 : i32
    return %c0_i32, %c0_i32_0 : i32, i32
  }
  func.func @transform_22(%arg0: i32) -> (i32, i32) {
    %c0_i32 = arith.constant 0 : i32
    %c0_i32_0 = arith.constant 0 : i32
    %c0_i32_1 = arith.constant 0 : i32
    return %c0_i32, %c0_i32_0 : i32, i32
  }
  func.func @transform_23(%arg0: i32) -> (i32, i32) {
    %c0_i32 = arith.constant 0 : i32
    %c0_i32_0 = arith.constant 0 : i32
    %c0_i32_1 = arith.constant 0 : i32
    return %c0_i32, %c0_i32_0 : i32, i32
  }
  func.func @transform_24(%arg0: i32) -> (i32, i32) {
    %c0_i32 = arith.constant 0 : i32
    %c0_i32_0 = arith.constant 0 : i32
    %c0_i32_1 = arith.constant 0 : i32
    return %c0_i32, %c0_i32_0 : i32, i32
  }
  func.func @transform_25(%arg0: i32) -> (i32, i32) {
    %c0_i32 = arith.constant 0 : i32
    %c0_i32_0 = arith.constant 0 : i32
    %c0_i32_1 = arith.constant 0 : i32
    return %c0_i32, %c0_i32_0 : i32, i32
  }
  func.func @transform_26(%arg0: i32) -> (i32, i32) {
    %c0_i32 = arith.constant 0 : i32
    %c0_i32_0 = arith.constant 0 : i32
    %c0_i32_1 = arith.constant 0 : i32
    return %c0_i32, %c0_i32_0 : i32, i32
  }
  func.func @transform_27(%arg0: i32) -> (i32, i32) {
    %c0_i32 = arith.constant 0 : i32
    %c0_i32_0 = arith.constant 0 : i32
    %c0_i32_1 = arith.constant 0 : i32
    return %c0_i32, %c0_i32_0 : i32, i32
  }
  func.func @transform_28(%arg0: i32) -> (i32, i32) {
    %c0_i32 = arith.constant 0 : i32
    %c0_i32_0 = arith.constant 0 : i32
    %c0_i32_1 = arith.constant 0 : i32
    return %c0_i32, %c0_i32_0 : i32, i32
  }
  func.func @transform_29(%arg0: i32) -> (i32, i32) {
    %c0_i32 = arith.constant 0 : i32
    %c0_i32_0 = arith.constant 0 : i32
    %c0_i32_1 = arith.constant 0 : i32
    return %c0_i32, %c0_i32_0 : i32, i32
  }
  func.func @transform_30(%arg0: i32) -> (i32, i32) {
    %c0_i32 = arith.constant 0 : i32
    %c0_i32_0 = arith.constant 0 : i32
    %c0_i32_1 = arith.constant 0 : i32
    return %c0_i32, %c0_i32_0 : i32, i32
  }
  func.func @transform_31(%arg0: i32) -> (i32, i32) {
    %c0_i32 = arith.constant 0 : i32
    %c0_i32_0 = arith.constant 0 : i32
    %c0_i32_1 = arith.constant 0 : i32
    return %c0_i32, %c0_i32_0 : i32, i32
  }
  func.func @transform_32(%arg0: i32) -> (i32, i32) {
    %c0_i32 = arith.constant 0 : i32
    %c0_i32_0 = arith.constant 0 : i32
    %c0_i32_1 = arith.constant 0 : i32
    return %c0_i32, %c0_i32_0 : i32, i32
  }
  func.func @transform_33(%arg0: i32) -> (i32, i32) {
    %c0_i32 = arith.constant 0 : i32
    %c0_i32_0 = arith.constant 0 : i32
    %c0_i32_1 = arith.constant 0 : i32
    return %c0_i32, %c0_i32_0 : i32, i32
  }
  func.func @transform_34(%arg0: i32) -> (i32, i32) {
    %c0_i32 = arith.constant 0 : i32
    %c0_i32_0 = arith.constant 0 : i32
    %c0_i32_1 = arith.constant 0 : i32
    return %c0_i32, %c0_i32_0 : i32, i32
  }
  func.func @transform_35(%arg0: i32) -> (i32, i32) {
    %c0_i32 = arith.constant 0 : i32
    %c0_i32_0 = arith.constant 0 : i32
    %c0_i32_1 = arith.constant 0 : i32
    return %c0_i32, %c0_i32_0 : i32, i32
  }
  func.func @transform_36(%arg0: i32) -> (i32, i32) {
    %c0_i32 = arith.constant 0 : i32
    %c0_i32_0 = arith.constant 0 : i32
    %c0_i32_1 = arith.constant 0 : i32
    return %c0_i32, %c0_i32_0 : i32, i32
  }
  func.func @transform_37(%arg0: i32) -> (i32, i32) {
    %c0_i32 = arith.constant 0 : i32
    %c0_i32_0 = arith.constant 0 : i32
    %c0_i32_1 = arith.constant 0 : i32
    return %c0_i32, %c0_i32_0 : i32, i32
  }
  func.func @transform_38(%arg0: i32) -> (i32, i32) {
    %c0_i32 = arith.constant 0 : i32
    %c0_i32_0 = arith.constant 0 : i32
    %c0_i32_1 = arith.constant 0 : i32
    return %c0_i32, %c0_i32_0 : i32, i32
  }
  func.func @transform_39(%arg0: i32) -> (i32, i32) {
    %c0_i32 = arith.constant 0 : i32
    %c0_i32_0 = arith.constant 0 : i32
    %c0_i32_1 = arith.constant 0 : i32
    return %c0_i32, %c0_i32_0 : i32, i32
  }
  func.func @transform_40(%arg0: i32) -> (i32, i32) {
    %c0_i32 = arith.constant 0 : i32
    %c0_i32_0 = arith.constant 0 : i32
    %c0_i32_1 = arith.constant 0 : i32
    return %c0_i32, %c0_i32_0 : i32, i32
  }
  func.func @transform_41(%arg0: i32) -> (i32, i32) {
    %c0_i32 = arith.constant 0 : i32
    %c0_i32_0 = arith.constant 0 : i32
    %c0_i32_1 = arith.constant 0 : i32
    return %c0_i32, %c0_i32_0 : i32, i32
  }
  func.func @transform_42(%arg0: i32) -> (i32, i32) {
    %c0_i32 = arith.constant 0 : i32
    %c0_i32_0 = arith.constant 0 : i32
    %c0_i32_1 = arith.constant 0 : i32
    return %c0_i32, %c0_i32_0 : i32, i32
  }
  func.func @transform_43(%arg0: i32) -> (i32, i32) {
    %c0_i32 = arith.constant 0 : i32
    %c0_i32_0 = arith.constant 0 : i32
    %c0_i32_1 = arith.constant 0 : i32
    return %c0_i32, %c0_i32_0 : i32, i32
  }
  func.func @transform_44(%arg0: i32) -> (i32, i32) {
    %c0_i32 = arith.constant 0 : i32
    %c0_i32_0 = arith.constant 0 : i32
    %c0_i32_1 = arith.constant 0 : i32
    return %c0_i32, %c0_i32_0 : i32, i32
  }
  func.func @transform_45(%arg0: i32) -> (i32, i32, i32) {
    %c0_i32 = arith.constant 0 : i32
    %c0_i32_0 = arith.constant 0 : i32
    %c0_i32_1 = arith.constant 0 : i32
    return %arg0, %c0_i32, %c0_i32_0 : i32, i32, i32
  }
}

</mosaic_0001>

<bundles_post_ra>
// kernel: melgan_forward.1
= control target key start
LH: loop header
LB: loop body
LE: loop exit
PB: predicated region body
PF: predicated region fallthrough
CT: control target
= control target key end

     0   :  { %s9427_s6 = smov 1   ;;  %s9428_s10 = smov 2   ;;  %s10882_s0 = inlined_call_operand.smem [shape: u32[46], index: -1, kind: input, shape index: {}] }
   0x1   :  { %s9513_s5 = sld [smem:[%s10882_s0]]   ;;  %s9429_s14 = smov 3  }
   0x2   :  { %s9518_s9 = sld [smem:[%s10882_s0 + %s9427_s6]]   ;;  %s9430_s18 = smov 4  }
   0x3   :  { %s9523_s13 = sld [smem:[%s10882_s0 + %s9428_s10]]   ;;  %s9431_s22 = smov 5  }
   0x4   :  { %s9528_s17 = sld [smem:[%s10882_s0 + %s9429_s14]]   ;;  %s9432_s26 = smov 6  }
   0x5   :  { %s9533_s21 = sld [smem:[%s10882_s0 + %s9430_s18]]   ;;  %s9433_s30 = smov 7  }
   0x6   :  { %s9538_s25 = sld [smem:[%s10882_s0 + %s9431_s22]]   ;;  %s9434_s4 = smov 8  }
   0x7   :  { %10919 = sst [smem:[#allocation53_spill]] %s9513_s5  ;;  %s9435_s10 = smov 9  }
   0x8   :  { %10920 = sst [smem:[#allocation54_spill]] %s9518_s9  ;;  %s9436_s15 = smov 10  }
   0x9   :  { %10921 = sst [smem:[#allocation55_spill]] %s9523_s13  ;;  %s9437_s20 = smov 11  }
   0xa   :  { %10922 = sst [smem:[#allocation56_spill]] %s9528_s17  ;;  %s9439_s1 = smov 13  }
   0xb   :  { %10923 = sst [smem:[#allocation57_spill]] %s9533_s21  ;;  %s9440_s7 = smov 14  }
   0xc   :  { %s9543_s29 = sld [smem:[%s10882_s0 + %s9432_s26]]   ;;  %s9438_s26 = smov 12  }
   0xd   :  { %s9548_s3 = sld [smem:[%s10882_s0 + %s9433_s30]]   ;;  %s9442_s22 = smov 16  }
   0xe   :  { %s9553_s8 = sld [smem:[%s10882_s0 + %s9434_s4]]   ;;  %s9443_s28 = smov 17  }
   0xf   :  { %s9558_s14 = sld [smem:[%s10882_s0 + %s9435_s10]]  }
  0x10   :  { %s9563_s19 = sld [smem:[%s10882_s0 + %s9436_s15]]   ;;  %s9441_s15 = smov 15  }
  0x11   :  { %s9568_s24 = sld [smem:[%s10882_s0 + %s9437_s20]]  }
  0x12   :  { %s9573_s30 = sld [smem:[%s10882_s0 + %s9438_s26]]  }
  0x13   :  { %10924 = sst [smem:[#allocation58_spill]] %s9548_s3 }
  0x14   :  { %10925 = sst [smem:[#allocation59_spill]] %s9553_s8 }
  0x15   :  { %10926 = sst [smem:[#allocation60_spill]] %s9558_s14 }
  0x16   :  { %10927 = sst [smem:[#allocation61_spill]] %s9563_s19 }
  0x17   :  { %s9578_s6 = sld [smem:[%s10882_s0 + %s9439_s1]]   ;;  %s9471_s1 = smov 45  }
  0x18   :  { %10928 = sst [smem:[#allocation62_spill]] %s9573_s30 }
  0x19   :  { %s9583_s12 = sld [smem:[%s10882_s0 + %s9440_s7]]   ;;  %s9444_s7 = smov 18  }
  0x1a   :  { %s9588_s20 = sld [smem:[%s10882_s0 + %s9441_s15]]   ;;  %s9445_s15 = smov 19  }
  0x1b   :  { %s9593_s27 = sld [smem:[%s10882_s0 + %s9442_s22]]   ;;  %s9446_s22 = smov 20  }
  0x1c   :  { %s9598_s4 = sld [smem:[%s10882_s0 + %s9443_s28]]   ;;  %s9447_s28 = smov 21  }
  0x1d   :  { %10929 = sst [smem:[#allocation63_spill]] %s9578_s6 }
  0x1e   :  { %s9603_s5 = sld [smem:[%s10882_s0 + %s9444_s7]]   ;;  %s9448_s7 = smov 22  }
  0x1f   :  { %10930 = sst [smem:[#allocation64_spill]] %s9583_s12 }
  0x20   :  { %10931 = sst [smem:[#allocation65_spill]] %s9588_s20 }
  0x21   :  { %10932 = sst [smem:[#allocation66_spill]] %s9593_s27 }
  0x22   :  { %10933 = sst [smem:[#allocation67_spill]] %s9598_s4 }
  0x23   :  { %s9608_s12 = sld [smem:[%s10882_s0 + %s9445_s15]]   ;;  %s9449_s15 = smov 23  }
  0x24   :  { %10934 = sst [smem:[#allocation68_spill]] %s9603_s5 }
  0x25   :  { %s9613_s27 = sld [smem:[%s10882_s0 + %s9446_s22]]   ;;  %s9450_s22 = smov 24  }
  0x26   :  { %s9618_s4 = sld [smem:[%s10882_s0 + %s9447_s28]]   ;;  %s9451_s28 = smov 25  }
  0x27   :  { %s9623_s5 = sld [smem:[%s10882_s0 + %s9448_s7]]   ;;  %s9452_s7 = smov 26  }
  0x29   :  { %10935 = sst [smem:[#allocation69_spill]] %s9608_s12 }
  0x2a   :  { %s9628_s12 = sld [smem:[%s10882_s0 + %s9449_s15]]   ;;  %s9453_s15 = smov 27  }
  0x2b   :  { %10936 = sst [smem:[#allocation70_spill]] %s9613_s27 }
  0x2c   :  { %10937 = sst [smem:[#allocation71_spill]] %s9618_s4 }
  0x2d   :  { %10938 = sst [smem:[#allocation72_spill]] %s9623_s5 }
  0x2e   :  { %s9633_s27 = sld [smem:[%s10882_s0 + %s9450_s22]]   ;;  %s9454_s22 = smov 28  }
  0x2f   :  { %s9638_s4 = sld [smem:[%s10882_s0 + %s9451_s28]]   ;;  %s9455_s28 = smov 29  }
  0x30   :  { %10939 = sst [smem:[#allocation73_spill]] %s9628_s12 }
  0x31   :  { %s9643_s5 = sld [smem:[%s10882_s0 + %s9452_s7]]   ;;  %s9456_s7 = smov 30  }
  0x32   :  { %s9648_s12 = sld [smem:[%s10882_s0 + %s9453_s15]]   ;;  %s9457_s15 = smov 31  }
  0x33   :  { %s9653_s30 = sld [smem:[%s10882_s0 + %s9454_s22]]   ;;  %s9458_s22 = smov 32  }
  0x34   :  { %s9663_s19 = sld [smem:[%s10882_s0 + %s9456_s7]]   ;;  %s9460_s7 = smov 34  }
  0x35   :  { %10940 = sst [smem:[#allocation74_spill]] %s9638_s4 }
  0x36   :  { %s9658_s4 = sld [smem:[%s10882_s0 + %s9455_s28]]   ;;  %s9459_s28 = smov 33  }
  0x37   :  { %10941 = sst [smem:[#allocation75_spill]] %s9643_s5 }
  0x38   :  { %10942 = sst [smem:[#allocation76_spill]] %s9648_s12 }
  0x39   :  { %s9668_s12 = sld [smem:[%s10882_s0 + %s9457_s15]]   ;;  %s9461_s15 = smov 35  }
  0x3a   :  { %10944 = sst [smem:[#allocation78_spill]] %s9663_s19 }
  0x3b   :  { %s9673_s8 = sld [smem:[%s10882_s0 + %s9458_s22]]   ;;  %s9462_s22 = smov 36  }
  0x3c   :  { %10943 = sst [smem:[#allocation77_spill]] %s9658_s4 }
  0x3d   :  { %s9678_s4 = sld [smem:[%s10882_s0 + %s9459_s28]]   ;;  %s9463_s28 = smov 37  }
  0x3e   :  { %s9683_s19 = sld [smem:[%s10882_s0 + %s9460_s7]]   ;;  %s9464_s7 = smov 38  }
  0x3f   :  { %10945 = sst [smem:[#allocation79_spill]] %s9668_s12 }
  0x40   :  { %s9688_s12 = sld [smem:[%s10882_s0 + %s9461_s15]]   ;;  %s9465_s15 = smov 39  }
  0x41   :  { %10946 = sst [smem:[#allocation80_spill]] %s9673_s8 }
  0x42   :  { %s9693_s8 = sld [smem:[%s10882_s0 + %s9462_s22]]   ;;  %s9466_s22 = smov 40  }
  0x43   :  { %10947 = sst [smem:[#allocation81_spill]] %s9678_s4 }
  0x44   :  { %10948 = sst [smem:[#allocation82_spill]] %s9683_s19 }
  0x45   :  { %s9698_s4 = sld [smem:[%s10882_s0 + %s9463_s28]]   ;;  %s9467_s28 = smov 41  }
  0x46   :  { %10949 = sst [smem:[#allocation83_spill]] %s9688_s12 }
  0x47   :  { %s9703_s19 = sld [smem:[%s10882_s0 + %s9464_s7]]   ;;  %s9468_s7 = smov 42  }
  0x48   :  { %10950 = sst [smem:[#allocation84_spill]] %s9693_s8 }
  0x49   :  { %s9708_s12 = sld [smem:[%s10882_s0 + %s9465_s15]]   ;;  %s9469_s15 = smov 43  }
  0x4a   :  { %s9713_s8 = sld [smem:[%s10882_s0 + %s9466_s22]]   ;;  %s9470_s22 = smov 44  }
  0x4b   :  { %10951 = sst [smem:[#allocation85_spill]] %s9698_s4 }
  0x4c   :  { %s9718_s4 = sld [smem:[%s10882_s0 + %s9467_s28]]  }
  0x4d   :  { %10952 = sst [smem:[#allocation86_spill]] %s9703_s19 }
  0x4e   :  { %s9723_s19 = sld [smem:[%s10882_s0 + %s9468_s7]]  }
  0x4f   :  { %10953 = sst [smem:[#allocation87_spill]] %s9708_s12 }
  0x50   :  { %10954 = sst [smem:[#allocation88_spill]] %s9713_s8 }
  0x51   :  { %s9728_s12 = sld [smem:[%s10882_s0 + %s9469_s15]]  }
  0x52   :  { %10955 = sst [smem:[#allocation89_spill]] %s9718_s4 }
  0x53   :  { %s7092_s8 = sld [smem:[%s10882_s0 + %s9470_s22]]  }
  0x54   :  { %s9736_s4 = sld [smem:[%s10882_s0 + %s9471_s1]]  }
  0x59   :  { %v96_v0 = vstv %s7092_s8 }
  0x5a   :  { %10956 = sst [smem:[#allocation90_spill]] %s9736_s4  ;;  %97 = vst [vmem:[#allocation2] sm:$0x1] %v96_v0 }
  0x5b   :  { %98 = vsyncpa [#allocation4], 0 }
  0x5c   :  { %100 = vsyncpa [#allocation4 + $0x1], 0 }
  0x5d   :  { %101 = vsyncpa [#allocation7], 0 }
  0x5e   :  { %102 = vsyncpa [#allocation10], 0 }
  0x5f   :  { %103 = vsyncpa [#allocation13], 0 }
  0x60   :  { %104 = vsyncpa [#allocation16], 0 }
  0x61   :  { %105 = vsyncpa [#allocation19], 0 }
  0x62   :  { %106 = vsyncpa [#allocation22], 0 }
  0x63   :  { %107 = vsyncpa [#allocation25], 0 }
  0x64   :  { %108 = vsyncpa [#allocation28], 0 }
  0x65   :  { %109 = vsyncpa [#allocation31], 0 }
  0x66   :  { %110 = vsyncpa [#allocation34], 0 }
  0x67   :  { %111 = vsyncpa [#allocation37], 0 }
  0x68   :  { %112 = vsyncpa [#allocation5], 0 }
  0x69   :  { %114 = vsyncpa [#allocation5 + $0x1], 0  ;;  %s9738_s7 = smov 0   ;;  %s9740_s0 = smov 0  }
  0x6a   :  { %s9742_s8 = smov 0   ;;  %s9744_s10 = smov 0  }
  0x6b LB: > { %s10957_s21 = sld [smem:[#allocation57_spill]]  ;;  %s10959_s17 = sld [smem:[#allocation56_spill]]  ;;  %s9413_s7 = sphi %s9738_s7, %s11060_s7   ;;  %s9425_s10 = sphi %s9744_s10, %s11063_s10   ;;  %s9421_s8 = sphi %s9742_s8, %s11062_s8   ;;  %s9417_s0 = sphi %s9740_s0, %s11061_s0  }
  0x6c   : > { %s10958_s20 = sld [smem:[#allocation65_spill]]  ;;  %s10960_s14 = sld [smem:[#allocation60_spill]] }
  0x6d   : > { %s10961_s13 = sld [smem:[#allocation55_spill]]  ;;  %s10962_s9 = sld [smem:[#allocation54_spill]] }
  0x6e   : > { %s10963_s6 = sld [smem:[#allocation63_spill]]  ;;  %s10964_s5 = sld [smem:[#allocation75_spill]] }
  0x6f   : > { %s10965_s3 = sld [smem:[#allocation58_spill]]  ;;  %s9472_s11 = smov [#allocation6]  }
  0x70   : > { %s1113_s15 = sshll.u32 %s9472_s11, 4  ;;  %s9759_s16 = sadd.s32 4294967295, %s9425_s10   ;;  %s9764_s15 = int_to_ptr.vmem [resolvable:$true] %s1113_s15 }
  0x71   : > { %p7096_p0 = scmp.ge.s32.totalorder %s9425_s10, 1  ;;  %p10892_p1 = scmp.eq.s32.totalorder %s9759_s16, 0 }
  0x72   : > { %p1101_p2 = scmp.lt.s32.totalorder %s9425_s10, 3  ;;  %s9473_s22 = smov [#allocation9]  }
  0x73   : > { %s1140_s23 = sshll.u32 %s9473_s22, 4  ;;  %s9474_s1 = smov [#allocation12]   ;;  %s9779_s23 = int_to_ptr.vmem [resolvable:$true] %s1140_s23 }
  0x74   : > { %p9766_p3 = pnand %p7096_p0, %p1101_p2  ;;  %s1162_s28 = sshll.u32 %s9474_s1, 4  ;;  %s9781_s28 = int_to_ptr.vmem [resolvable:$true] %s1162_s28 }
  0x75   : > { %s8669_s2 = scalar_lea.hbm %s10962_s9, 256 }
  0x76   : > { %s10966_s18 = scalar_select %p9766_p3, 1, 0 }
  0x77   : > { %p8436_p5 = pneg %p9766_p3  ;;  %p8670_p7 = scmp.ne.s32.totalorder %s10962_s9, %s8669_s2 }
  0x78   : > { %p8676_p11 = scmp.lt.u32.totalorder %s8669_s2, %s10962_s9 }
  0x79   : > { %p9775_p6 = pnand %p8436_p5, %p10892_p1 }
  0x7b   : > { %p9787_p8 = pneg %p9775_p6 }
  0x7d   : > { %p8672_p9 = pnand %p9787_p8, %p8670_p7 }
  0x7f   : > { %p8673_p10 = pneg %p8672_p9 }
  0x81   : > { %p8678_p12 = pnand %p8676_p11, %p8673_p10 }
  0x83   : > { %8681 = shalt.err (!%p8678_p12)
}
  0x84   : > { %s8682_s22 = scalar_lea.vmem %s9764_s15, 256  ;;  %p8690_p5 = scmp.lt.s32.totalorder %s9764_s15, %s9764_s15 }
  0x85   : > { %p8683_p13 = scmp.ne.s32.totalorder %s9764_s15, %s8682_s22  ;;  %p8691_p4 = scmp.lt.s32.totalorder %s8682_s22, %s8682_s22 }
  0x87   : > { %p8685_p0 = pnand %p8683_p13, %p9787_p8  ;;  %p8692_p1 = por %p8691_p4, %p8690_p5 }
  0x89   : > { %p8686_p2 = pneg %p8685_p0 }
  0x8b   : > { %p8693_p3 = pnand %p8692_p1, %p8686_p2 }
  0x8d   : > { %8696 = shalt.err (!%p8693_p3)
}
  0x8e   : > { %s10895_s1 = smov 128   ;;  %s10896_s2 = smov 8  }
  0x8f   : > { %8439 = dma.hbm_to_vmem [thread:$0]  (!%p9775_p6), %s10962_s9, 256, %s9764_s15, [#allocation7], %s10895_s1, %s10895_s1, %s10896_s2  }
  0x90   : > { %s8697_s4 = scalar_lea.hbm %s10959_s17, 128 }
  0x91   : > { %p8698_p7 = scmp.ne.s32.totalorder %s10959_s17, %s8697_s4  ;;  %p8704_p3 = scmp.lt.u32.totalorder %s8697_s4, %s10959_s17 }
  0x93   : > { %p8700_p4 = pnand %p8698_p7, %p9787_p8 }
  0x95   : > { %p8701_p1 = pneg %p8700_p4 }
  0x97   : > { %p8706_p9 = pnand %p8704_p3, %p8701_p1 }
  0x99   : > { %8709 = shalt.err (!%p8706_p9)
}
  0x9a   : > { %s8710_s22 = scalar_lea.vmem %s9779_s23, 128  ;;  %p8718_p13 = scmp.lt.s32.totalorder %s9779_s23, %s9779_s23 }
  0x9b   : > { %p8711_p10 = scmp.ne.s32.totalorder %s9779_s23, %s8710_s22  ;;  %p8719_p0 = scmp.lt.s32.totalorder %s8710_s22, %s8710_s22 }
  0x9d   : > { %p8713_p11 = pnand %p8711_p10, %p9787_p8  ;;  %p8720_p2 = por %p8719_p0, %p8718_p13 }
  0x9f   : > { %p8714_p12 = pneg %p8713_p11 }
  0xa1   : > { %p8721_p5 = pnand %p8720_p2, %p8714_p12 }
  0xa3   : > { %8724 = shalt.err (!%p8721_p5)
}
  0xa4   : > { %8445 = dma.hbm_to_vmem [thread:$0]  (!%p9775_p6), %s10959_s17, 128, %s9779_s23, [#allocation10]  }
  0xa5   : > { %s8725_s4 = scalar_lea.hbm %s9538_s25, 128 }
  0xa6   : > { %p8726_p7 = scmp.ne.s32.totalorder %s9538_s25, %s8725_s4  ;;  %p8732_p3 = scmp.lt.u32.totalorder %s8725_s4, %s9538_s25 }
  0xa8   : > { %p8728_p4 = pnand %p8726_p7, %p9787_p8 }
  0xaa   : > { %p8729_p1 = pneg %p8728_p4 }
  0xac   : > { %p8734_p9 = pnand %p8732_p3, %p8729_p1 }
  0xae   : > { %8737 = shalt.err (!%p8734_p9)
}
  0xaf   : > { %s8738_s15 = scalar_lea.vmem %s9781_s28, 128  ;;  %p8746_p13 = scmp.lt.s32.totalorder %s9781_s28, %s9781_s28 }
  0xb0   : > { %p8739_p10 = scmp.ne.s32.totalorder %s9781_s28, %s8738_s15  ;;  %p8747_p0 = scmp.lt.s32.totalorder %s8738_s15, %s8738_s15 }
  0xb2   : > { %p8741_p11 = pnand %p8739_p10, %p9787_p8  ;;  %p8748_p2 = por %p8747_p0, %p8746_p13 }
  0xb4   : > { %p8742_p12 = pneg %p8741_p11 }
  0xb6   : > { %p8749_p5 = pnand %p8748_p2, %p8742_p12 }
  0xb8   : > { %8752 = shalt.err (!%p8749_p5)
}
  0xb9   : > { %8451 = dma.hbm_to_vmem [thread:$0]  (!%p9775_p6), %s9538_s25, 128, %s9781_s28, [#allocation13]  }
  0xba   : > { %s9477_s23 = smov [#allocation15]   ;;  %s9478_s4 = smov [#allocation18]  }
  0xbb   : > { %s1184_s22 = sshll.u32 %s9477_s23, 4  ;;  %s1206_s1 = sshll.u32 %s9478_s4, 4  ;;  %s1185_s22 = int_to_ptr.vmem [resolvable:$true] %s1184_s22  ;;  %s1207_s1 = int_to_ptr.vmem [resolvable:$true] %s1206_s1 }
  0xbc   : > { %s8753_s2 = scalar_lea.hbm %s10965_s3, 128 }
  0xbd   : > { %p8754_p7 = scmp.ne.s32.totalorder %s10965_s3, %s8753_s2  ;;  %p8760_p3 = scmp.lt.u32.totalorder %s8753_s2, %s10965_s3 }
  0xbf   : > { %p8756_p4 = pnand %p8754_p7, %p9787_p8 }
  0xc1   : > { %p8757_p1 = pneg %p8756_p4 }
  0xc3   : > { %p8762_p9 = pnand %p8760_p3, %p8757_p1 }
  0xc5   : > { %8765 = shalt.err (!%p8762_p9)
}
  0xc6   : > { %s8766_s15 = scalar_lea.vmem %s1185_s22, 128  ;;  %p8774_p13 = scmp.lt.s32.totalorder %s1185_s22, %s1185_s22 }
  0xc7   : > { %p8767_p10 = scmp.ne.s32.totalorder %s1185_s22, %s8766_s15  ;;  %p8775_p0 = scmp.lt.s32.totalorder %s8766_s15, %s8766_s15 }
  0xc9   : > { %p8769_p11 = pnand %p8767_p10, %p9787_p8  ;;  %p8776_p2 = por %p8775_p0, %p8774_p13 }
  0xcb   : > { %p8770_p12 = pneg %p8769_p11 }
  0xcd   : > { %p8777_p5 = pnand %p8776_p2, %p8770_p12 }
  0xcf   : > { %8780 = shalt.err (!%p8777_p5)
}
  0xd0   : > { %8457 = dma.hbm_to_vmem [thread:$0]  (!%p9775_p6), %s10965_s3, 128, %s1185_s22, [#allocation16]  }
  0xd1   : > { %s8781_s28 = scalar_lea.hbm %s10960_s14, 128 }
  0xd2   : > { %p8782_p7 = scmp.ne.s32.totalorder %s10960_s14, %s8781_s28  ;;  %p8788_p3 = scmp.lt.u32.totalorder %s8781_s28, %s10960_s14 }
  0xd4   : > { %p8784_p4 = pnand %p8782_p7, %p9787_p8 }
  0xd6   : > { %p8785_p1 = pneg %p8784_p4 }
  0xd8   : > { %p8790_p9 = pnand %p8788_p3, %p8785_p1 }
  0xda   : > { %8793 = shalt.err (!%p8790_p9)
}
  0xdb   : > { %s8794_s2 = scalar_lea.vmem %s1207_s1, 128  ;;  %p8802_p13 = scmp.lt.s32.totalorder %s1207_s1, %s1207_s1 }
  0xdc   : > { %p8795_p10 = scmp.ne.s32.totalorder %s1207_s1, %s8794_s2  ;;  %p8803_p0 = scmp.lt.s32.totalorder %s8794_s2, %s8794_s2 }
  0xde   : > { %p8797_p11 = pnand %p8795_p10, %p9787_p8  ;;  %p8804_p2 = por %p8803_p0, %p8802_p13 }
  0xe0   : > { %p8798_p12 = pneg %p8797_p11 }
  0xe2   : > { %p8805_p5 = pnand %p8804_p2, %p8798_p12 }
  0xe4   : > { %8808 = shalt.err (!%p8805_p5)
}
  0xe5   : > { %8463 = dma.hbm_to_vmem [thread:$0]  (!%p9775_p6), %s10960_s14, 128, %s1207_s1, [#allocation19]  }
  0xe6   : > { %s9479_s23 = smov [#allocation21]   ;;  %s9480_s4 = smov [#allocation24]  }
  0xe7   : > { %s1228_s22 = sshll.u32 %s9479_s23, 4  ;;  %s1250_s15 = sshll.u32 %s9480_s4, 4  ;;  %s1229_s22 = int_to_ptr.vmem [resolvable:$true] %s1228_s22  ;;  %s1251_s15 = int_to_ptr.vmem [resolvable:$true] %s1250_s15 }
  0xe8   : > { %s8809_s28 = scalar_lea.hbm %s9568_s24, 128 }
  0xe9   : > { %p8810_p7 = scmp.ne.s32.totalorder %s9568_s24, %s8809_s28  ;;  %p8816_p3 = scmp.lt.u32.totalorder %s8809_s28, %s9568_s24 }
  0xeb   : > { %p8812_p4 = pnand %p8810_p7, %p9787_p8 }
  0xed   : > { %p8813_p1 = pneg %p8812_p4 }
  0xef   : > { %p8818_p9 = pnand %p8816_p3, %p8813_p1 }
  0xf1   : > { %8821 = shalt.err (!%p8818_p9)
}
  0xf2   : > { %s8822_s2 = scalar_lea.vmem %s1229_s22, 128  ;;  %p8830_p13 = scmp.lt.s32.totalorder %s1229_s22, %s1229_s22 }
  0xf3   : > { %p8823_p10 = scmp.ne.s32.totalorder %s1229_s22, %s8822_s2  ;;  %p8831_p0 = scmp.lt.s32.totalorder %s8822_s2, %s8822_s2 }
  0xf5   : > { %p8825_p11 = pnand %p8823_p10, %p9787_p8  ;;  %p8832_p2 = por %p8831_p0, %p8830_p13 }
  0xf7   : > { %p8826_p12 = pneg %p8825_p11 }
  0xf9   : > { %p8833_p5 = pnand %p8832_p2, %p8826_p12 }
  0xfb   : > { %8836 = shalt.err (!%p8833_p5)
}
  0xfc   : > { %8469 = dma.hbm_to_vmem [thread:$0]  (!%p9775_p6), %s9568_s24, 128, %s1229_s22, [#allocation22]  }
  0xfd   : > { %s8837_s1 = scalar_lea.hbm %s10963_s6, 128 }
  0xfe   : > { %p8838_p7 = scmp.ne.s32.totalorder %s10963_s6, %s8837_s1  ;;  %p8844_p3 = scmp.lt.u32.totalorder %s8837_s1, %s10963_s6 }
 0x100   : > { %p8840_p4 = pnand %p8838_p7, %p9787_p8 }
 0x102   : > { %p8841_p1 = pneg %p8840_p4 }
 0x104   : > { %p8846_p9 = pnand %p8844_p3, %p8841_p1 }
 0x106   : > { %8849 = shalt.err (!%p8846_p9)
}
 0x107   : > { %s8850_s23 = scalar_lea.vmem %s1251_s15, 128  ;;  %p8858_p13 = scmp.lt.s32.totalorder %s1251_s15, %s1251_s15 }
 0x108   : > { %p8851_p10 = scmp.ne.s32.totalorder %s1251_s15, %s8850_s23  ;;  %p8859_p0 = scmp.lt.s32.totalorder %s8850_s23, %s8850_s23 }
 0x10a   : > { %p8853_p11 = pnand %p8851_p10, %p9787_p8  ;;  %p8860_p2 = por %p8859_p0, %p8858_p13 }
 0x10c   : > { %p8854_p12 = pneg %p8853_p11 }
 0x10e   : > { %p8861_p5 = pnand %p8860_p2, %p8854_p12 }
 0x110   : > { %8864 = shalt.err (!%p8861_p5)
}
 0x111   : > { %8475 = dma.hbm_to_vmem [thread:$0]  (!%p9775_p6), %s10963_s6, 128, %s1251_s15, [#allocation25]  }
 0x112   : > { %s9481_s22 = smov [#allocation27]   ;;  %s9482_s28 = smov [#allocation30]  }
 0x113   : > { %s1272_s4 = sshll.u32 %s9481_s22, 4  ;;  %s1315_s2 = sshll.u32 %s9482_s28, 4  ;;  %s1273_s4 = int_to_ptr.vmem [resolvable:$true] %s1272_s4  ;;  %s1316_s2 = int_to_ptr.vmem [resolvable:$true] %s1315_s2 }
 0x114   : > { %s8865_s1 = scalar_lea.hbm %s10958_s20, 128 }
 0x115   : > { %p8866_p7 = scmp.ne.s32.totalorder %s10958_s20, %s8865_s1  ;;  %p8872_p3 = scmp.lt.u32.totalorder %s8865_s1, %s10958_s20 }
 0x117   : > { %p8868_p4 = pnand %p8866_p7, %p9787_p8 }
 0x119   : > { %p8869_p1 = pneg %p8868_p4 }
 0x11b   : > { %p8874_p9 = pnand %p8872_p3, %p8869_p1 }
 0x11d   : > { %8877 = shalt.err (!%p8874_p9)
}
 0x11e   : > { %s8878_s23 = scalar_lea.vmem %s1273_s4, 128  ;;  %p8886_p13 = scmp.lt.s32.totalorder %s1273_s4, %s1273_s4 }
 0x11f   : > { %p8879_p10 = scmp.ne.s32.totalorder %s1273_s4, %s8878_s23  ;;  %p8887_p0 = scmp.lt.s32.totalorder %s8878_s23, %s8878_s23 }
 0x121   : > { %p8881_p11 = pnand %p8879_p10, %p9787_p8  ;;  %p8888_p2 = por %p8887_p0, %p8886_p13 }
 0x123   : > { %p8882_p12 = pneg %p8881_p11 }
 0x125   : > { %p8889_p5 = pnand %p8888_p2, %p8882_p12 }
 0x127   : > { %8892 = shalt.err (!%p8889_p5)
}
 0x128   : > { %8481 = dma.hbm_to_vmem [thread:$0]  (!%p9775_p6), %s10958_s20, 128, %s1273_s4, [#allocation28]  }
 0x129   : > { %s8893_s15 = scalar_lea.hbm %s9633_s27, 64 }
 0x12a   : > { %p8894_p7 = scmp.ne.s32.totalorder %s9633_s27, %s8893_s15  ;;  %p8900_p3 = scmp.lt.u32.totalorder %s8893_s15, %s9633_s27 }
 0x12c   : > { %p8896_p4 = pnand %p8894_p7, %p9787_p8 }
 0x12e   : > { %p8897_p1 = pneg %p8896_p4 }
 0x130   : > { %p8902_p9 = pnand %p8900_p3, %p8897_p1 }
 0x132   : > { %8905 = shalt.err (!%p8902_p9)
}
 0x133   : > { %s8906_s22 = scalar_lea.vmem %s1316_s2, 64  ;;  %p8914_p13 = scmp.lt.s32.totalorder %s1316_s2, %s1316_s2 }
 0x134   : > { %p8907_p10 = scmp.ne.s32.totalorder %s1316_s2, %s8906_s22  ;;  %p8915_p0 = scmp.lt.s32.totalorder %s8906_s22, %s8906_s22 }
 0x136   : > { %p8909_p11 = pnand %p8907_p10, %p9787_p8  ;;  %p8916_p2 = por %p8915_p0, %p8914_p13 }
 0x138   : > { %p8910_p12 = pneg %p8909_p11 }
 0x13a   : > { %p8917_p5 = pnand %p8916_p2, %p8910_p12 }
 0x13c   : > { %8920 = shalt.err (!%p8917_p5)
}
 0x13d   : > { %8487 = dma.hbm_to_vmem [thread:$0]  (!%p9775_p6), %s9633_s27, 64, %s1316_s2, [#allocation31]  }
 0x13e   : > { %s9483_s4 = smov [#allocation33]   ;;  %s9484_s1 = smov [#allocation36]  }
 0x13f   : > { %s1337_s28 = sshll.u32 %s9483_s4, 4  ;;  %s1359_s23 = sshll.u32 %s9484_s1, 4  ;;  %s1338_s28 = int_to_ptr.vmem [resolvable:$true] %s1337_s28  ;;  %s1360_s23 = int_to_ptr.vmem [resolvable:$true] %s1359_s23 }
 0x140   : > { %s8921_s15 = scalar_lea.hbm %s10964_s5, 64 }
 0x141   : > { %p8922_p7 = scmp.ne.s32.totalorder %s10964_s5, %s8921_s15  ;;  %p8928_p3 = scmp.lt.u32.totalorder %s8921_s15, %s10964_s5 }
 0x143   : > { %p8924_p4 = pnand %p8922_p7, %p9787_p8 }
 0x145   : > { %p8925_p1 = pneg %p8924_p4 }
 0x147   : > { %p8930_p9 = pnand %p8928_p3, %p8925_p1 }
 0x149   : > { %8933 = shalt.err (!%p8930_p9)
}
 0x14a   : > { %s8934_s22 = scalar_lea.vmem %s1338_s28, 64  ;;  %p8942_p13 = scmp.lt.s32.totalorder %s1338_s28, %s1338_s28 }
 0x14b   : > { %p8935_p10 = scmp.ne.s32.totalorder %s1338_s28, %s8934_s22  ;;  %p8943_p0 = scmp.lt.s32.totalorder %s8934_s22, %s8934_s22 }
 0x14d   : > { %p8937_p11 = pnand %p8935_p10, %p9787_p8  ;;  %p8944_p2 = por %p8943_p0, %p8942_p13 }
 0x14f   : > { %p8938_p12 = pneg %p8937_p11 }
 0x151   : > { %p8945_p5 = pnand %p8944_p2, %p8938_p12 }
 0x153   : > { %8948 = shalt.err (!%p8945_p5)
}
 0x154   : > { %8493 = dma.hbm_to_vmem [thread:$0]  (!%p9775_p6), %s10964_s5, 64, %s1338_s28, [#allocation34]  }
 0x155   : > { %s8949_s2 = scalar_lea.hbm %s9653_s30, 64 }
 0x156   : > { %p8950_p7 = scmp.ne.s32.totalorder %s9653_s30, %s8949_s2  ;;  %p8956_p3 = scmp.lt.u32.totalorder %s8949_s2, %s9653_s30 }
 0x158   : > { %p8952_p4 = pnand %p8950_p7, %p9787_p8 }
 0x15a   : > { %p8953_p1 = pneg %p8952_p4 }
 0x15c   : > { %p8958_p9 = pnand %p8956_p3, %p8953_p1 }
 0x15e   : > { %8961 = shalt.err (!%p8958_p9)
}
 0x15f   : > { %s8962_s4 = scalar_lea.vmem %s1360_s23, 64  ;;  %p8970_p13 = scmp.lt.s32.totalorder %s1360_s23, %s1360_s23 }
 0x160   : > { %p8963_p10 = scmp.ne.s32.totalorder %s1360_s23, %s8962_s4  ;;  %p8971_p0 = scmp.lt.s32.totalorder %s8962_s4, %s8962_s4 }
 0x162   : > { %p8965_p11 = pnand %p8963_p10, %p9787_p8  ;;  %p8972_p2 = por %p8971_p0, %p8970_p13 }
 0x164   : > { %p8966_p12 = pneg %p8965_p11 }
 0x166   : > { %p8973_p5 = pnand %p8972_p2, %p8966_p12 }
 0x168   : > { %8976 = shalt.err (!%p8973_p5)
}
 0x169   : > { %8499 = dma.hbm_to_vmem [thread:$0]  (!%p9775_p6), %s9653_s30, 64, %s1360_s23, [#allocation37]  }
 0x16a   : > { %s9485_s28 = smov [#allocation8]   ;;  %s9486_s15 = smov [#allocation11]  }
 0x16b   : > { %s1126_s1 = sshll.u32 %s9485_s28, 4  ;;  %s1151_s22 = sshll.u32 %s9486_s15, 4  ;;  %s1127_s1 = int_to_ptr.vmem [resolvable:$true] %s1126_s1  ;;  %s1152_s22 = int_to_ptr.vmem [resolvable:$true] %s1151_s22 }
 0x16c   : > { %s8977_s2 = scalar_lea.hbm %s10961_s13, 256 }
 0x16d   : > { %p8978_p7 = scmp.ne.s32.totalorder %s10961_s13, %s8977_s2  ;;  %p8984_p3 = scmp.lt.u32.totalorder %s8977_s2, %s10961_s13 }
 0x16f   : > { %p8980_p4 = pnand %p8978_p7, %p9787_p8 }
 0x171   : > { %p8981_p1 = pneg %p8980_p4 }
 0x173   : > { %p8986_p9 = pnand %p8984_p3, %p8981_p1 }
 0x175   : > { %8989 = shalt.err (!%p8986_p9)
}
 0x176   : > { %s8990_s4 = scalar_lea.vmem %s1127_s1, 256  ;;  %p8998_p13 = scmp.lt.s32.totalorder %s1127_s1, %s1127_s1 }
 0x177   : > { %p8991_p10 = scmp.ne.s32.totalorder %s1127_s1, %s8990_s4  ;;  %p8999_p0 = scmp.lt.s32.totalorder %s8990_s4, %s8990_s4 }
 0x179   : > { %p8993_p11 = pnand %p8991_p10, %p9787_p8  ;;  %p9000_p2 = por %p8999_p0, %p8998_p13 }
 0x17b   : > { %p8994_p12 = pneg %p8993_p11 }
 0x17d   : > { %p9001_p5 = pnand %p9000_p2, %p8994_p12 }
 0x17f   : > { %9004 = shalt.err (!%p9001_p5)
}
 0x180   : > { %s10969_s23 = smov 8   ;;  %s10970_s28 = smov 128  }
 0x181   : > { %8442 = dma.hbm_to_vmem [thread:$0]  (!%p9775_p6), %s10961_s13, 256, %s1127_s1, [#allocation7], %s10970_s28, %s10970_s28, %s10969_s23  }
 0x182   : > { %s9005_s15 = scalar_lea.hbm %s10957_s21, 128 }
 0x183   : > { %p9006_p7 = scmp.ne.s32.totalorder %s10957_s21, %s9005_s15  ;;  %p9012_p3 = scmp.lt.u32.totalorder %s9005_s15, %s10957_s21 }
 0x185   : > { %p9008_p4 = pnand %p9006_p7, %p9787_p8 }
 0x187   : > { %p9009_p1 = pneg %p9008_p4 }
 0x189   : > { %p9014_p9 = pnand %p9012_p3, %p9009_p1 }
 0x18b   : > { %9017 = shalt.err (!%p9014_p9)
}
 0x18c   : > { %s9018_s2 = scalar_lea.vmem %s1152_s22, 128  ;;  %p9026_p13 = scmp.lt.s32.totalorder %s1152_s22, %s1152_s22 }
 0x18d   : > { %p9019_p10 = scmp.ne.s32.totalorder %s1152_s22, %s9018_s2  ;;  %p9027_p0 = scmp.lt.s32.totalorder %s9018_s2, %s9018_s2 }
 0x18f   : > { %p9021_p11 = pnand %p9019_p10, %p9787_p8  ;;  %p9028_p2 = por %p9027_p0, %p9026_p13 }
 0x191   : > { %p9022_p12 = pneg %p9021_p11 }
 0x193   : > { %p9029_p5 = pnand %p9028_p2, %p9022_p12 }
 0x195   : > { %9032 = shalt.err (!%p9029_p5)
}
 0x196   : > { %8448 = dma.hbm_to_vmem [thread:$0]  (!%p9775_p6), %s10957_s21, 128, %s1152_s22, [#allocation10]  }
 0x197   : > { %s9487_s1 = smov [#allocation14]   ;;  %s9488_s23 = smov [#allocation17]  }
 0x198   : > { %s1173_s4 = sshll.u32 %s9487_s1, 4  ;;  %s1195_s28 = sshll.u32 %s9488_s23, 4  ;;  %s1174_s4 = int_to_ptr.vmem [resolvable:$true] %s1173_s4  ;;  %s1196_s28 = int_to_ptr.vmem [resolvable:$true] %s1195_s28 }
 0x199   : > { %s9033_s15 = scalar_lea.hbm %s9543_s29, 128 }
 0x19a   : > { %p9034_p7 = scmp.ne.s32.totalorder %s9543_s29, %s9033_s15  ;;  %p9040_p3 = scmp.lt.u32.totalorder %s9033_s15, %s9543_s29 }
 0x19c   : > { %p9036_p4 = pnand %p9034_p7, %p9787_p8 }
 0x19e   : > { %p9037_p1 = pneg %p9036_p4 }
 0x1a0   : > { %p9042_p9 = pnand %p9040_p3, %p9037_p1 }
 0x1a2   : > { %9045 = shalt.err (!%p9042_p9)
}
 0x1a3   : > { %s9046_s2 = scalar_lea.vmem %s1174_s4, 128  ;;  %p9054_p13 = scmp.lt.s32.totalorder %s1174_s4, %s1174_s4 }
 0x1a4   : > { %p9047_p10 = scmp.ne.s32.totalorder %s1174_s4, %s9046_s2  ;;  %p9055_p0 = scmp.lt.s32.totalorder %s9046_s2, %s9046_s2 }
 0x1a6   : > { %p9049_p11 = pnand %p9047_p10, %p9787_p8  ;;  %p9056_p2 = por %p9055_p0, %p9054_p13 }
 0x1a8   : > { %p9050_p12 = pneg %p9049_p11 }
 0x1aa   : > { %p9057_p5 = pnand %p9056_p2, %p9050_p12 }
 0x1ac   : > { %9060 = shalt.err (!%p9057_p5)
}
 0x1ad   : > { %s10971_s22 = sld [smem:[#allocation59_spill]] }
 0x1ae   : > { %8454 = dma.hbm_to_vmem [thread:$0]  (!%p9775_p6), %s9543_s29, 128, %s1174_s4, [#allocation13]  }
 0x1b3   : > { %s9061_s1 = scalar_lea.hbm %s10971_s22, 128 }
 0x1b4   : > { %p9062_p7 = scmp.ne.s32.totalorder %s10971_s22, %s9061_s1  ;;  %p9068_p3 = scmp.lt.u32.totalorder %s9061_s1, %s10971_s22 }
 0x1b6   : > { %p9064_p4 = pnand %p9062_p7, %p9787_p8 }
 0x1b8   : > { %p9065_p1 = pneg %p9064_p4 }
 0x1ba   : > { %p9070_p9 = pnand %p9068_p3, %p9065_p1 }
 0x1bc   : > { %9073 = shalt.err (!%p9070_p9)
}
 0x1bd   : > { %s9074_s23 = scalar_lea.vmem %s1196_s28, 128  ;;  %p9082_p13 = scmp.lt.s32.totalorder %s1196_s28, %s1196_s28 }
 0x1be   : > { %p9075_p10 = scmp.ne.s32.totalorder %s1196_s28, %s9074_s23  ;;  %p9083_p0 = scmp.lt.s32.totalorder %s9074_s23, %s9074_s23 }
 0x1c0   : > { %p9077_p11 = pnand %p9075_p10, %p9787_p8  ;;  %p9084_p2 = por %p9083_p0, %p9082_p13 }
 0x1c2   : > { %p9078_p12 = pneg %p9077_p11 }
 0x1c4   : > { %p9085_p5 = pnand %p9084_p2, %p9078_p12 }
 0x1c6   : > { %9088 = shalt.err (!%p9085_p5)
}
 0x1c7   : > { %s10972_s4 = sld [smem:[#allocation61_spill]]  ;;  %s9489_s15 = smov [#allocation20]  }
 0x1c8   : > { %8460 = dma.hbm_to_vmem [thread:$0]  (!%p9775_p6), %s10971_s22, 128, %s1196_s28, [#allocation16]  }
 0x1c9   : > { %s1217_s2 = sshll.u32 %s9489_s15, 4  ;;  %s9490_s1 = smov [#allocation23]   ;;  %s1218_s2 = int_to_ptr.vmem [resolvable:$true] %s1217_s2 }
 0x1ca   : > { %s1239_s3 = sshll.u32 %s9490_s1, 4  ;;  %s1240_s3 = int_to_ptr.vmem [resolvable:$true] %s1239_s3 }
 0x1cd   : > { %s9089_s5 = scalar_lea.hbm %s10972_s4, 128 }
 0x1ce   : > { %p9090_p7 = scmp.ne.s32.totalorder %s10972_s4, %s9089_s5  ;;  %p9096_p3 = scmp.lt.u32.totalorder %s9089_s5, %s10972_s4 }
 0x1d0   : > { %p9092_p4 = pnand %p9090_p7, %p9787_p8 }
 0x1d2   : > { %p9093_p1 = pneg %p9092_p4 }
 0x1d4   : > { %p9098_p9 = pnand %p9096_p3, %p9093_p1 }
 0x1d6   : > { %9101 = shalt.err (!%p9098_p9)
}
 0x1d7   : > { %s9102_s23 = scalar_lea.vmem %s1218_s2, 128  ;;  %p9110_p13 = scmp.lt.s32.totalorder %s1218_s2, %s1218_s2 }
 0x1d8   : > { %p9103_p10 = scmp.ne.s32.totalorder %s1218_s2, %s9102_s23  ;;  %p9111_p0 = scmp.lt.s32.totalorder %s9102_s23, %s9102_s23 }
 0x1da   : > { %p9105_p11 = pnand %p9103_p10, %p9787_p8  ;;  %p9112_p2 = por %p9111_p0, %p9110_p13 }
 0x1dc   : > { %p9106_p12 = pneg %p9105_p11 }
 0x1de   : > { %p9113_p5 = pnand %p9112_p2, %p9106_p12 }
 0x1e0   : > { %9116 = shalt.err (!%p9113_p5)
}
 0x1e1   : > { %s10973_s28 = sld [smem:[#allocation62_spill]] }
 0x1e2   : > { %8466 = dma.hbm_to_vmem [thread:$0]  (!%p9775_p6), %s10972_s4, 128, %s1218_s2, [#allocation19]  }
 0x1e7   : > { %s9117_s5 = scalar_lea.hbm %s10973_s28, 128 }
 0x1e8   : > { %p9118_p7 = scmp.ne.s32.totalorder %s10973_s28, %s9117_s5  ;;  %p9124_p3 = scmp.lt.u32.totalorder %s9117_s5, %s10973_s28 }
 0x1ea   : > { %p9120_p4 = pnand %p9118_p7, %p9787_p8 }
 0x1ec   : > { %p9121_p1 = pneg %p9120_p4 }
 0x1ee   : > { %p9126_p9 = pnand %p9124_p3, %p9121_p1 }
 0x1f0   : > { %9129 = shalt.err (!%p9126_p9)
}
 0x1f1   : > { %s9130_s15 = scalar_lea.vmem %s1240_s3, 128  ;;  %p9138_p13 = scmp.lt.s32.totalorder %s1240_s3, %s1240_s3 }
 0x1f2   : > { %p9131_p10 = scmp.ne.s32.totalorder %s1240_s3, %s9130_s15  ;;  %p9139_p0 = scmp.lt.s32.totalorder %s9130_s15, %s9130_s15 }
 0x1f4   : > { %p9133_p11 = pnand %p9131_p10, %p9787_p8  ;;  %p9140_p2 = por %p9139_p0, %p9138_p13 }
 0x1f6   : > { %p9134_p12 = pneg %p9133_p11 }
 0x1f8   : > { %p9141_p5 = pnand %p9140_p2, %p9134_p12 }
 0x1fa   : > { %9144 = shalt.err (!%p9141_p5)
}
 0x1fb   : > { %s10974_s2 = sld [smem:[#allocation64_spill]]  ;;  %s9491_s1 = smov [#allocation26]  }
 0x1fc   : > { %8472 = dma.hbm_to_vmem [thread:$0]  (!%p9775_p6), %s10973_s28, 128, %s1240_s3, [#allocation22]  }
 0x1fd   : > { %s1261_s23 = sshll.u32 %s9491_s1, 4  ;;  %s9492_s5 = smov [#allocation29]   ;;  %s1262_s23 = int_to_ptr.vmem [resolvable:$true] %s1261_s23 }
 0x1fe   : > { %s1304_s4 = sshll.u32 %s9492_s5, 4  ;;  %s1305_s4 = int_to_ptr.vmem [resolvable:$true] %s1304_s4 }
 0x201   : > { %s9145_s6 = scalar_lea.hbm %s10974_s2, 128 }
 0x202   : > { %p9146_p7 = scmp.ne.s32.totalorder %s10974_s2, %s9145_s6  ;;  %p9152_p3 = scmp.lt.u32.totalorder %s9145_s6, %s10974_s2 }
 0x204   : > { %p9148_p4 = pnand %p9146_p7, %p9787_p8 }
 0x206   : > { %p9149_p1 = pneg %p9148_p4 }
 0x208   : > { %p9154_p9 = pnand %p9152_p3, %p9149_p1 }
 0x20a   : > { %9157 = shalt.err (!%p9154_p9)
}
 0x20b   : > { %s9158_s15 = scalar_lea.vmem %s1262_s23, 128  ;;  %p9166_p13 = scmp.lt.s32.totalorder %s1262_s23, %s1262_s23 }
 0x20c   : > { %p9159_p10 = scmp.ne.s32.totalorder %s1262_s23, %s9158_s15  ;;  %p9167_p0 = scmp.lt.s32.totalorder %s9158_s15, %s9158_s15 }
 0x20e   : > { %p9161_p11 = pnand %p9159_p10, %p9787_p8  ;;  %p9168_p2 = por %p9167_p0, %p9166_p13 }
 0x210   : > { %p9162_p12 = pneg %p9161_p11 }
 0x212   : > { %p9169_p5 = pnand %p9168_p2, %p9162_p12 }
 0x214   : > { %9172 = shalt.err (!%p9169_p5)
}
 0x215   : > { %s10975_s3 = sld [smem:[#allocation73_spill]] }
 0x216   : > { %8478 = dma.hbm_to_vmem [thread:$0]  (!%p9775_p6), %s10974_s2, 128, %s1262_s23, [#allocation25]  }
 0x21b   : > { %s9173_s6 = scalar_lea.hbm %s10975_s3, 64 }
 0x21c   : > { %p9174_p7 = scmp.ne.s32.totalorder %s10975_s3, %s9173_s6  ;;  %p9180_p3 = scmp.lt.u32.totalorder %s9173_s6, %s10975_s3 }
 0x21e   : > { %p9176_p4 = pnand %p9174_p7, %p9787_p8 }
 0x220   : > { %p9177_p1 = pneg %p9176_p4 }
 0x222   : > { %p9182_p9 = pnand %p9180_p3, %p9177_p1 }
 0x224   : > { %9185 = shalt.err (!%p9182_p9)
}
 0x225   : > { %s9186_s1 = scalar_lea.vmem %s1305_s4, 64  ;;  %p9194_p13 = scmp.lt.s32.totalorder %s1305_s4, %s1305_s4 }
 0x226   : > { %p9187_p10 = scmp.ne.s32.totalorder %s1305_s4, %s9186_s1  ;;  %p9195_p0 = scmp.lt.s32.totalorder %s9186_s1, %s9186_s1 }
 0x228   : > { %p9189_p11 = pnand %p9187_p10, %p9787_p8  ;;  %p9196_p2 = por %p9195_p0, %p9194_p13 }
 0x22a   : > { %p9190_p12 = pneg %p9189_p11 }
 0x22c   : > { %p9197_p5 = pnand %p9196_p2, %p9190_p12 }
 0x22e   : > { %9200 = shalt.err (!%p9197_p5)
}
 0x22f   : > { %s10976_s23 = sld [smem:[#allocation74_spill]]  ;;  %s9493_s5 = smov [#allocation32]  }
 0x230   : > { %8484 = dma.hbm_to_vmem [thread:$0]  (!%p9775_p6), %s10975_s3, 64, %s1305_s4, [#allocation28]  }
 0x231   : > { %s1326_s15 = sshll.u32 %s9493_s5, 4  ;;  %s9494_s6 = smov [#allocation35]   ;;  %s1327_s15 = int_to_ptr.vmem [resolvable:$true] %s1326_s15 }
 0x232   : > { %s1348_s2 = sshll.u32 %s9494_s6, 4  ;;  %s1349_s2 = int_to_ptr.vmem [resolvable:$true] %s1348_s2 }
 0x235   : > { %s9201_s9 = scalar_lea.hbm %s10976_s23, 64 }
 0x236   : > { %p9202_p7 = scmp.ne.s32.totalorder %s10976_s23, %s9201_s9  ;;  %p9208_p3 = scmp.lt.u32.totalorder %s9201_s9, %s10976_s23 }
 0x238   : > { %p9204_p4 = pnand %p9202_p7, %p9787_p8 }
 0x23a   : > { %p9205_p1 = pneg %p9204_p4 }
 0x23c   : > { %p9210_p9 = pnand %p9208_p3, %p9205_p1 }
 0x23e   : > { %9213 = shalt.err (!%p9210_p9)
}
 0x23f   : > { %s9214_s1 = scalar_lea.vmem %s1327_s15, 64  ;;  %p9222_p13 = scmp.lt.s32.totalorder %s1327_s15, %s1327_s15 }
 0x240   : > { %p9215_p10 = scmp.ne.s32.totalorder %s1327_s15, %s9214_s1  ;;  %p9223_p0 = scmp.lt.s32.totalorder %s9214_s1, %s9214_s1 }
 0x242   : > { %p9217_p11 = pnand %p9215_p10, %p9787_p8  ;;  %p9224_p2 = por %p9223_p0, %p9222_p13 }
 0x244   : > { %p9218_p12 = pneg %p9217_p11 }
 0x246   : > { %p9225_p5 = pnand %p9224_p2, %p9218_p12 }
 0x248   : > { %9228 = shalt.err (!%p9225_p5)
}
 0x249   : > { %s10977_s4 = sld [smem:[#allocation76_spill]] }
 0x24a   : > { %8490 = dma.hbm_to_vmem [thread:$0]  (!%p9775_p6), %s10976_s23, 64, %s1327_s15, [#allocation31]  }
 0x24f   : > { %s9229_s9 = scalar_lea.hbm %s10977_s4, 64 }
 0x250   : > { %p9230_p7 = scmp.ne.s32.totalorder %s10977_s4, %s9229_s9  ;;  %p9236_p3 = scmp.lt.u32.totalorder %s9229_s9, %s10977_s4 }
 0x252   : > { %p9232_p4 = pnand %p9230_p7, %p9787_p8 }
 0x254   : > { %p9233_p1 = pneg %p9232_p4 }
 0x256   : > { %p9238_p9 = pnand %p9236_p3, %p9233_p1 }
 0x258   : > { %9241 = shalt.err (!%p9238_p9)
}
 0x259   : > { %s9242_s5 = scalar_lea.vmem %s1349_s2, 64  ;;  %p9250_p13 = scmp.lt.s32.totalorder %s1349_s2, %s1349_s2 }
 0x25a   : > { %p9243_p10 = scmp.ne.s32.totalorder %s1349_s2, %s9242_s5  ;;  %p9251_p0 = scmp.lt.s32.totalorder %s9242_s5, %s9242_s5 }
 0x25c   : > { %p9245_p11 = pnand %p9243_p10, %p9787_p8  ;;  %p9252_p2 = por %p9251_p0, %p9250_p13 }
 0x25e   : > { %p9246_p12 = pneg %p9245_p11 }
 0x260   : > { %p9253_p5 = pnand %p9252_p2, %p9246_p12 }
 0x262   : > { %9256 = shalt.err (!%p9253_p5)
}
 0x263   : > { %s10978_s15 = sld [smem:[#allocation77_spill]]  ;;  %s9495_s6 = smov [#allocation38]  }
 0x264   : > { %8496 = dma.hbm_to_vmem [thread:$0]  (!%p9775_p6), %s10977_s4, 64, %s1349_s2, [#allocation34]  }
 0x265   : > { %s1370_s1 = sshll.u32 %s9495_s6, 4  ;;  %s1371_s1 = int_to_ptr.vmem [resolvable:$true] %s1370_s1 }
 0x269   : > { %s9257_s9 = scalar_lea.hbm %s10978_s15, 64 }
 0x26a   : > { %p9258_p7 = scmp.ne.s32.totalorder %s10978_s15, %s9257_s9  ;;  %p9264_p3 = scmp.lt.u32.totalorder %s9257_s9, %s10978_s15 }
 0x26c   : > { %p9260_p4 = pnand %p9258_p7, %p9787_p8 }
 0x26e   : > { %p9261_p1 = pneg %p9260_p4 }
 0x270   : > { %p9266_p9 = pnand %p9264_p3, %p9261_p1 }
 0x272   : > { %9269 = shalt.err (!%p9266_p9)
}
 0x273   : > { %s9270_s5 = scalar_lea.vmem %s1371_s1, 64  ;;  %p9278_p13 = scmp.lt.s32.totalorder %s1371_s1, %s1371_s1 }
 0x274   : > { %p9271_p10 = scmp.ne.s32.totalorder %s1371_s1, %s9270_s5  ;;  %p9279_p0 = scmp.lt.s32.totalorder %s9270_s5, %s9270_s5 }
 0x276   : > { %p9273_p11 = pnand %p9271_p10, %p9787_p8  ;;  %p9280_p2 = por %p9279_p0, %p9278_p13 }
 0x278   : > { %p9274_p12 = pneg %p9273_p11 }
 0x27a   : > { %p9281_p5 = pnand %p9280_p2, %p9274_p12 }
 0x27c   : > { %9284 = shalt.err (!%p9281_p5)
}
 0x27d   : > { %8502 = dma.hbm_to_vmem [thread:$0]  (!%p9775_p6), %s10978_s15, 64, %s1371_s1, [#allocation37]  }
 0x27e   : > { %s7095_s11 = sadd.s32 4294967294, %s9425_s10   ;;  %s10032_s2 = sadd.s32 1, %s9425_s10  }
 0x27f   : > { %s124_s26 = ssub.s32 %s9425_s10, %s10032_s2  ;;  %s127_s6 = sadd.s32 1, %s9421_s8 }
 0x280   : > { %s10979_s9 = sld [smem:[#allocation53_spill]]  ;;  %p125_p8 = scmp.eq.s32.totalorder %s124_s26, 0 }
 0x281   : > { %p134_p7 = scmp.ne.s32.totalorder %s9421_s8, %s9417_s0  ;;  %p135_p4 = scmp.eq.s32.totalorder %s9425_s10, 0 }
 0x282   : > { %p140_p1 = scmp.ne.s32.totalorder %s9417_s0, %s9413_s7  ;;  %p10981_p9 = scmp.eq.s32.totalorder %s9759_s16, 0 }
 0x283   : > { %s10043_s5 = scalar_select %p125_p8, %s9421_s8, %s127_s6  }
 0x284   : > { %p10045_p3 = por %p135_p4, %p134_p7  ;;  %p10051_p6 = por %p10981_p9, %p140_p1 }
 0x285   : > { %p1088_p10 = scmp.eq.s32.totalorder %s9759_s16, 1  ;;  %p1094_p11 = scmp.eq.s32.totalorder %s7095_s11, 1 }
 0x286   : > { %s10982_s1 = scalar_select %p10051_p6, 1, 0 }
 0x287   : > { %p8533_p12 = scmp.lt.s32.totalorder %s9425_s10, 2  ;;  %s1426_s4 = sand.u32 1, %s9421_s8  }
 0x288   : > { %p10058_p13 = por %p1088_p10, %p134_p7  ;;  %p10062_p0 = por %p1094_p11, %p140_p1 }
 0x289   : > { %s7120_s13 = sshll.u32 %s1426_s4, 3  ;;  %s7121_s14 = sshll.u32 %s9425_s10, 7 }
 0x28a   : > { %s10983_s26 = scalar_select %p10058_p13, 1, 0 }
 0x28b   : > { %s10984_s6 = scalar_select %p10062_p0, 1, 0 }
 0x28c   : > { %s10068_s15 = scalar_lea.hbm %s10979_s9, %s7121_s14  ;;  %s1430_s11 = scalar_lea.vmem [#allocation3], %s7120_s13 }
 0x28d   : > { %s1437_s17 = sshll.u32 %s1430_s11, 4  ;;  %p10074_p2 = pnand %p8533_p12, %p10045_p3  ;;  %s10070_s17 = int_to_ptr.vmem [resolvable:$true] %s1437_s17 }
 0x28e   : > { %s1427_s21 = scalar_lea.sflag [#allocation4], %s1426_s4  ;;  %s9285_s22 = scalar_lea.hbm %s10068_s15, 128 }
 0x28f   : > { %p9286_p5 = scmp.ne.s32.totalorder %s10068_s15, %s9285_s22  ;;  %p9287_p8 = pneg %p10074_p2 }
 0x290   : > { %s9290_s13 = scalar_lea.hbm %s10979_s9, 256  ;;  %p9291_p1 = scmp.lt.u32.totalorder %s10068_s15, %s10979_s9 }
 0x291   : > { %p9288_p7 = pnand %p9287_p8, %p9286_p5  ;;  %p9292_p9 = scmp.lt.u32.totalorder %s9290_s13, %s9285_s22 }
 0x292   : > { %p9294_p11 = scmp.lt.u32.totalorder %s9285_s22, %s10068_s15 }
 0x293   : > { %p9289_p4 = pneg %p9288_p7  ;;  %p9293_p10 = por %p9292_p9, %p9291_p1 }
 0x295   : > { %p9295_p3 = por %p9294_p11, %p9293_p10 }
 0x297   : > { %p9296_p12 = pnand %p9295_p3, %p9289_p4 }
 0x299   : > { %9299 = shalt.err (!%p9296_p12)
}
 0x29a   : > { %s9300_s14 = scalar_lea.vmem %s10070_s17, 128  ;;  %s9496_s3 = smov [#allocation3]  }
 0x29b   : > { %p9301_p0 = scmp.ne.s32.totalorder %s10070_s17, %s9300_s14  ;;  %s9305_s4 = sshll.u32 %s9496_s3, 4  ;;  %s9306_s4 = int_to_ptr.vmem [resolvable:$false] %s9305_s4 }
 0x29c   : > { %s9307_s11 = scalar_lea.vmem %s9306_s4, 256  ;;  %p9308_p5 = scmp.lt.s32.totalorder %s10070_s17, %s9306_s4 }
 0x29d   : > { %p9303_p13 = pnand %p9301_p0, %p9287_p8  ;;  %p9309_p7 = scmp.lt.s32.totalorder %s9307_s11, %s9300_s14 }
 0x29f   : > { %p9304_p6 = pneg %p9303_p13  ;;  %p9310_p1 = por %p9309_p7, %p9308_p5 }
 0x2a1   : > { %p9311_p9 = pnand %p9310_p1, %p9304_p6 }
 0x2a3   : > { %9314 = shalt.err (!%p9311_p9)
}
 0x2a4   : > { %8506 = dma.hbm_to_vmem [thread:$0]  (!%p10074_p2), %s10068_s15, 128, %s10070_s17, %s1427_s21  }
 0x2a5   : > { %p10986_p4 = scmp.ne.s32.totalorder %s10966_s18, 0 }
 0x2a6   : > { %s10102_s22 = sand.u32 (!%p10986_p4), 1, %s9417_s0   ;;  %p10987_p6 = scmp.ne.s32.totalorder (!%p10986_p4), %s10982_s1, 0 }
 0x2a7   : > { %1446 = sbr.rel (%p10986_p4) target bundleno = 6546 (0x1992), region = 200  ;;  %s7123_s13 = sshll.u32 (!%p10986_p4), %s10102_s22, 3 }
 0x2a8   : > { %s1449_s3 = scalar_lea.sflag (!%p10986_p4), [#allocation4], %s10102_s22  ;;  %s10106_s14 = scalar_lea.vmem (!%p10986_p4), [#allocation3], %s7123_s13 }
 0x2ae   : > { %9360 = dma.done.wait (%p10987_p6), %s1449_s3, 128  }
 0x2af   : > { %9362 = vsyncadd (%p10987_p6), %s1449_s3, 4294967168  ;;  %p10988_p13 = scmp.eq.s32.totalorder %s9759_s16, 0 }
 0x2b1   : > { %9364 = dma.done.wait (%p10988_p13), [#allocation7], 512   ;;  %p10989_p0 = pmov %p10988_p13 }
 0x2b3   : > { %9366 = vsyncadd (%p10989_p0), [#allocation7], 4294966784  ;;  %p10990_p2 = pmov %p10989_p0 }
 0x2b4   : > { %p10991_p8 = pmov %p10989_p0 }
 0x2b5   : > { %9368 = dma.done.wait (%p10990_p2), [#allocation10], 256  }
 0x2b6   : > { %9370 = vsyncadd (%p10991_p8), [#allocation10], 4294967040  ;;  %p10992_p10 = pmov %p10989_p0 }
 0x2b7   : > { %p10993_p11 = pmov %p10989_p0 }
 0x2b8   : > { %9372 = dma.done.wait (%p10992_p10), [#allocation13], 256  }
 0x2b9   : > { %9374 = vsyncadd (%p10993_p11), [#allocation13], 4294967040  ;;  %p10994_p3 = pmov %p10989_p0 }
 0x2ba   : > { %p10995_p12 = pmov %p10989_p0 }
 0x2bb   : > { %9376 = dma.done.wait (%p10994_p3), [#allocation16], 256  }
 0x2bc   : > { %9378 = vsyncadd (%p10995_p12), [#allocation16], 4294967040  ;;  %p10996_p5 = pmov %p10989_p0 }
 0x2bd   : > { %p10997_p7 = pmov %p10989_p0 }
 0x2be   : > { %9380 = dma.done.wait (%p10996_p5), [#allocation19], 256  }
 0x2bf   : > { %9382 = vsyncadd (%p10997_p7), [#allocation19], 4294967040  ;;  %p10998_p1 = pmov %p10989_p0 }
 0x2c0   : > { %p10999_p9 = pmov %p10989_p0 }
 0x2c1   : > { %9384 = dma.done.wait (%p10998_p1), [#allocation22], 256  }
 0x2c2   : > { %9386 = vsyncadd (%p10999_p9), [#allocation22], 4294967040  ;;  %p11000_p4 = pmov %p10989_p0 }
 0x2c3   : > { %p11001_p6 = pmov %p10989_p0 }
 0x2c4   : > { %9388 = dma.done.wait (%p11000_p4), [#allocation25], 256  }
 0x2c5   : > { %9390 = vsyncadd (%p11001_p6), [#allocation25], 4294967040  ;;  %p11002_p13 = pmov %p10989_p0 }
 0x2c7   : > { %9392 = dma.done.wait (%p11002_p13), [#allocation28], 192  }
 0x2c8   : > { %9394 = vsyncadd (%p10989_p0), [#allocation28], 4294967104  ;;  %p11003_p2 = pmov %p10989_p0 }
 0x2c9   : > { %p11004_p8 = pmov %p10989_p0 }
 0x2ca   : > { %9396 = dma.done.wait (%p11003_p2), [#allocation31], 128  }
 0x2cb   : > { %9398 = vsyncadd (%p11004_p8), [#allocation31], 4294967168  ;;  %p11005_p10 = pmov %p10989_p0 }
 0x2cc   : > { %p11006_p11 = pmov %p10989_p0 }
 0x2cd   : > { %9400 = dma.done.wait (%p11005_p10), [#allocation34], 128  }
 0x2ce   : > { %9402 = vsyncadd (%p11006_p11), [#allocation34], 4294967168  ;;  %p11007_p3 = pmov %p10989_p0 }
 0x2cf   : > { %p11008_p12 = pmov %p10989_p0 }
 0x2d0   : > { %9404 = dma.done.wait (%p11007_p3), [#allocation37], 128  }
 0x2d1   : > { %9406 = vsyncadd (%p11008_p12), [#allocation37], 4294967168  ;;  %v1651_v1 = vlaneseq  ;;  %v9497_v2 = vmov 0.0   ;;  %vm10917_vm0 = vmmov 0   ;;  %vm1729_vm3 = vcmask 64512   ;;  %v1646_v26 = vld [vmem:[%s10106_s14] sm:$0xff] }
 0x2d2   : > { %7639 = vmatprep.subr.mxu1 %v9497_v2  ;;  %7641 = vmatprep.mubr.msk.f32.mxu1 %vm10917_vm0, %v9497_v2  ;;  %v9499_v31 = vmov 1.0   ;;  %v1647_v38 = vld [vmem:[#allocation6] sm:$0xff]  ;;  %v1649_v39 = vld [vmem:[#allocation8] sm:$0xff]  ;;  %v2316_v40 = vld [vmem:[#allocation11] sm:$0xff]  ;;  %v9500_v41 = vmov 0   ;;  %s11009_s17 = sld [smem:[#allocation66_spill]] }
 0x2d3   : > { %v10159_v3 = vand.u32 127, %v1651_v1  ;;  %7649 = vmatprep.subr.mxu0 %v9497_v2  ;;  %7651 = vmatprep.mubr.msk.f32.mxu0 %vm10917_vm0, %v9497_v2  ;;  %v10173_v13 = vshrl.u32 %v1651_v1, 7  ;;  %s11010_s21 = sld [smem:[#allocation68_spill]]  ;;  %v1650_v42 = vld [vmem:[#allocation8 + $0x8] sm:$0xff]  ;;  %s11011_s20 = sld [smem:[#allocation70_spill]]  ;;  %v2729_v44 = vld [vmem:[#allocation17] sm:$0xff] }
 0x2d4   : > { %8665 = vset.pattern.permute.xlu0 %v9500_v41  ;;  %8666 = vset.pattern.permute.xlu1 %v9500_v41  ;;  %v2727_v43 = vld [vmem:[#allocation14] sm:$0xff]  ;;  %s11012_s18 = sld [smem:[#allocation72_spill]]  ;;  %v3225_v46 = vld [vmem:[#allocation23] sm:$0xff]  ;;  %s11013_s15 = sld [smem:[#allocation78_spill]]  ;;  %v4575_v53 = vld [vmem:[#allocation33] sm:$0xf] }
 0x2d5   : > { %v7146_v4 = vadd.s32 4294967293, %v10159_v3  ;;  %v1665_v5 = vadd.s32 1, %v10159_v3  ;;  %v10167_v6 = vadd.s32 2, %v10159_v3  ;;  %v1696_v7 = vadd.s32 4, %v10159_v3  ;;  %2225 = vperm.xlu0 %8665, %v1649_v39   ;;  %2649 = vperm.xlu1 %8666, %v2316_v40   ;;  %v2731_v45 = vld [vmem:[#allocation20] sm:$0xff]  ;;  %s11014_s1 = sld [smem:[#allocation80_spill]] }
 0x2d6   : > { %v1707_v8 = vadd.s32 5, %v10159_v3  ;;  %v1718_v9 = vadd.s32 6, %v10159_v3  ;;  %v1691_v18 = vsub.s32 14, %v10159_v3  ;;  %vm1690_vm4 = vcmp.ge.s32.totalorder %v10159_v3, 8  ;;  %v3227_v47 = vld [vmem:[#allocation26] sm:$0xff]  ;;  %s11015_s4 = sld [smem:[#allocation82_spill]] }
 0x2d7   : > { %v1657_v10 = vsub.s32 0, %v7146_v4  ;;  %v7149_v11 = vadd.s32 4294967293, %v1665_v5  ;;  %v7152_v12 = vadd.s32 4294967293, %v10167_v6  ;;  %v10175_v14 = vadd.s32 4294967293, %v1696_v7  ;;  %s11016_s11 = sld [smem:[#allocation84_spill]]  ;;  %s11017_s13 = sld [smem:[#allocation86_spill]] }
 0x2d8   : > { %v10182_v20 = vadd.s32 4294967293, %v1707_v8  ;;  %v10184_v21 = vadd.s32 4294967293, %v1718_v9  ;;  %v1692_v33 = vsel %vm1690_vm4, %v1691_v18, %v10159_v3  ;;  %v3229_v48 = vld [vmem:[%s11009_s17] sm:$0xff]  ;;  %s11018_s3 = sld [smem:[#allocation88_spill]]  ;;  %v4577_v54 = vld [vmem:[#allocation36] sm:$0xf] }
 0x2d9   : > { %v10177_v15 = vmin.u32 %v7146_v4, %v1657_v10  ;;  %v1668_v16 = vsub.s32 0, %v7149_v11  ;;  %v1679_v17 = vsub.s32 0, %v7152_v12  ;;  %vm1701_vm1 = vcmp.ge.s32.totalorder %v10175_v14, 8  ;;  %2230 = vperm.xlu0 %8665, %v1650_v42   ;;  %2987 = vperm.xlu1 %8666, %v2727_v43   ;;  %v3703_v49 = vld [vmem:[%s11010_s21] sm:$0xff]  ;;  %s11021_s14 = sld [smem:[#allocation67_spill]]  ;;  %s11022_s17 = sld [smem:[#allocation69_spill]] }
 0x2da   : > { %v1702_v19 = vsub.s32 14, %v10175_v14  ;;  %v1724_v30 = vsub.s32 14, %v10184_v21  ;;  %v1713_v34 = vsub.s32 14, %v10182_v20  ;;  %vm1723_vm8 = vcmp.ge.s32.totalorder %v10184_v21, 8  ;;  %v3705_v50 = vld [vmem:[%s11011_s20] sm:$0xff]  ;;  %s11023_s21 = sld [smem:[#allocation71_spill]] }
 0x2db   : > { %vm1659_vm2 = vcmp.ge.s32.totalorder %v10177_v15, 8  ;;  %v1660_v22 = vsub.s32 14, %v10177_v15  ;;  %v10188_v23 = vmin.u32 %v7149_v11, %v1668_v16  ;;  %v10190_v24 = vmin.u32 %v7152_v12, %v1679_v17  ;;  %v3707_v51 = vld [vmem:[%s11012_s18] sm:$0xff]  ;;  %s11038_s20 = sld [smem:[#allocation79_spill]]  ;;  %s11039_s18 = sld [smem:[#allocation81_spill]] }
 0x2dc   : > { %v1703_v29 = vsel %vm1701_vm1, %v1702_v19, %v10175_v14  ;;  %vm1712_vm10 = vcmp.ge.s32.totalorder %v10182_v20, 8  ;;  %vm1693_vm13 = vcmp.eq.s32.totalorder %v10173_v13, %v1692_v33  ;;  %v1725_v36 = vsel %vm1723_vm8, %v1724_v30, %v10184_v21  ;;  %v4190_v52 = vld [vmem:[#allocation30] sm:$0xf]  ;;  %p11057_p7 = scmp.ne.s32.totalorder %s10983_s26, 0 }
 0x2dd   : > { %v1661_v25 = vsel %vm1659_vm2, %v1660_v22, %v10177_v15  ;;  %vm1670_vm5 = vcmp.ge.s32.totalorder %v10188_v23, 8  ;;  %v1671_v27 = vsub.s32 14, %v10188_v23  ;;  %vm1681_vm6 = vcmp.ge.s32.totalorder %v10190_v24, 8  ;;  %3069 = vperm.xlu0 %8665, %v2729_v44   ;;  %3147 = vperm.xlu1 %8666, %v2731_v45   ;;  %v4579_v55 = vld [vmem:[%s11013_s15] sm:$0xf]  ;;  %s11040_s15 = sld [smem:[#allocation83_spill]] }
 0x2de   : > { %vm1662_vm7 = vcmp.eq.s32.totalorder %v10173_v13, %v1661_v25  ;;  %v1682_v28 = vsub.s32 14, %v10190_v24  ;;  %vm1704_vm12 = vcmp.eq.s32.totalorder %v10173_v13, %v1703_v29  ;;  %v1714_v37 = vsel %vm1712_vm10, %v1713_v34, %v10182_v20  ;;  %v5098_v56 = vld [vmem:[%s11014_s1] sm:$0xf]  ;;  %s11043_s1 = sld [smem:[#allocation85_spill]] }
 0x2df   : > { %7640 = vmatpush3.msk.msra.mxu1 %vm1662_vm7, %v9499_v31  ;;  %v1672_v32 = vsel %vm1670_vm5, %v1671_v27, %v10188_v23  ;;  %vm1726_vm14 = vcmp.eq.s32.totalorder %v10173_v13, %v1725_v36  ;;  %vm1715_vm15 = vcmp.eq.s32.totalorder %v10173_v13, %v1714_v37  ;;  %vm2233_vm1 = vcmask 457728   ;;  %v5100_v57 = vld [vmem:[%s11015_s4] sm:$0xf]  ;;  %s11045_s4 = sld [smem:[#allocation87_spill]] }
 0x2e0   : > { %7642 = vmatmul.mubr.msk.f32.vlgmr.msra.gmra.mrb[0].mxu1 %vm1729_vm3, %v1646_v26  ;;  %7644 = vmatprep.subr.mxu1 %v9497_v2  ;;  %vm1673_vm9 = vcmp.eq.s32.totalorder %v10173_v13, %v1672_v32  ;;  %v1683_v35 = vsel %vm1681_vm6, %v1682_v28, %v10190_v24  ;;  %v5102_v58 = vld [vmem:[%s11016_s11] sm:$0xf]  ;;  %v10261_v27 = vmul.u32 2, %v10173_v13  ;;  %v9501_v44 = vmov 0.0|0.0   ;;  %s11047_s11 = sld [smem:[#allocation89_spill]] }
 0x2e1   : > { %7645 = vmatpush3.msk.msra.mxu1 %vm1673_vm9, %v9499_v31  ;;  %7646 = vmatprep.mubr.msk.f32.mxu1 %vm10917_vm0, %v9497_v2  ;;  %vm1684_vm11 = vcmp.eq.s32.totalorder %v10173_v13, %v1683_v35  ;;  %v5601_v59 = vld [vmem:[%s11017_s13] sm:$0xf]  ;;  %vm2652_vm9 = vcmask 523264   ;;  %s11056_s13 = sld [smem:[#allocation90_spill]] }
 0x2e2   : > { %7650 = vmatpush3.msk.msra.mxu0 %vm1684_vm11, %v9499_v31  ;;  %7654 = vmatprep.subr.mxu1 %v9497_v2  ;;  %v5603_v60 = vld [vmem:[%s11018_s3] sm:$0xf]  ;;  %v2336_v28 = vadd.s32 3, %v10261_v27  ;;  %v10265_v29 = vadd.s32 4294967295, %v10261_v27  ;;  %vm2328_vm5 = vcmp.eq.s32.totalorder %v10261_v27, %v10159_v3  ;;  %v2331_v33 = vadd.s32 2, %v10261_v27  ;;  %s7418_s3 = sshll.u32 %s9759_s16, 4 }
 0x2e3   : > { %7652 = vmatmul.mubr.msk.f32.vlgmr.msra.gmra.mrb[0].mxu0 %vm1729_vm3, %v1646_v26  ;;  %7659 = vmatprep.subr.mxu0 %v9497_v2  ;;  %v5605_v61 = vld [vmem:[%s9723_s19] sm:$0xf] }
 0x2e4   : > { %7647 = vmatmul.mubr.msk.f32.vlgmr.msra.gmra.mrb[2].mxu1 %vm1729_vm3, %v1646_v26  ;;  %7660 = vmatpush3.msk.msra.mxu0 %vm1704_vm12, %v9499_v31  ;;  %v6104_v62 = vld [vmem:[#allocation2] sm:$0x1]  ;;  %v10267_v30 = vadd.s32 4294967295, %v2336_v28  ;;  %vm2325_vm2 = vcmp.eq.s32.totalorder %v10265_v29, %v10159_v3  ;;  %v10296_v40 = vadd.s32 4294967295, %v2331_v33 }
 0x2e5   : > { %7655 = vmatpush3.msk.msra.mxu1 %vm1693_vm13, %v9499_v31  ;;  %7656 = vmatprep.mubr.msk.f32.mxu1 %vm10917_vm0, %v9497_v2 }
 0x2e6   : > { %7661 = vmatprep.mubr.msk.f32.mxu0 %vm10917_vm0, %v9497_v2  ;;  %7664 = vmatprep.subr.mxu1 %v9497_v2  ;;  %vm2338_vm4 = vcmp.eq.s32.totalorder %v10267_v30, %v10159_v3  ;;  %vm2333_vm8 = vcmp.eq.s32.totalorder %v10296_v40, %v10159_v3 }
 0x2e7   : > { %7662 = vmatmul.mubr.msk.f32.vlgmr.msra.gmra.mrb[2].mxu0 %vm1729_vm3, %v1646_v26  ;;  %7669 = vmatprep.subr.mxu0 %v9497_v2 }
 0x2e8   : > { %7657 = vmatmul.mubr.msk.f32.vlgmr.msra.gmra.mrb[4].mxu1 %vm1729_vm3, %v1646_v26  ;;  %7670 = vmatpush3.msk.msra.mxu0 %vm1726_vm14, %v9499_v31  ;;  %vm2749_vm14 = vcmp.ge.s32.totalorder %v10159_v3, 16 }
 0x2e9   : > { %7665 = vmatpush3.msk.msra.mxu1 %vm1715_vm15, %v9499_v31  ;;  %7666 = vmatprep.mubr.msk.f32.mxu1 %vm10917_vm0, %v9497_v2 }
 0x2ea   : > { %7671 = vmatprep.mubr.msk.f32.mxu0 %vm10917_vm0, %v9497_v2  ;;  %3466 = vperm.xlu0 %8665, %v3225_v46  }
 0x2eb   : > { %7672 = vmatmul.mubr.msk.f32.vlgmr.msra.gmra.mrb[4].mxu0 %vm1729_vm3, %v1646_v26  ;;  %3547 = vperm.xlu1 %8666, %v3227_v47  }
 0x2ec   : > { %7667 = vmatmul.mubr.msk.f32.vlgmr.msra.gmra.mrb[6].mxu1 %vm1729_vm3, %v1646_v26  ;;  %v1648_v26 = vld [vmem:[#allocation6 + $0x8] sm:$0xff]  ;;  %7691 = vmatprep.subr.msk.mxu0 %vm2325_vm2, %v9499_v31 }
 0x2ed   : > { %7688 = vmatprep.mubr.msk.f32.mxu1 %vm2233_vm1, %v1647_v38  ;;  %7692 = vmatpush3.msk.msra.mxu0 %vm2325_vm2, %v9499_v31 }
 0x2ee   : > { %3625 = vperm.xlu0 %8665, %v3229_v48   ;;  %7696 = vmatprep.subr.msk.mxu0 %vm2328_vm5, %v9499_v31 }
 0x2ef   : > { %3953 = vperm.xlu1 %8666, %v3703_v49  }
 0x2f2   : > { %4034 = vperm.xlu0 %8665, %v3705_v50  }
 0x2f3   : > { %4112 = vperm.xlu1 %8666, %v3707_v51  }
 0x2f6   : > { %4497 = vperm.xlu0 %8665, %v4190_v52  }
 0x2f7   : > { %4850 = vperm.xlu1 %8666, %v4575_v53  }
 0x2fa   : > { %4935 = vperm.xlu0 %8665, %v4577_v54  }
 0x2fb   : > { %5017 = vperm.xlu1 %8666, %v4579_v55  }
 0x2fe   : > { %5355 = vperm.xlu0 %8665, %v5098_v56   ;;  %v2315_v56 = vld [vmem:[#allocation9] sm:$0xff] }
 0x2ff   : > { %5439 = vperm.xlu1 %8666, %v5100_v57   ;;  %v7198_v57 = vadd.s32 4294967295, %v10159_v3 }
 0x302   : > { %5520 = vperm.xlu0 %8665, %v5102_v58   ;;  %v2738_v58 = vsub.s32 0, %v7198_v57 }
 0x303   : > { %5858 = vperm.xlu1 %8666, %v5601_v59  }
 0x304   : > { %v10333_v59 = vmin.u32 %v7198_v57, %v2738_v58 }
 0x306   : > { %5942 = vperm.xlu0 %8665, %v5603_v60   ;;  %v2741_v60 = vsub.s32 30, %v10333_v59  ;;  %vm2740_vm10 = vcmp.ge.s32.totalorder %v10333_v59, 16  ;;  %v4586_v30 = vsub.s32 62, %v10333_v59 }
 0x307   : > { %6023 = vperm.xlu1 %8666, %v5605_v61   ;;  %v10337_v61 = vadd.s32 8, %v10173_v13 }
 0x30a   : > { %6675 = vperm.xlu0 %8665, %v6104_v62   ;;  %v2742_v62 = vsel %vm2740_vm10, %v2741_v60, %v10333_v59 }
 0x30b   : > { %vm2743_vm11 = vcmp.eq.s32.totalorder %v10173_v13, %v2742_v62  ;;  %vm2744_vm12 = vcmp.eq.s32.totalorder %v10337_v61, %v2742_v62 }
 0x30c   : > { %vm8152_vm13 = vmpackc.low %vm2744_vm12, %vm2743_vm11 }
 0x354   : > { %v2226_v32 = vpop.permute.xlu0 %2225 }
 0x358   : > { %v2231_v34 = vpop.permute.xlu0 %2230 }
 0x3b3   : > { %v1799_v63 = vpop.f32.mrb[0].mxu1 }
 0x3b4   : > { %v7643_v0 = vpop.f32.mrb[1].mxu1 }
 0x3b5   : > { %v2750_v0 = vsub.s32 30, %v10159_v3 }
 0x3b6   : > { %v1939_v1 = vpop.f32.mrb[0].mxu0 }
 0x3b7   : > { %v1869_v4 = vpop.f32.mrb[2].mxu1  ;;  %v7653_v5 = vpop.f32.mrb[1].mxu0 }
 0x3b8   : > { %v8127_v7 = vpack.c.bf16 %v1869_v4, %v1799_v63  ;;  %v7648_v8 = vpop.f32.mrb[3].mxu1  ;;  %v9502_v63 = vmov 1.0|1.0   ;;  %v2751_v4 = vsel %vm2749_vm14, %v2750_v0, %v10159_v3  ;;  %vm2990_vm14 = vcmask 195584   ;;  %v3224_v0 = vld [vmem:[#allocation21] sm:$0xff] }
 0x3ba   : > { %8128 = vmatprep.subr.bf16.mxu1 %v8127_v7  ;;  %v2079_v9 = vpop.f32.mrb[2].mxu0 }
 0x3bb   : > { %v2009_v10 = vpop.f32.mrb[4].mxu1  ;;  %8130 = vmatpush3.bf16.msra.mxu1 %v8127_v7  ;;  %v7663_v11 = vpop.f32.mrb[3].mxu0 }
 0x3bc   : > { %v8131_v12 = vpack.c.bf16 %v2009_v10, %v1939_v1  ;;  %v7658_v16 = vpop.f32.mrb[5].mxu1  ;;  %v10347_v1 = vadd.s32 4294967295, %v10167_v6  ;;  %v2650_v7 = vpop.permute.xlu1 %2649 }
 0x3be   : > { %8132 = vmatprep.subr.bf16.mxu1 %v8131_v12  ;;  %v2219_v17 = vpop.f32.mrb[4].mxu0  ;;  %v2763_v5 = vsub.s32 30, %v10347_v1  ;;  %vm2762_vm15 = vcmp.ge.s32.totalorder %v10347_v1, 16 }
 0x3bf   : > { %v2149_v18 = vpop.f32.mrb[6].mxu1  ;;  %8134 = vmatpush3.bf16.msra.mxu1 %v8131_v12  ;;  %v7673_v19 = vpop.f32.mrb[5].mxu0  ;;  %v3724_v12 = vadd.s32 18, %v10159_v3 }
 0x3c0   : > { %v8135_v22 = vpack.c.bf16 %v2149_v18, %v2079_v9  ;;  %v7668_v25 = vpop.f32.mrb[7].mxu1  ;;  %v2764_v11 = vsel %vm2762_vm15, %v2763_v5, %v10347_v1  ;;  %v2988_v33 = vpop.permute.xlu1 %2987 }
 0x3c1   : > { %vm2765_vm11 = vcmp.eq.s32.totalorder %v10173_v13, %v2764_v11  ;;  %vm2766_vm12 = vcmp.eq.s32.totalorder %v10337_v61, %v2764_v11 }
 0x3c2   : > { %8136 = vmatprep.subr.bf16.mxu1 %v8135_v22 }
 0x3c3   : > { %8138 = vmatpush3.bf16.msra.mxu1 %v8135_v22 }
 0x3c4   : > { %7686 = vmatprep.subr.mxu1 %v2219_v17 }
 0x3c7   : > { %7687 = vmatpush3.msra.mxu1 %v2219_v17 }
 0x3c8   : > { %7689 = vmatmul.mubr.msk.f32.vlgmr.msra.gmra.mrb[8].mxu1 %vm2233_vm1, %v1648_v26  ;;  %7706 = vmatprep.subr.msk.mxu1 %vm2338_vm4, %v9499_v31  ;;  %vm2752_vm1 = vcmp.eq.s32.totalorder %v10173_v13, %v2751_v4 }
 0x3c9   : > { %7707 = vmatpush3.msk.msra.mxu1 %vm2338_vm4, %v9499_v31 }
 0x3ca   : > { %8151 = vmatprep.subr.bf16.mxu1 %v9501_v44 }
 0x49b   : > { %v7690_v35 = vpop.f32.mrb[8].mxu1 }
 0x49c   : > { %v2312_v36 = vadd.f32 %v7690_v35, %v2231_v34  ;;  %v2306_v37 = vpop.f32.mrb[9].mxu1 }
 0x49d   : > { %v2307_v38 = vadd.f32 %v2306_v37, %v2226_v32  ;;  %v2726_v32 = vld [vmem:[#allocation12] sm:$0xff] }
 0x49e   : > { %v2320_v39 = vmul.f32 0.2, %v2312_v36  ;;  %vm2318_vm6 = vcmp.ge.f32.partialorder %v2312_v36, 0.0 }
 0x49f   : > { %vm2317_vm7 = vcmp.ge.f32.partialorder %v2307_v38, 0.0  ;;  %v2319_v41 = vmul.f32 0.2, %v2307_v38 }
 0x4a0   : > { %v2322_v43 = vsel %vm2318_vm6, %v2312_v36, %v2320_v39  ;;  %vm2753_vm6 = vcmp.eq.s32.totalorder %v10337_v61, %v2751_v4 }
 0x4a1   : > { %v2321_v42 = vsel %vm2317_vm7, %v2307_v38, %v2319_v41  ;;  %vm10356_vm10 = vmpackc.low %vm2753_vm6, %vm2752_vm1  ;;  %v2728_v38 = vld [vmem:[#allocation15] sm:$0xff]  ;;  %v2730_v41 = vld [vmem:[#allocation18] sm:$0xff]  ;;  %vm3233_vm1 = vcmp.ge.s32.totalorder %v10177_v15, 16 }
 0x4a2   : > { %7693 = vmatprep.mubr.msk.f32.mxu0 %vm1729_vm3, %v2321_v42  ;;  %7708 = vmatprep.mubr.msk.f32.mxu1 %vm1729_vm3, %v2321_v42 }
 0x4a3   : > { %7694 = vmatmul.mubr.msk.f32.vlgmr.msra.gmra.mrb[6].mxu0 %vm1729_vm3, %v2322_v43  ;;  %7709 = vmatmul.mubr.msk.f32.vlgmr.msra.gmra.mrb[10].mxu1 %vm1729_vm3, %v2322_v43 }
 0x4a4   : > { %7698 = vmatprep.mubr.msk.f32.mxu0 %vm1729_vm3, %v2321_v42  ;;  %7697 = vmatpush3.msk.msra.mxu0 %vm2328_vm5, %v9499_v31 }
 0x4a5   : > { %7701 = vmatprep.subr.msk.mxu0 %vm2333_vm8, %v9499_v31  ;;  %7734 = vmatprep.mubr.msk.f32.mxu1 %vm10917_vm0, %v9497_v2 }
 0x4a6   : > { %8153 = vmatpush3.bf16.msk.msra.mxu1 %vm8152_vm13, %v9502_v63  ;;  %vm8158_vm13 = vmpackc.low %vm2766_vm12, %vm2765_vm11  ;;  %vm3242_vm12 = vcmp.ge.s32.totalorder %v10184_v21, 16 }
 0x4a7   : > { %7699 = vmatmul.mubr.msk.f32.vlgmr.msra.gmra.mrb[8].mxu0 %vm1729_vm3, %v2322_v43  ;;  %8154 = vmatprep.subr.bf16.mxu1 %v9501_v44 }
 0x4a8   : > { %7703 = vmatprep.mubr.msk.f32.mxu0 %vm1729_vm3, %v2321_v42  ;;  %7702 = vmatpush3.msk.msra.mxu0 %vm2333_vm8, %v9499_v31  ;;  %v3234_v42 = vsub.s32 30, %v10177_v15 }
 0x4a9   : > { %8139 = vmatprep.subr.bf16.mxu0 %v9501_v44 }
 0x4ab   : > { %7704 = vmatmul.mubr.msk.f32.vlgmr.msra.gmra.mrb[10].mxu0 %vm1729_vm3, %v2322_v43  ;;  %v3235_v43 = vsel %vm3233_vm1, %v3234_v42, %v10177_v15 }
 0x4ac   : > { %7727 = vmatprep.mubr.msk.f32.mxu0 %vm10917_vm0, %v9497_v2  ;;  %vm3236_vm6 = vcmp.eq.s32.totalorder %v10173_v13, %v3235_v43 }
 0x576   : > { %v7695_v45 = vpop.f32.mrb[6].mxu0  ;;  %v7710_v46 = vpop.f32.mrb[10].mxu1 }
 0x577   : > { %v2413_v47 = vpop.f32.mrb[7].mxu0  ;;  %v2638_v48 = vpop.f32.mrb[11].mxu1 }
 0x578   : > { %v8140_v49 = vpack.c.bf16 %v7695_v45, %v2413_v47  ;;  %v8149_v50 = vpack.c.bf16 %v7710_v46, %v2638_v48  ;;  %v3243_v45 = vsub.s32 30, %v10184_v21  ;;  %v3070_v46 = vpop.permute.xlu0 %3069  ;;  %v3148_v47 = vpop.permute.xlu1 %3147 }
 0x57a   : > { %v7700_v51 = vpop.f32.mrb[8].mxu0  ;;  %8141 = vmatpush3.bf16.msra.mxu0 %v8140_v49  ;;  %v3244_v48 = vsel %vm3242_vm12, %v3243_v45, %v10184_v21  ;;  %v8320_v49 = vadd.f32 %v3148_v47, %v3070_v46 }
 0x57b   : > { %v2488_v52 = vpop.f32.mrb[9].mxu0  ;;  %8142 = vmatprep.subr.bf16.mxu0 %v9501_v44 }
 0x57c   : > { %v8143_v31 = vpack.c.bf16 %v7700_v51, %v2488_v52  ;;  %v3467_v4 = vpop.permute.xlu0 %3466 }
 0x57e   : > { %v7705_v53 = vpop.f32.mrb[10].mxu0  ;;  %8144 = vmatpush3.bf16.msra.mxu0 %v8143_v31 }
 0x57f   : > { %v2563_v54 = vpop.f32.mrb[11].mxu0  ;;  %8145 = vmatprep.subr.bf16.mxu0 %v9501_v44 }
 0x580   : > { %v8146_v55 = vpack.c.bf16 %v7705_v53, %v2563_v54 }
 0x582   : > { %8147 = vmatpush3.bf16.msra.mxu0 %v8146_v55 }
 0x583   : > { %8148 = vmatprep.subr.bf16.mxu0 %v9501_v44 }
 0x586   : > { %8150 = vmatpush3.bf16.msra.mxu0 %v8149_v50 }
 0x587   : > { %7760 = vmatprep.subr.mxu0 %v9497_v2 }
 0x589   : > { %7728 = vmatmul.mubr.msk.f32.vlgmr.msra.gmra.mrb[12].mxu0 %vm2652_vm9, %v2315_v56  ;;  %vm2771_vm9 = vcmask 130048  }
 0x58a   : > { %7762 = vmatprep.mubr.msk.f32.mxu0 %vm10917_vm0, %v9497_v2 }
 0x65c   : > { %v2722_v8 = vpop.f32.mrb[12].mxu0 }
 0x65d   : > { %v2723_v9 = vadd.f32 %v2722_v8, %v2650_v7  ;;  %v7729_v10 = vpop.f32.mrb[13].mxu0 }
 0x65e   : > { %v3226_v10 = vld [vmem:[#allocation24] sm:$0xff] }
 0x65f   : > { %v2733_v6 = vmul.f32 0.2, %v2723_v9  ;;  %vm2732_vm7 = vcmp.ge.f32.partialorder %v2723_v9, 0.0 }
 0x661   : > { %v2734_v16 = vsel %vm2732_vm7, %v2723_v9, %v2733_v6  ;;  %vm3237_vm7 = vcmp.eq.s32.totalorder %v10337_v61, %v3235_v43  ;;  %v3228_v6 = vld [vmem:[#allocation27] sm:$0xff] }
 0x662   : > { %7735 = vmatmul.mubr.msk.f32.vlgmr.msra.gmra.mrb[12].mxu1 %vm2771_vm9, %v2734_v16  ;;  %vm8164_vm11 = vmpackc.low %vm3237_vm7, %vm3236_vm6 }
 0x663   : > { %8156 = vmatpush3.bf16.msk.msra.mxu1 %vm10356_vm10, %v9502_v63  ;;  %7741 = vmatprep.mubr.msk.f32.mxu1 %vm10917_vm0, %v9497_v2 }
 0x664   : > { %8157 = vmatprep.subr.bf16.mxu1 %v9501_v44 }
 0x666   : > { %7742 = vmatmul.mubr.msk.f32.vlgmr.msra.gmra.mrb[14].mxu1 %vm2771_vm9, %v2734_v16 }
 0x667   : > { %8159 = vmatpush3.bf16.msk.msra.mxu1 %vm8158_vm13, %v9502_v63  ;;  %7748 = vmatprep.mubr.msk.f32.mxu1 %vm10917_vm0, %v9497_v2  ;;  %vm3245_vm13 = vcmp.eq.s32.totalorder %v10173_v13, %v3244_v48 }
 0x668   : > { %8160 = vmatprep.subr.bf16.mxu1 %v9501_v44 }
 0x66a   : > { %7749 = vmatmul.mubr.msk.f32.vlgmr.msra.gmra.mrb[16].mxu1 %vm2771_vm9, %v2734_v16  ;;  %v7235_v16 = vadd.s32 4294967287, %v10159_v3 }
 0x66b   : > { %7757 = vmatprep.mubr.msk.f32.mxu1 %vm10917_vm0, %v9497_v2 }
 0x735   : > { %v2841_v17 = vpop.f32.mrb[12].mxu1 }
 0x736   : > { %v7736_v18 = vpop.f32.mrb[13].mxu1 }
 0x739   : > { %v2911_v19 = vpop.f32.mrb[14].mxu1 }
 0x73a   : > { %v8161_v22 = vpack.c.bf16 %v2911_v19, %v2841_v17  ;;  %v7743_v25 = vpop.f32.mrb[15].mxu1  ;;  %v3713_v17 = vsub.s32 0, %v7235_v16 }
 0x73b   : > { %v10445_v25 = vadd.s32 4294967287, %v3724_v12 }
 0x73c   : > { %8162 = vmatpush3.bf16.msra.mxu1 %v8161_v22  ;;  %v10435_v18 = vmin.u32 %v7235_v16, %v3713_v17 }
 0x73d   : > { %v2981_v26 = vpop.f32.mrb[16].mxu1  ;;  %7755 = vmatprep.subr.mxu1 %v9497_v2 }
 0x73e   : > { %v7750_v28 = vpop.f32.mrb[17].mxu1  ;;  %v3716_v19 = vsub.s32 30, %v10435_v18 }
 0x73f   : > { %v3548_v28 = vpop.permute.xlu1 %3547 }
 0x740   : > { %7756 = vmatpush3.msra.mxu1 %v2981_v26  ;;  %v3730_v26 = vsub.s32 30, %v10445_v25 }
 0x741   : > { %7758 = vmatmul.mubr.msk.f32.vlgmr.msra.gmra.mrb[18].mxu1 %vm2990_vm14, %v2726_v32  ;;  %8163 = vmatprep.subr.bf16.mxu1 %v9501_v44  ;;  %v3626_v32 = vpop.permute.xlu0 %3625 }
 0x742   : > { %7774 = vmatprep.mubr.msk.f32.mxu1 %vm10917_vm0, %v9497_v2  ;;  %8165 = vmatpush3.bf16.msk.msra.mxu1 %vm8164_vm11, %v9502_v63  ;;  %vm3715_vm11 = vcmp.ge.s32.totalorder %v10435_v18, 16 }
 0x743   : > { %8169 = vmatprep.subr.bf16.mxu1 %v9501_v44  ;;  %v3717_v22 = vsel %vm3715_vm11, %v3716_v19, %v10435_v18 }
 0x744   : > { %vm3718_vm12 = vcmp.eq.s32.totalorder %v10173_v13, %v3717_v22 }
 0x814   : > { %v3060_v34 = vpop.f32.mrb[18].mxu1 }
 0x815   : > { %v3061_v35 = vadd.f32 %v3060_v34, %v2988_v33  ;;  %v7759_v36 = vpop.f32.mrb[19].mxu1  ;;  %v8322_v34 = vadd.f32 %v3626_v32, %v3548_v28 }
 0x817   : > { %vm3064_vm15 = vcmp.ge.f32.partialorder %v3061_v35, 0.0  ;;  %v3065_v37 = vmul.f32 0.2, %v3061_v35 }
 0x819   : > { %v3066_v39 = vsel %vm3064_vm15, %v3061_v35, %v3065_v37  ;;  %vm3246_vm15 = vcmp.eq.s32.totalorder %v10337_v61, %v3244_v48 }
 0x81a   : > { %7761 = vmatpush3.msra.mxu0 %v3066_v39  ;;  %vm8170_vm6 = vmpackc.low %vm3246_vm15, %vm3245_vm13  ;;  %vm3729_vm15 = vcmp.ge.s32.totalorder %v10445_v25, 16 }
 0x81b   : > { %7763 = vmatmul.mubr.msk.f32.vlgmr.msra.gmra.mrb[14].mxu0 %vm1729_vm3, %v2728_v38  ;;  %7765 = vmatprep.subr.mxu0 %v9497_v2  ;;  %v3731_v33 = vsel %vm3729_vm15, %v3730_v26, %v10445_v25 }
 0x81c   : > { %7766 = vmatpush3.msra.mxu0 %v2723_v9  ;;  %7767 = vmatprep.mubr.msk.f32.mxu0 %vm10917_vm0, %v9497_v2 }
 0x81d   : > { %8166 = vmatprep.subr.bf16.mxu0 %v9501_v44 }
 0x823   : > { %7768 = vmatmul.mubr.msk.f32.vlgmr.msra.gmra.mrb[14].mxu0 %vm1729_vm3, %v2730_v41 }
 0x824   : > { %8168 = vmatpush3.bf16.msk.msra.mxu0 %vm10356_vm10, %v9502_v63  ;;  %7781 = vmatprep.mubr.msk.f32.mxu0 %vm10917_vm0, %v9497_v2 }
 0x825   : > { %8172 = vmatprep.subr.bf16.mxu0 %v9501_v44 }
 0x8f6   : > { %v3219_v50 = vpop.f32.mrb[14].mxu0 }
 0x8f7   : > { %v8321_v51 = vadd.f32 %v8320_v49, %v3219_v50  ;;  %v7769_v52 = vpop.f32.mrb[15].mxu0  ;;  %v3702_v49 = vld [vmem:[%s11021_s14] sm:$0xff]  ;;  %v3954_v50 = vpop.permute.xlu1 %3953  ;;  %s1645_s14 = scalar_lea.vmem [#allocation39], %s10102_s22 }
 0x8f9   : > { %v3231_v31 = vmul.f32 0.2, %v8321_v51  ;;  %vm3230_vm1 = vcmp.ge.f32.partialorder %v8321_v51, 0.0 }
 0x8fb   : > { %v3232_v53 = vsel %vm3230_vm1, %v8321_v51, %v3231_v31  ;;  %vm3732_vm1 = vcmp.eq.s32.totalorder %v10173_v13, %v3731_v33 }
 0x8fc   : > { %7775 = vmatmul.mubr.msk.f32.vlgmr.msra.gmra.mrb[20].mxu1 %vm2771_vm9, %v3232_v53  ;;  %7782 = vmatmul.mubr.msk.f32.vlgmr.msra.gmra.mrb[16].mxu0 %vm2771_vm9, %v3232_v53 }
 0x8fd   : > { %8171 = vmatpush3.bf16.msk.msra.mxu1 %vm8170_vm6, %v9502_v63  ;;  %7788 = vmatprep.mubr.msk.f32.mxu1 %vm10917_vm0, %v9497_v2  ;;  %vm3733_vm6 = vcmp.eq.s32.totalorder %v10337_v61, %v3731_v33 }
 0x8fe   : > { %7797 = vmatprep.mubr.msk.f32.mxu0 %vm10917_vm0, %v9497_v2  ;;  %7800 = vmatprep.subr.mxu1 %v9497_v2  ;;  %vm8182_vm11 = vmpackc.low %vm3733_vm6, %vm3732_vm1 }
 0x900   : > { %7789 = vmatmul.mubr.msk.f32.vlgmr.msra.gmra.mrb[22].mxu1 %vm2771_vm9, %v3232_v53 }
 0x901   : > { %7802 = vmatprep.mubr.msk.f32.mxu1 %vm10917_vm0, %v9497_v2 }
 0x9cf   : > { %v3320_v54 = vpop.f32.mrb[20].mxu1  ;;  %v3390_v55 = vpop.f32.mrb[16].mxu0 }
 0x9d0   : > { %v8173_v56 = vpack.c.bf16 %v3390_v55, %v3320_v54  ;;  %v7776_v57 = vpop.f32.mrb[21].mxu1  ;;  %v7783_v58 = vpop.f32.mrb[17].mxu0  ;;  %v3704_v54 = vld [vmem:[%s11022_s17] sm:$0xff]  ;;  %s6775_s17 = sshll.u32 %s1645_s14, 4  ;;  %s10844_s17 = int_to_ptr.vmem [resolvable:$true] %s6775_s17 }
 0x9d1   : > { %v4194_v57 = vmul.u32 2, %v10337_v61 }
 0x9d2   : > { %8174 = vmatpush3.bf16.msra.mxu0 %v8173_v56  ;;  %v3706_v56 = vld [vmem:[%s11023_s21] sm:$0xff]  ;;  %s10842_s21 = scalar_lea.hbm %s11056_s13, %s7418_s3 }
 0x9d3   : > { %v3460_v60 = vpop.f32.mrb[22].mxu1  ;;  %7795 = vmatprep.subr.mxu0 %v9497_v2  ;;  %v7254_v58 = vadd.s32 4294967295, %v4194_v57 }
 0x9d4   : > { %v7790_v62 = vpop.f32.mrb[23].mxu1 }
 0x9d5   : > { %v4207_v62 = vadd.s32 3, %v4194_v57 }
 0x9d6   : > { %7796 = vmatpush3.msra.mxu0 %v3460_v60  ;;  %v4202_v60 = vadd.s32 2, %v4194_v57 }
 0x9d7   : > { %7798 = vmatmul.mubr.msk.f32.vlgmr.msra.gmra.mrb[18].mxu0 %vm2990_vm14, %v3224_v0  ;;  %8175 = vmatprep.subr.bf16.mxu0 %v9501_v44 }
 0x9d8   : > { %7814 = vmatprep.mubr.msk.f32.mxu0 %vm10917_vm0, %v9497_v2  ;;  %v7257_v0 = vadd.s32 4294967295, %v4202_v60 }
 0xaaa   : > { %v3538_v5 = vpop.f32.mrb[18].mxu0 }
 0xaab   : > { %v3539_v7 = vadd.f32 %v3538_v5, %v3467_v4  ;;  %v7799_v8 = vpop.f32.mrb[19].mxu0  ;;  %v7259_v4 = vadd.s32 4294967295, %v4207_v62  ;;  %v4035_v5 = vpop.permute.xlu0 %4034  ;;  %v6109_v62 = vsub.s32 62, %v10188_v23 }
 0xaad   : > { %vm3542_vm7 = vcmp.ge.f32.partialorder %v3539_v7, 0.0  ;;  %v3543_v9 = vmul.f32 0.2, %v3539_v7 }
 0xaaf   : > { %v3544_v11 = vsel %vm3542_vm7, %v3539_v7, %v3543_v9  ;;  %v4113_v7 = vpop.permute.xlu1 %4112 }
 0xab0   : > { %7801 = vmatpush3.msra.mxu1 %v3544_v11  ;;  %v8324_v29 = vadd.f32 %v4113_v7, %v4035_v5 }
 0xab1   : > { %7803 = vmatmul.mubr.msk.f32.vlgmr.msra.gmra.mrb[24].mxu1 %vm1729_vm3, %v3226_v10  ;;  %7805 = vmatprep.subr.mxu1 %v9497_v2 }
 0xab2   : > { %7806 = vmatpush3.msra.mxu1 %v8321_v51  ;;  %7807 = vmatprep.mubr.msk.f32.mxu1 %vm10917_vm0, %v9497_v2 }
 0xab3   : > { %8178 = vmatprep.subr.bf16.mxu1 %v9501_v44 }
 0xab9   : > { %7808 = vmatmul.mubr.msk.f32.vlgmr.msra.gmra.mrb[24].mxu1 %vm1729_vm3, %v3228_v6  ;;  %v4601_v6 = vsub.s32 62, %v10159_v3 }
 0xaba   : > { %8180 = vmatpush3.bf16.msk.msra.mxu1 %vm10356_vm10, %v9502_v63  ;;  %7821 = vmatprep.mubr.msk.f32.mxu1 %vm10917_vm0, %v9497_v2  ;;  %vm3719_vm10 = vcmp.eq.s32.totalorder %v10337_v61, %v3717_v22 }
 0xabb   : > { %8184 = vmatprep.subr.bf16.mxu1 %v9501_v44  ;;  %vm8176_vm13 = vmpackc.low %vm3719_vm10, %vm3718_vm12  ;;  %vm4199_vm10 = vcmp.eq.s32.totalorder %v4194_v57, %v10159_v3  ;;  %v4574_v57 = vld [vmem:[#allocation32] sm:$0xf] }
 0xabc   : > { %8177 = vmatpush3.bf16.msk.msra.mxu0 %vm8176_vm13, %v9502_v63 }
 0xabd   : > { %8181 = vmatprep.subr.bf16.mxu0 %v9501_v44 }
 0xb8c   : > { %v3697_v35 = vpop.f32.mrb[24].mxu1 }
 0xb8d   : > { %v8323_v36 = vadd.f32 %v8322_v34, %v3697_v35  ;;  %v7809_v37 = vpop.f32.mrb[25].mxu1  ;;  %v4189_v35 = vld [vmem:[#allocation29] sm:$0xf] }
 0xb8e   : > { %v10545_v37 = vadd.s32 24, %v10173_v13 }
 0xb8f   : > { %v3709_v38 = vmul.f32 0.2, %v8323_v36  ;;  %vm3708_vm7 = vcmp.ge.f32.partialorder %v8323_v36, 0.0 }
 0xb91   : > { %v3710_v39 = vsel %vm3708_vm7, %v8323_v36, %v3709_v38 }
 0xb92   : > { %7815 = vmatmul.mubr.msk.f32.vlgmr.msra.gmra.mrb[20].mxu0 %vm2771_vm9, %v3710_v39  ;;  %7822 = vmatmul.mubr.msk.f32.vlgmr.msra.gmra.mrb[26].mxu1 %vm2771_vm9, %v3710_v39 }
 0xb93   : > { %8183 = vmatpush3.bf16.msk.msra.mxu0 %vm8182_vm11, %v9502_v63  ;;  %7828 = vmatprep.mubr.msk.f32.mxu0 %vm10917_vm0, %v9497_v2 }
 0xb94   : > { %7837 = vmatprep.mubr.msk.f32.mxu1 %vm10917_vm0, %v9497_v2  ;;  %7840 = vmatprep.subr.mxu0 %v9497_v2 }
 0xb96   : > { %7829 = vmatmul.mubr.msk.f32.vlgmr.msra.gmra.mrb[22].mxu0 %vm2771_vm9, %v3710_v39  ;;  %v4616_v39 = vsub.s32 62, %v10347_v1 }
 0xb97   : > { %7842 = vmatprep.mubr.msk.f32.mxu0 %vm10917_vm0, %v9497_v2 }
 0xc65   : > { %v3807_v41 = vpop.f32.mrb[20].mxu0  ;;  %v3877_v42 = vpop.f32.mrb[26].mxu1 }
 0xc66   : > { %v8185_v43 = vpack.c.bf16 %v3877_v42, %v3807_v41  ;;  %v7816_v45 = vpop.f32.mrb[21].mxu0  ;;  %v7823_v46 = vpop.f32.mrb[27].mxu1 }
 0xc67   : > { %v4498_v42 = vpop.permute.xlu0 %4497 }
 0xc68   : > { %8186 = vmatpush3.bf16.msra.mxu1 %v8185_v43 }
 0xc69   : > { %v3947_v47 = vpop.f32.mrb[22].mxu0  ;;  %7835 = vmatprep.subr.mxu1 %v9497_v2 }
 0xc6a   : > { %v7830_v48 = vpop.f32.mrb[23].mxu0 }
 0xc6c   : > { %7836 = vmatpush3.msra.mxu1 %v3947_v47 }
 0xc6d   : > { %7838 = vmatmul.mubr.msk.f32.vlgmr.msra.gmra.mrb[28].mxu1 %vm2990_vm14, %v3702_v49  ;;  %8187 = vmatprep.subr.bf16.mxu1 %v9501_v44  ;;  %vm4196_vm14 = vcmp.eq.s32.totalorder %v7254_v58, %v10159_v3  ;;  %v5107_v58 = vsub.s32 62, %v10177_v15 }
 0xc6e   : > { %7854 = vmatprep.mubr.msk.f32.mxu1 %vm10917_vm0, %v9497_v2  ;;  %vm8188_vm13 = vmpackc.low %vm4196_vm14, %vm2325_vm2  ;;  %vm4204_vm2 = vcmp.eq.s32.totalorder %v7257_v0, %v10159_v3  ;;  %v4851_v0 = vpop.permute.xlu1 %4850 }
 0xc6f   : > { %8189 = vmatpush3.bf16.msk.msra.mxu1 %vm8188_vm13, %v9502_v63  ;;  %vm8194_vm1 = vmpackc.low %vm4204_vm2, %vm2333_vm8 }
 0xc70   : > { %8193 = vmatprep.subr.bf16.mxu1 %v9501_v44 }
 0xd40   : > { %v4025_v51 = vpop.f32.mrb[28].mxu1 }
 0xd41   : > { %v4026_v52 = vadd.f32 %v4025_v51, %v3954_v50  ;;  %v7839_v31 = vpop.f32.mrb[29].mxu1 }
 0xd43   : > { %vm4029_vm12 = vcmp.ge.f32.partialorder %v4026_v52, 0.0  ;;  %v4030_v53 = vmul.f32 0.2, %v4026_v52 }
 0xd45   : > { %v4031_v55 = vsel %vm4029_vm12, %v4026_v52, %v4030_v53 }
 0xd46   : > { %7841 = vmatpush3.msra.mxu0 %v4031_v55 }
 0xd47   : > { %7843 = vmatmul.mubr.msk.f32.vlgmr.msra.gmra.mrb[24].mxu0 %vm1729_vm3, %v3704_v54  ;;  %7845 = vmatprep.subr.mxu0 %v9497_v2 }
 0xd48   : > { %7846 = vmatpush3.msra.mxu0 %v8323_v36  ;;  %7847 = vmatprep.mubr.msk.f32.mxu0 %vm10917_vm0, %v9497_v2 }
 0xd49   : > { %8190 = vmatprep.subr.bf16.mxu0 %v9501_v44 }
 0xd4f   : > { %7848 = vmatmul.mubr.msk.f32.vlgmr.msra.gmra.mrb[24].mxu0 %vm1729_vm3, %v3706_v56  ;;  %vm8191_vm3 = vmpackc.low %vm4199_vm10, %vm2328_vm5  ;;  %vm4209_vm5 = vcmp.eq.s32.totalorder %v7259_v4, %v10159_v3  ;;  %vm4500_vm10 = vcmask 261120  }
 0xd50   : > { %7861 = vmatprep.mubr.msk.f32.mxu0 %vm10917_vm0, %v9497_v2  ;;  %8192 = vmatpush3.bf16.msk.msra.mxu0 %vm8191_vm3, %v9502_v63  ;;  %vm8197_vm6 = vmpackc.low %vm4209_vm5, %vm2338_vm4  ;;  %vm4585_vm4 = vcmp.ge.s32.totalorder %v10333_v59, 32 }
 0xd51   : > { %8196 = vmatprep.subr.bf16.mxu0 %v9501_v44  ;;  %v4587_v40 = vsel %vm4585_vm4, %v4586_v30, %v10333_v59  ;;  %vm4615_vm4 = vcmp.ge.s32.totalorder %v10347_v1, 32  ;;  %v5018_v30 = vpop.permute.xlu1 %5017 }
 0xd52   : > { %vm4588_vm8 = vcmp.eq.s32.totalorder %v10173_v13, %v4587_v40  ;;  %vm4589_vm7 = vcmp.eq.s32.totalorder %v10337_v61, %v4587_v40  ;;  %vm4591_vm2 = vcmp.eq.s32.totalorder %v10545_v37, %v4587_v40  ;;  %v4617_v41 = vsel %vm4615_vm4, %v4616_v39, %v10347_v1 }
 0xd53   : > { %vm8206_vm11 = vmpackc.low %vm4589_vm7, %vm4588_vm8  ;;  %vm4618_vm8 = vcmp.eq.s32.totalorder %v10173_v13, %v4617_v41  ;;  %vm4619_vm7 = vcmp.eq.s32.totalorder %v10337_v61, %v4617_v41  ;;  %vm5106_vm4 = vcmp.ge.s32.totalorder %v10177_v15, 32 }
 0xd54   : > { %v5108_v60 = vsel %vm5106_vm4, %v5107_v58, %v10177_v15  ;;  %vm5121_vm4 = vcmp.ge.s32.totalorder %v10184_v21, 32 }
 0xe22   : > { %v4184_v8 = vpop.f32.mrb[24].mxu0 }
 0xe23   : > { %v8325_v9 = vadd.f32 %v8324_v29, %v4184_v8  ;;  %v7849_v10 = vpop.f32.mrb[25].mxu0  ;;  %v4576_v29 = vld [vmem:[#allocation35] sm:$0xf] }
 0xe25   : > { %vm4191_vm15 = vcmp.ge.f32.partialorder %v8325_v9, 0.0  ;;  %v4192_v27 = vmul.f32 0.2, %v8325_v9 }
 0xe27   : > { %v4193_v11 = vsel %vm4191_vm15, %v8325_v9, %v4192_v27  ;;  %v4578_v9 = vld [vmem:[#allocation38] sm:$0xf]  ;;  %v5122_v27 = vsub.s32 62, %v10184_v21 }
 0xe28   : > { %7855 = vmatmul.mubr.msk.f32.vlgmr.msra.gmra.mrb[30].mxu1 %vm2771_vm9, %v4193_v11  ;;  %7862 = vmatmul.mubr.msk.f32.vlgmr.msra.gmra.mrb[26].mxu0 %vm2771_vm9, %v4193_v11 }
 0xe29   : > { %8195 = vmatpush3.bf16.msk.msra.mxu1 %vm8194_vm1, %v9502_v63  ;;  %8198 = vmatpush3.bf16.msk.msra.mxu0 %vm8197_vm6, %v9502_v63 }
 0xe2a   : > { %7868 = vmatprep.mubr.msk.f32.mxu1 %vm10917_vm0, %v9497_v2  ;;  %7875 = vmatprep.mubr.msk.f32.mxu0 %vm10917_vm0, %v9497_v2 }
 0xe2b   : > { %8199 = vmatprep.subr.bf16.mxu1 %v9501_v44  ;;  %8205 = vmatprep.subr.bf16.mxu0 %v9501_v44 }
 0xe2c   : > { %7869 = vmatmul.mubr.msk.f32.vlgmr.msra.gmra.mrb[32].mxu1 %vm2771_vm9, %v4193_v11  ;;  %7876 = vmatmul.mubr.msk.f32.vlgmr.msra.gmra.mrb[28].mxu0 %vm2771_vm9, %v4193_v11  ;;  %vm4600_vm9 = vcmp.ge.s32.totalorder %v10159_v3, 32  ;;  %v4936_v11 = vpop.permute.xlu0 %4935 }
 0xe2d   : > { %7886 = vmatprep.mubr.msk.f32.mxu1 %vm10917_vm0, %v9497_v2  ;;  %7897 = vmatprep.mubr.msk.f32.mxu0 %vm10917_vm0, %v9497_v2  ;;  %v4602_v59 = vsel %vm4600_vm9, %v4601_v6, %v10159_v3  ;;  %v10542_v3 = vadd.s32 16, %v10173_v13  ;;  %vm8218_vm9 = vmpackc.low %vm4619_vm7, %vm4618_vm8  ;;  %vm5109_vm8 = vcmp.eq.s32.totalorder %v10173_v13, %v5108_v60  ;;  %vm5110_vm7 = vcmp.eq.s32.totalorder %v10337_v61, %v5108_v60 }
 0xe2e   : > { %8207 = vmatpush3.bf16.msk.msra.mxu0 %vm8206_vm11, %v9502_v63  ;;  %vm4603_vm12 = vcmp.eq.s32.totalorder %v10173_v13, %v4602_v59  ;;  %vm4604_vm14 = vcmp.eq.s32.totalorder %v10337_v61, %v4602_v59  ;;  %vm4606_vm1 = vcmp.eq.s32.totalorder %v10545_v37, %v4602_v59  ;;  %v8326_v6 = vadd.f32 %v5018_v30, %v4936_v11 }
 0xe2f   : > { %8208 = vmatprep.subr.bf16.mxu0 %v9501_v44  ;;  %vm10530_vm13 = vmpackc.low %vm4604_vm14, %vm4603_vm12  ;;  %vm4590_vm3 = vcmp.eq.s32.totalorder %v10542_v3, %v4587_v40  ;;  %vm4605_vm15 = vcmp.eq.s32.totalorder %v10542_v3, %v4602_v59  ;;  %vm4620_vm12 = vcmp.eq.s32.totalorder %v10542_v3, %v4617_v41  ;;  %vm4621_vm14 = vcmp.eq.s32.totalorder %v10545_v37, %v4617_v41 }
 0xe30   : > { %vm8209_vm5 = vmpackc.low %vm4591_vm2, %vm4590_vm3  ;;  %vm10916_vm2 = vcmask 1043456   ;;  %v5123_v40 = vsel %vm5121_vm4, %v5122_v27, %v10184_v21 }
 0xe31   : > { %vm10552_vm6 = vmpackc.low %vm4606_vm1, %vm4605_vm15  ;;  %vm10915_vm1 = vcmask 97280  }
 0xe32   : > { %8210 = vmatpush3.bf16.msk.msra.mxu0 %vm8209_vm5, %v9502_v63  ;;  %vm8221_vm3 = vmpackc.low %vm4621_vm14, %vm4620_vm12  ;;  %vm9503_vm5 = vmmov 1   ;;  %vm10914_vm12 = vcmask 31744   ;;  %vm5111_vm14 = vcmp.eq.s32.totalorder %v10542_v3, %v5108_v60 }
 0xe33   : > { %8217 = vmatprep.subr.bf16.mxu0 %v9501_v44  ;;  %vm10583_vm15 = vmpackc.low %vm10916_vm2, %vm9503_vm5 }
 0xefb   : > { %v4281_v16 = vpop.f32.mrb[30].mxu1  ;;  %v4351_v17 = vpop.f32.mrb[26].mxu0 }
 0xefc   : > { %v8200_v19 = vpack.c.bf16 %v4351_v17, %v4281_v16  ;;  %v7856_v22 = vpop.f32.mrb[31].mxu1  ;;  %v7863_v12 = vpop.f32.mrb[27].mxu0 }
 0xefe   : > { %8201 = vmatpush3.bf16.msra.mxu1 %v8200_v19 }
 0xeff   : > { %v4421_v26 = vpop.f32.mrb[32].mxu1  ;;  %v4491_v28 = vpop.f32.mrb[28].mxu0  ;;  %8202 = vmatprep.subr.bf16.mxu1 %v9501_v44 }
 0xf00   : > { %v8203_v32 = vpack.c.bf16 %v4491_v28, %v4421_v26  ;;  %v7870_v33 = vpop.f32.mrb[33].mxu1  ;;  %v7877_v34 = vpop.f32.mrb[29].mxu0 }
 0xf02   : > { %8204 = vmatpush3.bf16.msra.mxu1 %v8203_v32 }
 0xf03   : > { %8211 = vmatprep.subr.bf16.mxu1 %v9501_v44 }
 0xf05   : > { %7887 = vmatmul.mubr.msk.f32.vlgmr.msra.gmra.mrb[34].mxu1 %vm4500_vm10, %v4189_v35 }
 0xf06   : > { %8213 = vmatpush3.bf16.msk.msra.mxu1 %vm10530_vm13, %v9502_v63  ;;  %7908 = vmatprep.mubr.msk.f32.mxu1 %vm10917_vm0, %v9497_v2 }
 0xf07   : > { %8214 = vmatprep.subr.bf16.mxu1 %v9501_v44 }
 0xf0a   : > { %8216 = vmatpush3.bf16.msk.msra.mxu1 %vm10552_vm6, %v9502_v63 }
 0xf0b   : > { %8223 = vmatprep.subr.bf16.mxu1 %v9501_v44 }
 0xfd8   : > { %v4570_v43 = vpop.f32.mrb[34].mxu1 }
 0xfd9   : > { %v4571_v45 = vadd.f32 %v4570_v43, %v4498_v42  ;;  %v7888_v46 = vpop.f32.mrb[35].mxu1  ;;  %v5097_v43 = vld [vmem:[%s11038_s20] sm:$0xf]  ;;  %s6763_s20 = scalar_lea.sflag [#allocation5], %s10102_s22 }
 0xfdb   : > { %v4581_v47 = vmul.f32 0.2, %v4571_v45  ;;  %vm4580_vm11 = vcmp.ge.f32.partialorder %v4571_v45, 0.0 }
 0xfdd   : > { %v4582_v48 = vsel %vm4580_vm11, %v4571_v45, %v4581_v47  ;;  %vm10598_vm11 = vmpackc.low %vm5110_vm7, %vm5109_vm8  ;;  %vm5124_vm8 = vcmp.eq.s32.totalorder %v10173_v13, %v5123_v40  ;;  %vm5125_vm7 = vcmp.eq.s32.totalorder %v10337_v61, %v5123_v40  ;;  %v5356_v47 = vpop.permute.xlu0 %5355 }
 0xfde   : > { %7898 = vmatmul.mubr.msk.f32.vlgmr.msra.gmra.mrb[30].mxu0 %vm4500_vm10, %v4582_v48  ;;  %7909 = vmatmul.mubr.msk.f32.vlgmr.msra.gmra.mrb[36].mxu1 %vm4500_vm10, %v4582_v48 }
 0xfdf   : > { %8219 = vmatpush3.bf16.msk.msra.mxu0 %vm8218_vm9, %v9502_v63  ;;  %7919 = vmatprep.mubr.msk.f32.mxu0 %vm10917_vm0, %v9497_v2 }
 0xfe0   : > { %8220 = vmatprep.subr.bf16.mxu0 %v9501_v44  ;;  %7926 = vmatprep.mubr.msk.f32.mxu1 %vm10917_vm0, %v9497_v2 }
 0xfe3   : > { %8222 = vmatpush3.bf16.msk.msra.mxu0 %vm8221_vm3, %v9502_v63  ;;  %vm5112_vm3 = vcmp.eq.s32.totalorder %v10545_v37, %v5108_v60 }
 0xfe4   : > { %7929 = vmatprep.subr.mxu0 %v9497_v2  ;;  %vm10626_vm5 = vmpackc.low %vm5112_vm3, %vm5111_vm14  ;;  %vm5126_vm3 = vcmp.eq.s32.totalorder %v10542_v3, %v5123_v40 }
 0xfe5   : > { %vm10639_vm14 = vmpackc.low %vm5125_vm7, %vm5124_vm8 }
 0xfe6   : > { %7920 = vmatmul.mubr.msk.f32.vlgmr.msra.gmra.mrb[32].mxu0 %vm4500_vm10, %v4582_v48 }
 0xfe7   : > { %7931 = vmatprep.mubr.msk.f32.mxu0 %vm10917_vm0, %v9497_v2 }
0x10b1   : > { %v4699_v1 = vpop.f32.mrb[30].mxu0  ;;  %v4769_v49 = vpop.f32.mrb[36].mxu1 }
0x10b2   : > { %v4844_v50 = vrot.slane %v4769_v49, 4  ;;  %v7899_v51 = vpop.f32.mrb[31].mxu0  ;;  %v7910_v52 = vpop.f32.mrb[37].mxu1 }
0x10b3   : > { %v5099_v51 = vld [vmem:[%s11039_s18] sm:$0xf]  ;;  %s9315_s18 = scalar_lea.vmem %s10844_s17, 16 }
0x10b4   : > { %v4847_v31 = vsel %vm10916_vm2, %v4699_v1, %v4844_v50  ;;  %p9316_p5 = scmp.ne.s32.totalorder %s10844_s17, %s9315_s18 }
0x10b6   : > { %p9317_p1 = pnand %p9316_p5, %p11057_p7 }
0x10b8   : > { %p9318_p9 = pneg %p9317_p1 }
0x10b9   : > { %v4839_v53 = vpop.f32.mrb[32].mxu0 }
0x10ba   : > { %v8224_v55 = vpack.c.bf16 %v4839_v53, %v4847_v31  ;;  %v7921_v56 = vpop.f32.mrb[33].mxu0  ;;  %v5625_v31 = vsub.s32 62, %v10445_v25  ;;  %v5440_v53 = vpop.permute.xlu1 %5439 }
0x10bc   : > { %8226 = vmatpush3.bf16.msk.msra.mxu1 %vm10583_vm15, %v8224_v55  ;;  %v5521_v55 = vpop.permute.xlu0 %5520 }
0x10bd   : > { %8227 = vmatprep.subr.bf16.mxu1 %v9501_v44 }
0x10bf   : > { %7927 = vmatmul.mubr.msk.f32.vlgmr.msra.gmra.mrb[38].mxu1 %vm10915_vm1, %v4574_v57  ;;  %v8328_v57 = vadd.f32 %v5521_v55, %v5440_v53 }
0x10c0   : > { %7947 = vmatprep.mubr.msk.f32.mxu1 %vm10917_vm0, %v9497_v2  ;;  %8229 = vmatpush3.bf16.msk.msra.mxu1 %vm10598_vm11, %v9502_v63 }
0x10c1   : > { %8230 = vmatprep.subr.bf16.mxu1 %v9501_v44 }
0x10c4   : > { %8232 = vmatpush3.bf16.msk.msra.mxu1 %vm10626_vm5, %v9502_v63 }
0x10c5   : > { %8239 = vmatprep.subr.bf16.mxu1 %v9501_v44 }
0x1192   : > { %v4926_v4 = vpop.f32.mrb[38].mxu1 }
0x1193   : > { %v4927_v5 = vadd.f32 %v4926_v4, %v4851_v0  ;;  %v7928_v7 = vpop.f32.mrb[39].mxu1 }
0x1195   : > { %vm4930_vm9 = vcmp.ge.f32.partialorder %v4927_v5, 0.0  ;;  %v4931_v15 = vmul.f32 0.2, %v4927_v5 }
0x1197   : > { %v4932_v8 = vsel %vm4930_vm9, %v4927_v5, %v4931_v15 }
0x1198   : > { %7930 = vmatpush3.msk.msra.mxu0 %vm10916_vm2, %v4932_v8 }
0x1199   : > { %7932 = vmatmul.mubr.msk.f32.vlgmr.msra.gmra.mrb[34].mxu0 %vm10914_vm12, %v4576_v29  ;;  %7934 = vmatprep.subr.mxu0 %v9497_v2 }
0x119a   : > { %7935 = vmatpush3.msk.msra.mxu0 %vm10916_vm2, %v4571_v45  ;;  %7936 = vmatprep.mubr.msk.f32.mxu0 %vm10917_vm0, %v9497_v2  ;;  %v5610_v45 = vsub.s32 62, %v10435_v18 }
0x119b   : > { %8233 = vmatprep.subr.bf16.mxu0 %v9501_v44 }
0x11a1   : > { %7937 = vmatmul.mubr.msk.f32.vlgmr.msra.gmra.mrb[34].mxu0 %vm10914_vm12, %v4578_v9  ;;  %vm5127_vm12 = vcmp.eq.s32.totalorder %v10545_v37, %v5123_v40  ;;  %v5600_v40 = vld [vmem:[%s11043_s1] sm:$0xf] }
0x11a2   : > { %8235 = vmatpush3.bf16.msk.msra.mxu0 %vm10530_vm13, %v9502_v63  ;;  %7958 = vmatprep.mubr.msk.f32.mxu0 %vm10917_vm0, %v9497_v2  ;;  %vm10653_vm4 = vmpackc.low %vm5127_vm12, %vm5126_vm3  ;;  %vm5609_vm12 = vcmp.ge.s32.totalorder %v10435_v18, 32 }
0x11a3   : > { %8236 = vmatprep.subr.bf16.mxu0 %v9501_v44  ;;  %v5611_v46 = vsel %vm5609_vm12, %v5610_v45, %v10435_v18  ;;  %vm11041_vm12 = vcmask 31744   ;;  %v5101_v18 = vld [vmem:[%s11040_s15] sm:$0xf]  ;;  %v6154_v45 = vsub.s32 62, %v10182_v20  ;;  %s9504_s15 = smov [#allocation39]  }
0x11a4   : > { %vm5612_vm8 = vcmp.eq.s32.totalorder %v10173_v13, %v5611_v46  ;;  %vm5613_vm7 = vcmp.eq.s32.totalorder %v10337_v61, %v5611_v46  ;;  %s9319_s16 = sshll.u32 %s9504_s15, 4  ;;  %s9320_s16 = int_to_ptr.vmem [resolvable:$false] %s9319_s16 }
0x11a5   : > { %s9321_s1 = scalar_lea.vmem %s9320_s16, 32  ;;  %p9322_p4 = scmp.lt.s32.totalorder %s10844_s17, %s9320_s16 }
0x11a6   : > { %8238 = vmatpush3.bf16.msk.msra.mxu0 %vm10552_vm6, %v9502_v63  ;;  %p9323_p6 = scmp.lt.s32.totalorder %s9321_s1, %s9315_s18 }
0x11a7   : > { %8245 = vmatprep.subr.bf16.mxu0 %v9501_v44 }
0x11a8   : > { %p9324_p13 = por %p9323_p6, %p9322_p4 }
0x11aa   : > { %p9325_p0 = pnand %p9324_p13, %p9318_p9 }
0x1274   : > { %v5092_v16 = vpop.f32.mrb[34].mxu0 }
0x1275   : > { %v8327_v17 = vadd.f32 %v8326_v6, %v5092_v16  ;;  %v7938_v19 = vpop.f32.mrb[35].mxu0  ;;  %v5859_v6 = vpop.permute.xlu1 %5858 }
0x1277   : > { %v5104_v22 = vmul.f32 0.2, %v8327_v17  ;;  %vm5103_vm9 = vcmp.ge.f32.partialorder %v8327_v17, 0.0 }
0x1279   : > { %v5105_v59 = vsel %vm5103_vm9, %v8327_v17, %v5104_v22  ;;  %vm8250_vm9 = vmpackc.low %vm5613_vm7, %vm5612_vm8  ;;  %vm5614_vm7 = vcmp.eq.s32.totalorder %v10542_v3, %v5611_v46 }
0x127a   : > { %7948 = vmatmul.mubr.msk.f32.vlgmr.msra.gmra.mrb[40].mxu1 %vm4500_vm10, %v5105_v59  ;;  %7959 = vmatmul.mubr.msk.f32.vlgmr.msra.gmra.mrb[36].mxu0 %vm4500_vm10, %v5105_v59  ;;  %vm11042_vm8 = vmmov %vm11041_vm12 }
0x127b   : > { %8241 = vmatpush3.bf16.msk.msra.mxu1 %vm10639_vm14, %v9502_v63  ;;  %7969 = vmatprep.mubr.msk.f32.mxu1 %vm10917_vm0, %v9497_v2 }
0x127c   : > { %8242 = vmatprep.subr.bf16.mxu1 %v9501_v44  ;;  %7976 = vmatprep.mubr.msk.f32.mxu0 %vm10917_vm0, %v9497_v2 }
0x127f   : > { %8244 = vmatpush3.bf16.msk.msra.mxu1 %vm10653_vm4, %v9502_v63 }
0x1280   : > { %7979 = vmatprep.subr.mxu1 %v9497_v2 }
0x1282   : > { %7970 = vmatmul.mubr.msk.f32.vlgmr.msra.gmra.mrb[42].mxu1 %vm4500_vm10, %v5105_v59  ;;  %v5602_v59 = vld [vmem:[%s11045_s4] sm:$0xf] }
0x1283   : > { %7981 = vmatprep.mubr.msk.f32.mxu1 %vm10917_vm0, %v9497_v2 }
0x134d   : > { %v5205_v26 = vpop.f32.mrb[40].mxu1  ;;  %v5275_v28 = vpop.f32.mrb[36].mxu0 }
0x134e   : > { %v5350_v32 = vrot.slane %v5275_v28, 4  ;;  %v7949_v33 = vpop.f32.mrb[41].mxu1  ;;  %v7960_v34 = vpop.f32.mrb[37].mxu0  ;;  %v5604_v28 = vld [vmem:[%s11047_s11] sm:$0xf] }
0x134f   : > { %v5943_v33 = vpop.permute.xlu0 %5942 }
0x1350   : > { %v5352_v35 = vsel %vm10916_vm2, %v5205_v26, %v5350_v32  ;;  %v6024_v32 = vpop.permute.xlu1 %6023 }
0x1355   : > { %v5345_v39 = vpop.f32.mrb[42].mxu1 }
0x1356   : > { %v8246_v41 = vpack.c.bf16 %v5345_v39, %v5352_v35  ;;  %v7971_v42 = vpop.f32.mrb[43].mxu1  ;;  %v8330_v35 = vadd.f32 %v6024_v32, %v5943_v33 }
0x1358   : > { %8248 = vmatpush3.bf16.msk.msra.mxu0 %vm10583_vm15, %v8246_v41 }
0x1359   : > { %8249 = vmatprep.subr.bf16.mxu0 %v9501_v44 }
0x135b   : > { %7977 = vmatmul.mubr.msk.f32.vlgmr.msra.gmra.mrb[38].mxu0 %vm10915_vm1, %v5097_v43  ;;  %v6139_v43 = vsub.s32 62, %v10175_v14 }
0x135c   : > { %7997 = vmatprep.mubr.msk.f32.mxu0 %vm10917_vm0, %v9497_v2  ;;  %8251 = vmatpush3.bf16.msk.msra.mxu0 %vm8250_vm9, %v9502_v63  ;;  %vm5615_vm9 = vcmp.eq.s32.totalorder %v10545_v37, %v5611_v46 }
0x135d   : > { %8252 = vmatprep.subr.bf16.mxu0 %v9501_v44 }
0x142e   : > { %v5430_v48 = vpop.f32.mrb[38].mxu0 }
0x142f   : > { %v5431_v1 = vadd.f32 %v5430_v48, %v5356_v47  ;;  %v7978_v49 = vpop.f32.mrb[39].mxu0 }
0x1431   : > { %vm5434_vm3 = vcmp.ge.f32.partialorder %v5431_v1, 0.0  ;;  %v5435_v50 = vmul.f32 0.2, %v5431_v1 }
0x1433   : > { %v5436_v52 = vsel %vm5434_vm3, %v5431_v1, %v5435_v50  ;;  %vm8253_vm3 = vmpackc.low %vm5615_vm9, %vm5614_vm7 }
0x1434   : > { %7980 = vmatpush3.msk.msra.mxu1 %vm10916_vm2, %v5436_v52  ;;  %8254 = vmatpush3.bf16.msk.msra.mxu0 %vm8253_vm3, %v9502_v63 }
0x1435   : > { %7982 = vmatmul.mubr.msk.f32.vlgmr.msra.gmra.mrb[44].mxu1 %vm11041_vm12, %v5099_v51  ;;  %7984 = vmatprep.subr.mxu1 %v9497_v2  ;;  %vm5624_vm12 = vcmp.ge.s32.totalorder %v10445_v25, 32 }
0x1436   : > { %7985 = vmatpush3.msk.msra.mxu1 %vm10916_vm2, %v8327_v17  ;;  %7986 = vmatprep.mubr.msk.f32.mxu1 %vm10917_vm0, %v9497_v2  ;;  %v5626_v56 = vsel %vm5624_vm12, %v5625_v31, %v10445_v25 }
0x1437   : > { %8255 = vmatprep.subr.bf16.mxu1 %v9501_v44  ;;  %8261 = vmatprep.subr.bf16.mxu0 %v9501_v44  ;;  %vm5628_vm7 = vcmp.eq.s32.totalorder %v10337_v61, %v5626_v56  ;;  %vm5629_vm1 = vcmp.eq.s32.totalorder %v10542_v3, %v5626_v56  ;;  %vm5630_vm2 = vcmp.eq.s32.totalorder %v10545_v37, %v5626_v56 }
0x1438   : > { %vm8265_vm12 = vmpackc.low %vm5630_vm2, %vm5629_vm1  ;;  %vm11046_vm2 = vcmask 97280  }
0x143d   : > { %7987 = vmatmul.mubr.msk.f32.vlgmr.msra.gmra.mrb[44].mxu1 %vm11042_vm8, %v5101_v18  ;;  %vm5627_vm8 = vcmp.eq.s32.totalorder %v10173_v13, %v5626_v56 }
0x143e   : > { %8257 = vmatpush3.bf16.msk.msra.mxu1 %vm10530_vm13, %v9502_v63  ;;  %8008 = vmatprep.mubr.msk.f32.mxu1 %vm10917_vm0, %v9497_v2  ;;  %vm8262_vm3 = vmpackc.low %vm5628_vm7, %vm5627_vm8  ;;  %vm11044_vm8 = vcmask 1043456  }
0x143f   : > { %8258 = vmatprep.subr.bf16.mxu1 %v9501_v44  ;;  %vm11048_vm7 = vmmov %vm11044_vm8 }
0x1442   : > { %8260 = vmatpush3.bf16.msk.msra.mxu1 %vm10552_vm6, %v9502_v63 }
0x1443   : > { %8267 = vmatprep.subr.bf16.mxu1 %v9501_v44 }
0x1510   : > { %v5595_v58 = vpop.f32.mrb[44].mxu1 }
0x1511   : > { %v8329_v60 = vadd.f32 %v8328_v57, %v5595_v58  ;;  %v7988_v0 = vpop.f32.mrb[45].mxu1  ;;  %v6103_v58 = vld [vmem:[%s9728_s12] sm:$0x1] }
0x1513   : > { %v5607_v4 = vmul.f32 0.2, %v8329_v60  ;;  %vm5606_vm9 = vcmp.ge.f32.partialorder %v8329_v60, 0.0 }
0x1515   : > { %v5608_v5 = vsel %vm5606_vm9, %v8329_v60, %v5607_v4  ;;  %vm11049_vm9 = vcmask 31744  }
0x1516   : > { %7998 = vmatmul.mubr.msk.f32.vlgmr.msra.gmra.mrb[40].mxu0 %vm4500_vm10, %v5608_v5  ;;  %8009 = vmatmul.mubr.msk.f32.vlgmr.msra.gmra.mrb[46].mxu1 %vm4500_vm10, %v5608_v5 }
0x1517   : > { %8263 = vmatpush3.bf16.msk.msra.mxu0 %vm8262_vm3, %v9502_v63  ;;  %8019 = vmatprep.mubr.msk.f32.mxu0 %vm10917_vm0, %v9497_v2 }
0x1518   : > { %8264 = vmatprep.subr.bf16.mxu0 %v9501_v44  ;;  %8026 = vmatprep.mubr.msk.f32.mxu1 %vm10917_vm0, %v9497_v2 }
0x151b   : > { %8266 = vmatpush3.bf16.msk.msra.mxu0 %vm8265_vm12, %v9502_v63 }
0x151c   : > { %8029 = vmatprep.subr.mxu0 %v9497_v2 }
0x151e   : > { %8020 = vmatmul.mubr.msk.f32.vlgmr.msra.gmra.mrb[42].mxu0 %vm4500_vm10, %v5608_v5 }
0x151f   : > { %8031 = vmatprep.mubr.msk.f32.mxu0 %vm10917_vm0, %v9497_v2 }
0x15e9   : > { %v5708_v25 = vpop.f32.mrb[40].mxu0  ;;  %v5778_v7 = vpop.f32.mrb[46].mxu1 }
0x15ea   : > { %v5853_v15 = vrot.slane %v5778_v7, 4  ;;  %v7999_v29 = vpop.f32.mrb[41].mxu0  ;;  %v8010_v8 = vpop.f32.mrb[47].mxu1 }
0x15ec   : > { %v5855_v9 = vsel %vm11044_vm8, %v5708_v25, %v5853_v15 }
0x15f1   : > { %v5848_v27 = vpop.f32.mrb[42].mxu0 }
0x15f2   : > { %v8268_v11 = vpack.c.bf16 %v5848_v27, %v5855_v9  ;;  %v8021_v30 = vpop.f32.mrb[43].mxu0 }
0x15f4   : > { %8270 = vmatpush3.bf16.msk.msra.mxu1 %vm10583_vm15, %v8268_v11 }
0x15f5   : > { %8271 = vmatprep.subr.bf16.mxu1 %v9501_v44 }
0x15f7   : > { %8027 = vmatmul.mubr.msk.f32.vlgmr.msra.gmra.mrb[48].mxu1 %vm11046_vm2, %v5600_v40  ;;  %vm11051_vm2 = vmmov %vm11049_vm9 }
0x15f8   : > { %8273 = vmatpush3.bf16.msk.msra.mxu1 %vm10598_vm11, %v9502_v63  ;;  %8047 = vmatprep.mubr.msk.f32.mxu1 %vm10917_vm0, %v9497_v2  ;;  %vm6108_vm11 = vcmp.ge.s32.totalorder %v10188_v23, 32 }
0x15f9   : > { %8274 = vmatprep.subr.bf16.mxu1 %v9501_v44  ;;  %v6110_v10 = vsel %vm6108_vm11, %v6109_v62, %v10188_v23  ;;  %v6124_v23 = vsub.s32 62, %v10190_v24 }
0x15fa   : > { %vm6111_vm3 = vcmp.eq.s32.totalorder %v10173_v13, %v6110_v10  ;;  %vm6112_vm12 = vcmp.eq.s32.totalorder %v10337_v61, %v6110_v10  ;;  %vm6114_vm11 = vcmp.eq.s32.totalorder %v10545_v37, %v6110_v10 }
0x15fb   : > { %vm8278_vm8 = vmpackc.low %vm6112_vm12, %vm6111_vm3  ;;  %vm6138_vm12 = vcmp.ge.s32.totalorder %v10175_v14, 32 }
0x15fc   : > { %8276 = vmatpush3.bf16.msk.msra.mxu1 %vm10626_vm5, %v9502_v63  ;;  %vm11050_vm5 = vmmov %vm11048_vm7  ;;  %v6140_v47 = vsel %vm6138_vm12, %v6139_v43, %v10175_v14 }
0x15fd   : > { %8283 = vmatprep.subr.bf16.mxu1 %v9501_v44 }
0x16ca   : > { %v5933_v16 = vpop.f32.mrb[48].mxu1 }
0x16cb   : > { %v5934_v17 = vadd.f32 %v5933_v16, %v5859_v6  ;;  %v8028_v19 = vpop.f32.mrb[49].mxu1 }
0x16cd   : > { %vm5937_vm1 = vcmp.ge.f32.partialorder %v5934_v17, 0.0  ;;  %v5938_v22 = vmul.f32 0.2, %v5934_v17 }
0x16cf   : > { %v5939_v26 = vsel %vm5937_vm1, %v5934_v17, %v5938_v22  ;;  %vm6113_vm1 = vcmp.eq.s32.totalorder %v10542_v3, %v6110_v10 }
0x16d0   : > { %8030 = vmatpush3.msk.msra.mxu0 %vm11048_vm7, %v5939_v26  ;;  %vm8281_vm7 = vmpackc.low %vm6114_vm11, %vm6113_vm1 }
0x16d1   : > { %8032 = vmatmul.mubr.msk.f32.vlgmr.msra.gmra.mrb[44].mxu0 %vm11049_vm9, %v5602_v59  ;;  %8034 = vmatprep.subr.mxu0 %v9497_v2  ;;  %vm6123_vm9 = vcmp.ge.s32.totalorder %v10190_v24, 32 }
0x16d2   : > { %8035 = vmatpush3.msk.msra.mxu0 %vm11050_vm5, %v8329_v60  ;;  %8036 = vmatprep.mubr.msk.f32.mxu0 %vm10917_vm0, %v9497_v2  ;;  %v6125_v34 = vsel %vm6123_vm9, %v6124_v23, %v10190_v24  ;;  %v6676_v60 = vpop.permute.xlu0 %6675 }
0x16d3   : > { %8277 = vmatprep.subr.bf16.mxu0 %v9501_v44  ;;  %vm6126_vm5 = vcmp.eq.s32.totalorder %v10173_v13, %v6125_v34  ;;  %vm6127_vm3 = vcmp.eq.s32.totalorder %v10337_v61, %v6125_v34  ;;  %vm6128_vm11 = vcmp.eq.s32.totalorder %v10542_v3, %v6125_v34 }
0x16d4   : > { %vm8284_vm1 = vmpackc.low %vm6127_vm3, %vm6126_vm5  ;;  %vm6141_vm5 = vcmp.eq.s32.totalorder %v10173_v13, %v6140_v47  ;;  %vm6142_vm3 = vcmp.eq.s32.totalorder %v10337_v61, %v6140_v47 }
0x16d9   : > { %8037 = vmatmul.mubr.msk.f32.vlgmr.msra.gmra.mrb[44].mxu0 %vm11051_vm2, %v5604_v28  ;;  %vm6153_vm2 = vcmp.ge.s32.totalorder %v10182_v20, 32 }
0x16da   : > { %8279 = vmatpush3.bf16.msk.msra.mxu0 %vm8278_vm8, %v9502_v63  ;;  %8058 = vmatprep.mubr.msk.f32.mxu0 %vm10917_vm0, %v9497_v2  ;;  %v6155_v48 = vsel %vm6153_vm2, %v6154_v45, %v10182_v20 }
0x16db   : > { %8280 = vmatprep.subr.bf16.mxu0 %v9501_v44  ;;  %vm6156_vm12 = vcmp.eq.s32.totalorder %v10173_v13, %v6155_v48 }
0x16de   : > { %8282 = vmatpush3.bf16.msk.msra.mxu0 %vm8281_vm7, %v9502_v63  ;;  %vm6129_vm7 = vcmp.eq.s32.totalorder %v10545_v37, %v6125_v34 }
0x16df   : > { %8289 = vmatprep.subr.bf16.mxu0 %v9501_v44  ;;  %vm8287_vm9 = vmpackc.low %vm6129_vm7, %vm6128_vm11  ;;  %vm6144_vm11 = vcmp.eq.s32.totalorder %v10545_v37, %v6140_v47  ;;  %vm6158_vm7 = vcmp.eq.s32.totalorder %v10542_v3, %v6155_v48 }
0x17ac   : > { %v6098_v39 = vpop.f32.mrb[44].mxu0 }
0x17ad   : > { %v8331_v41 = vadd.f32 %v8330_v35, %v6098_v39  ;;  %v8038_v42 = vpop.f32.mrb[45].mxu0 }
0x17af   : > { %vm6105_vm8 = vcmp.ge.f32.partialorder %v8331_v41, 0.0  ;;  %v6106_v46 = vmul.f32 0.2, %v8331_v41 }
0x17b1   : > { %v6107_v24 = vsel %vm6105_vm8, %v8331_v41, %v6106_v46  ;;  %vm6157_vm8 = vcmp.eq.s32.totalorder %v10337_v61, %v6155_v48 }
0x17b2   : > { %8048 = vmatmul.mubr.msk.f32.vlgmr.msra.gmra.mrb[50].mxu1 %vm4500_vm10, %v6107_v24  ;;  %8059 = vmatmul.mubr.msk.f32.vlgmr.msra.gmra.mrb[46].mxu0 %vm4500_vm10, %v6107_v24  ;;  %vm8302_vm2 = vmpackc.low %vm6157_vm8, %vm6156_vm12 }
0x17b3   : > { %8285 = vmatpush3.bf16.msk.msra.mxu1 %vm8284_vm1, %v9502_v63  ;;  %8291 = vmatpush3.bf16.msk.msra.mxu0 %vm10530_vm13, %v9502_v63  ;;  %vm8296_vm13 = vmpackc.low %vm6142_vm3, %vm6141_vm5  ;;  %vm6143_vm1 = vcmp.eq.s32.totalorder %v10542_v3, %v6140_v47  ;;  %vm11052_vm5 = vmmov 0   ;;  %vm6760_vm3 = vcmask 253952  }
0x17b4   : > { %8286 = vmatprep.subr.bf16.mxu1 %v9501_v44  ;;  %8292 = vmatprep.subr.bf16.mxu0 %v9501_v44 }
0x17b5   : > { %8069 = vmatprep.mubr.msk.f32.mxu1 %vm10917_vm0, %v9497_v2  ;;  %8080 = vmatprep.mubr.msk.f32.mxu0 %vm10917_vm0, %v9497_v2  ;;  %vm6159_vm0 = vcmp.eq.s32.totalorder %v10545_v37, %v6155_v48 }
0x17b7   : > { %8288 = vmatpush3.bf16.msk.msra.mxu1 %vm8287_vm9, %v9502_v63  ;;  %8294 = vmatpush3.bf16.msk.msra.mxu0 %vm10552_vm6, %v9502_v63  ;;  %vm8299_vm6 = vmpackc.low %vm6144_vm11, %vm6143_vm1 }
0x17b8   : > { %8295 = vmatprep.subr.bf16.mxu1 %v9501_v44  ;;  %8301 = vmatprep.subr.bf16.mxu0 %v9501_v44  ;;  %vm8305_vm9 = vmpackc.low %vm6159_vm0, %vm6158_vm7  ;;  %vm11053_vm0 = vcmask 1043456  }
0x17ba   : > { %8070 = vmatmul.mubr.msk.f32.vlgmr.msra.gmra.mrb[52].mxu1 %vm4500_vm10, %v6107_v24  ;;  %8081 = vmatmul.mubr.msk.f32.vlgmr.msra.gmra.mrb[48].mxu0 %vm4500_vm10, %v6107_v24 }
0x17bb   : > { %8297 = vmatpush3.bf16.msk.msra.mxu1 %vm8296_vm13, %v9502_v63  ;;  %8303 = vmatpush3.bf16.msk.msra.mxu0 %vm8302_vm2, %v9502_v63 }
0x17bc   : > { %8298 = vmatprep.subr.bf16.mxu1 %v9501_v44  ;;  %8304 = vmatprep.subr.bf16.mxu0 %v9501_v44 }
0x17bd   : > { %8091 = vmatprep.mubr.msk.f32.mxu1 %vm11052_vm5, %v9497_v2  ;;  %8102 = vmatprep.mubr.msk.f32.mxu0 %vm11052_vm5, %v9497_v2 }
0x17bf   : > { %8300 = vmatpush3.bf16.msk.msra.mxu1 %vm8299_vm6, %v9502_v63  ;;  %8306 = vmatpush3.bf16.msk.msra.mxu0 %vm8305_vm9, %v9502_v63 }
0x17c0   : > { %8307 = vmatprep.subr.bf16.mxu1 %v9501_v44  ;;  %8313 = vmatprep.subr.bf16.mxu0 %v9501_v44 }
0x17c2   : > { %8092 = vmatmul.mubr.msk.f32.vlgmr.msra.gmra.mrb[54].mxu1 %vm4500_vm10, %v6107_v24  ;;  %8103 = vmatmul.mubr.msk.f32.vlgmr.msra.gmra.mrb[50].mxu0 %vm4500_vm10, %v6107_v24 }
0x17c3   : > { %8309 = vmatpush3.bf16.msk.msra.mxu1 %vm10639_vm14, %v9502_v63  ;;  %8113 = vmatprep.mubr.msk.f32.mxu1 %vm11052_vm5, %v9497_v2  ;;  %vm11054_vm14 = vmmov %vm11053_vm0 }
0x17c4   : > { %8310 = vmatprep.subr.bf16.mxu1 %v9501_v44  ;;  %8124 = vmatprep.mubr.msk.f32.mxu0 %vm11052_vm5, %v9497_v2 }
0x17c7   : > { %8312 = vmatpush3.bf16.msk.msra.mxu1 %vm10653_vm4, %v9502_v63  ;;  %vm6682_vm4 = vcmask 228352  }
0x17ca   : > { %8114 = vmatmul.mubr.msk.f32.vlgmr.msra.gmra.mrb[56].mxu1 %vm4500_vm10, %v6107_v24  ;;  %vm11055_vm10 = vmmov %vm11053_vm0 }
0x1885   : > { %v6237_v14 = vpop.f32.mrb[50].mxu1  ;;  %v6307_v20 = vpop.f32.mrb[46].mxu0 }
0x1886   : > { %v6662_v61 = vrot.slane %v6307_v20, 4  ;;  %v8049_v36 = vpop.f32.mrb[51].mxu1  ;;  %v8060_v3 = vpop.f32.mrb[47].mxu0 }
0x1888   : > { %v6670_v37 = vsel %vm11053_vm0, %v6237_v14, %v6662_v61 }
0x188d   : > { %v6377_v38 = vpop.f32.mrb[52].mxu1  ;;  %v6447_v12 = vpop.f32.mrb[48].mxu0 }
0x188e   : > { %v6665_v1 = vrot.slane %v6447_v12, 4  ;;  %v8071_v49 = vpop.f32.mrb[53].mxu1  ;;  %v8082_v50 = vpop.f32.mrb[49].mxu0 }
0x1890   : > { %v6671_v2 = vsel %vm11054_vm14, %v6377_v38, %v6665_v1 }
0x1891   : > { %v8314_v51 = vpack.c.bf16 %v6671_v2, %v6670_v37 }
0x1893   : > { %8315 = vmatpush3.bf16.msra.mxu0 %v8314_v51 }
0x1894   : > { %8316 = vmatprep.subr.bf16.mxu0 %v9501_v44  ;;  %v6680_v44 = vsub.s32 0, %v10173_v13 }
0x1895   : > { %v6517_v63 = vpop.f32.mrb[54].mxu1  ;;  %v6587_v21 = vpop.f32.mrb[50].mxu0 }
0x1896   : > { %v6668_v52 = vrot.slane %v6587_v21, 4  ;;  %v8093_v18 = vpop.f32.mrb[55].mxu1  ;;  %v8104_v31 = vpop.f32.mrb[51].mxu0  ;;  %v6681_v0 = vrot.slane %v6676_v60, %v6680_v44 }
0x1898   : > { %v6672_v53 = vsel %vm11055_vm10, %v6517_v63, %v6668_v52 }
0x189d   : > { %v6657_v55 = vpop.f32.mrb[56].mxu1 }
0x189e   : > { %v8317_v56 = vpack.c.bf16 %v6657_v55, %v6672_v53  ;;  %v8115_v57 = vpop.f32.mrb[57].mxu1 }
0x18a0   : > { %8319 = vmatpush3.bf16.msk.msra.mxu0 %vm10583_vm15, %v8317_v56 }
0x18a3   : > { %8125 = vmatmul.mubr.msk.f32.vlgmr.msra.gmra.mrb[52].mxu0 %vm6682_vm4, %v6103_v58 }
0x1976   : > { %v6755_v4 = vpop.f32.mrb[52].mxu0 }
0x1977   : > { %v6756_v5 = vadd.f32 %v6755_v4, %v6681_v0  ;;  %v8126_v25 = vpop.f32.mrb[53].mxu0 }
0x1979   : > { %8667 = vtanh.f32 %v6756_v5 }
0x1983   : > { %v8668_v54 = vpop.eup %8667 }
0x1984   : > { %6761 = vst.msk [vmem:[%s1645_s14] sm:$0x1] %vm6760_vm3, %v8668_v54 }
0x1985   : > { %9328 = shalt.err (!%p9325_p0)
}
0x1986   : > { %s9329_s22 = scalar_lea.hbm %s10842_s21, 16  ;;  %s9333_s4 = scalar_lea.hbm %s11056_s13, 32 }
0x1987   : > { %p9330_p2 = scmp.ne.s32.totalorder %s10842_s21, %s9329_s22  ;;  %p9334_p11 = scmp.lt.u32.totalorder %s10842_s21, %s11056_s13 }
0x1988   : > { %p9335_p3 = scmp.lt.u32.totalorder %s9333_s4, %s9329_s22  ;;  %p9337_p5 = scmp.lt.u32.totalorder %s9329_s22, %s10842_s21 }
0x1989   : > { %p9331_p8 = pnand %p9330_p2, %p11057_p7 }
0x198a   : > { %p9336_p12 = por %p9335_p3, %p9334_p11 }
0x198b   : > { %p9332_p10 = pneg %p9331_p8 }
0x198c   : > { %p9338_p1 = por %p9337_p5, %p9336_p12 }
0x198e   : > { %p9339_p9 = pnand %p9338_p1, %p9332_p10 }
0x1990   : > { %9342 = shalt.err (!%p9339_p9)
}
0x1991   : > { %8434 = dma.vmem_to_hbm [thread:$0]  (%p11057_p7), %s10844_s17, 16, %s10842_s21, %s6763_s20  }
0x1992 PF: > { %s6787_s11 = sand.u32 1, %s9413_s7   ;;  %p11058_p4 = scmp.ne.s32.totalorder %s10984_s6, 0 }
0x1993   : > { %p11059_p6 = scmp.ge.s32.totalorder %s9425_s10, 2  ;;  %s6788_s3 = scalar_lea.sflag [#allocation5], %s6787_s11 }
0x1995   : > { %p8508_p13 = pnand %p11059_p6, %p11058_p4 }
0x1997   : > { %9408 = dma.done.wait (!%p8508_p13), %s6788_s3, 16  }
0x1998   : > { %9410 = vsyncadd (!%p8508_p13), %s6788_s3, 4294967280  ;;  %p117_p0 = scmp.ge.s32.totalorder %s10032_s2, 4   ;;  %s11060_s7 = smov %s9417_s0 }
0x1999   : > { %s11061_s0 = smov %s9421_s8  ;;  %s11062_s8 = smov %s10043_s5 }
0x199a   : > { %s11063_s10 = smov %s10032_s2  ;;  %119 = sbr.rel (!%p117_p0) target bundleno = 107 (0x6b), region = 378 }
0x19a1   :  { %6792 = vsyncpa [#allocation4], 1 }
0x19a2   :  { %6794 = vsyncpa [#allocation4 + $0x1], 1 }
0x19a3   :  { %6795 = vsyncpa [#allocation7], 1 }
0x19a4   :  { %6796 = vsyncpa [#allocation10], 1 }
0x19a5   :  { %6797 = vsyncpa [#allocation13], 1 }
0x19a6   :  { %6798 = vsyncpa [#allocation16], 1 }
0x19a7   :  { %6799 = vsyncpa [#allocation19], 1 }
0x19a8   :  { %6800 = vsyncpa [#allocation22], 1 }
0x19a9   :  { %6801 = vsyncpa [#allocation25], 1 }
0x19aa   :  { %6802 = vsyncpa [#allocation28], 1 }
0x19ab   :  { %6803 = vsyncpa [#allocation31], 1 }
0x19ac   :  { %6804 = vsyncpa [#allocation34], 1 }
0x19ad   :  { %6805 = vsyncpa [#allocation37], 1 }
0x19ae   :  { %6806 = vsyncpa [#allocation5], 1 }
0x19af   :  { %6808 = vsyncpa [#allocation5 + $0x1], 1 }

</bundles_post_ra>
